<compile_context>
chip_gen: v7x
topology: tpu7x:2x2x1
jax: 0.10.0
libtpu: 0.0.40
codegen_flags: <defaults>
</compile_context>

<pallas_src>
import functools
import math

import jax
import jax.numpy as jnp
from jax.experimental import pallas as pl
from jax.experimental.pallas import tpu as pltpu

# ----------------------------- small synthetic config -----------------------
B          = 2
IMSIZE     = 32
PATCH      = 16
IMG_C      = 3
D_V        = 32          # visual transformer width
HEADS_V    = 2
V_LAYERS   = 4
EXTRACT_LAYER = [1, 3]
CE_LAYER   = [2]         # single CE layer (key-mask CE assumes no re-drop of dead tokens)
D_T        = 16          # text transformer width
HEADS_T    = 2
T_LAYERS   = 2
EMBED_DIM  = 16          # text projection output dim (FeatureResizer input)
TXT_LEN    = 4
VOCAB      = 49
NECK_DIM   = 256
CE_KEEP_RATE = 0.7

LN_EPS     = 1e-5
MM_DTYPE   = jnp.bfloat16   # MXU operand dtype for weight matmuls (f32 accumulate)
PACK_LANES = 128            # lane width of the packed per-block parameter buffer
NEG_INF    = -1e30


# ----------------------------- in-kernel helpers ------------------------------
def _ln(x, g, b, eps):
    # x: (rows, D) f32; g/b: (1, D) f32
    mu = jnp.mean(x, axis=-1, keepdims=True)
    var = jnp.mean((x - mu) ** 2, axis=-1, keepdims=True)
    return (x - mu) * jax.lax.rsqrt(var + eps) * g + b


def _res_block(x, add_mask, qkvw, outw, fcw, prw, lp, *, n_heads, eps, score_dims=None):
    """One CLIP residual attention block on an (L, D) f32 activation.

    add_mask : (1, L) or (L, L) f32 additive attention (key) mask.
    lp       : (8, 128) packed params: rows = ln1_g, ln1_b, ln2_g, ln2_b,
               out_b, proj_b, fc_b[:4D], qkv_b[:3D].
    Returns (y, ce_score) -- ce_score is (1, lens_s) (head/query-averaged
    text->patch attention) when score_dims=(lens_t, lens_s), else None.
    """
    L, D = x.shape
    Dh = D // n_heads
    scale = 1.0 / math.sqrt(Dh)
    ln1g, ln1b = lp[0:1, :D], lp[1:2, :D]
    ln2g, ln2b = lp[2:3, :D], lp[3:4, :D]
    outb, prb = lp[4:5, :D], lp[5:6, :D]
    fcb, qkvb = lp[6:7, :4 * D], lp[7:8, :3 * D]

    h = _ln(x, ln1g, ln1b, eps)
    qkv = jnp.dot(h.astype(MM_DTYPE), qkvw, preferred_element_type=jnp.float32) + qkvb

    heads = []
    score = None
    for hh in range(n_heads):
        q = qkv[:, hh * Dh:(hh + 1) * Dh]
        k = qkv[:, D + hh * Dh:D + (hh + 1) * Dh]
        v = qkv[:, 2 * D + hh * Dh:2 * D + (hh + 1) * Dh]
        s = jnp.dot(q, k.T, preferred_element_type=jnp.float32) * scale + add_mask
        s = s - jnp.max(s, axis=-1, keepdims=True)
        e = jnp.exp(s)
        den = jnp.sum(e, axis=-1, keepdims=True)
        p = e * pl.reciprocal(den, approx=True)                  # EUP slot
        heads.append(jnp.dot(p, v, preferred_element_type=jnp.float32))
        if score_dims is not None:
            lens_t, lens_s = score_dims
            # exact normalization on the CE path (ordering-sensitive)
            e_t = e[L - lens_t:, 1:1 + lens_s]                   # text queries -> patch keys
            d_t = den[L - lens_t:, :]
            sc_h = jnp.sum(e_t / d_t, axis=0, keepdims=True)     # (1, lens_s)
            score = sc_h if score is None else score + sc_h

    attn = jnp.concatenate(heads, axis=-1) if n_heads > 1 else heads[0]   # (L, D)
    attn_out = jnp.dot(attn.astype(MM_DTYPE), outw,
                       preferred_element_type=jnp.float32) + outb
    x1 = x + attn_out
    h2 = _ln(x1, ln2g, ln2b, eps)
    hf = jnp.dot(h2.astype(MM_DTYPE), fcw, preferred_element_type=jnp.float32) + fcb
    hf = hf * jax.nn.sigmoid(1.702 * hf)                          # CLIP QuickGELU
    y = x1 + jnp.dot(hf.astype(MM_DTYPE), prw, preferred_element_type=jnp.float32) + prb

    if score_dims is not None:
        lens_t, _ = score_dims
        score = score / float(n_heads * lens_t)                   # head + query average
    return y, score


# ----------------------------- fused stack kernels ----------------------------
def _visual_stack_kernel(patches_ref, txt_ref, convw_ref, embp_ref,
                         qkvw_ref, outw_ref, fcw_ref, prw_ref, lp_ref,
                         neckw_ref, w1_ref, w2_ref, w3_ref, tailb_ref,
                         o_ref, x_sc, km_sc,
                         *, n_heads, lens_t, n_drop, ce_layers, eps):
    l = pl.program_id(1)
    n_layers = pl.num_programs(1)
    Np = patches_ref.shape[1]
    L, D = x_sc.shape
    lens_s = L - lens_t - 1
    want_ce = (n_drop > 0) and (len(ce_layers) > 0)

    # ---- l == 0: patch embed + cls + pos + ln_pre + text concat, init key-mask
    @pl.when(l == 0)
    def _():
        w = convw_ref[...]
        feat = jnp.dot(patches_ref[0].astype(w.dtype), w,
                       preferred_element_type=jnp.float32)          # (Np, D)
        ep = embp_ref[...]                                          # (Np+4, D)
        cls_e = ep[0:1, :]
        pos = ep[1:2 + Np, :]                                       # (1+Np, D)
        lng = ep[2 + Np:3 + Np, :]
        lnb = ep[3 + Np:4 + Np, :]
        cls_row = _ln(cls_e + pos[0:1, :], lng, lnb, eps)
        pat_rows = _ln(feat + pos[1:, :], lng, lnb, eps)
        x_sc[...] = jnp.concatenate(
            [cls_row, pat_rows, txt_ref[0].astype(jnp.float32)], axis=0)
        km_sc[...] = jnp.zeros(km_sc.shape, jnp.float32)

    # ---- one residual attention block per grid step (VMEM-resident activation)
    x = x_sc[...]
    km = km_sc[...]                                                 # (1, L) key mask
    y, score = _res_block(
        x, km, qkvw_ref[0], outw_ref[0], fcw_ref[0], prw_ref[0], lp_ref[0],
        n_heads=n_heads, eps=eps,
        score_dims=(lens_t, lens_s) if want_ce else None)
    x_sc[...] = y

    # ---- in-kernel candidate elimination: mask the lowest-scoring patch keys
    if want_ce:
        is_ce = (l == ce_layers[0])
        for c in ce_layers[1:]:
            is_ce = is_ce | (l == c)

        @pl.when(is_ce)
        def _():
            col_s = jax.lax.broadcasted_iota(jnp.int32, (1, lens_s), 1).astype(jnp.float32)
            col_l = jax.lax.broadcasted_iota(jnp.int32, (1, L), 1).astype(jnp.float32)
            km2 = km_sc[...]
            s_work = score
            for _ in range(n_drop):                                 # static, tiny
                mval = jnp.min(s_work, axis=-1, keepdims=True)
                cand = jnp.where(s_work == mval, col_s, jnp.float32(1e9))
                idx = jnp.min(cand, axis=-1, keepdims=True)         # first argmin, (1,1)
                km2 = jnp.where(col_l == (idx + 1.0), jnp.float32(NEG_INF), km2)
                s_work = jnp.where(col_s == idx, jnp.float32(1e30), s_work)
            km_sc[...] = km2

    # ---- l == last: cls token -> neck -> 3-layer bbox MLP -> sigmoid
    @pl.when(l == n_layers - 1)
    def _():
        cls_tok = y[0:1, :]                                         # (1, D)
        nb = tailb_ref[0:1, :]
        b1 = tailb_ref[1:2, :]
        b2 = tailb_ref[2:3, :]
        b3 = tailb_ref[3:4, :4]
        t = jnp.dot(cls_tok.astype(MM_DTYPE), neckw_ref[...],
                    preferred_element_type=jnp.float32) + nb
        t = jnp.maximum(jnp.dot(t.astype(MM_DTYPE), w1_ref[...],
                                preferred_element_type=jnp.float32) + b1, 0.0)
        t = jnp.maximum(jnp.dot(t.astype(MM_DTYPE), w2_ref[...],
                                preferred_element_type=jnp.float32) + b2, 0.0)
        box = jax.nn.sigmoid(jnp.dot(t.astype(MM_DTYPE), w3_ref[...],
                                     preferred_element_type=jnp.float32) + b3)
        o_ref[0] = box.astype(o_ref.dtype)                          # (1, 4)


def _text_stack_kernel(x_ref, qkvw_ref, outw_ref, fcw_ref, prw_ref, lp_ref,
                       headp_ref, proj_ref, rfcw_ref, o_ref, x_sc,
                       *, n_heads, eps):
    l = pl.program_id(1)
    n_layers = pl.num_programs(1)
    T, Dt = x_sc.shape
    Dv = rfcw_ref.shape[1]

    @pl.when(l == 0)
    def _():
        x_sc[...] = x_ref[0].astype(jnp.float32)

    # CLIP causal mask, built in-kernel (no (T,T) DMA)
    row = jax.lax.broadcasted_iota(jnp.int32, (T, T), 0)
    col = jax.lax.broadcasted_iota(jnp.int32, (T, T), 1)
    causal = jnp.where(col > row, jnp.float32(NEG_INF), jnp.float32(0.0))

    x = x_sc[...]
    y, _ = _res_block(x, causal, qkvw_ref[0], outw_ref[0], fcw_ref[0], prw_ref[0],
                      lp_ref[0], n_heads=n_heads, eps=eps)
    x_sc[...] = y

    # ---- l == last: ln_final -> text_projection -> FeatureResizer (fc + LN 1e-12)
    @pl.when(l == n_layers - 1)
    def _():
        hp = headp_ref[...]                                         # (8, 128)
        lnf_g, lnf_b = hp[0:1, :Dt], hp[1:2, :Dt]
        rlng, rlnb, rfcb = hp[2:3, :Dv], hp[3:4, :Dv], hp[4:5, :Dv]
        hfin = _ln(y, lnf_g, lnf_b, eps)
        tproj = jnp.dot(hfin.astype(MM_DTYPE), proj_ref[...],
                        preferred_element_type=jnp.float32)         # (T, EMBED)
        r = jnp.dot(tproj.astype(MM_DTYPE), rfcw_ref[...],
                    preferred_element_type=jnp.float32) + rfcb      # (T, Dv)
        r = _ln(r, rlng, rlnb, 1e-12)
        o_ref[0] = r.astype(o_ref.dtype)


# ----------------------------- pallas_call wrappers ---------------------------
def _shared_spec(arr):
    nd = arr.ndim
    return pl.BlockSpec(arr.shape, lambda b, l, _nd=nd: (0,) * _nd)


def _per_layer_spec(arr):
    nd = arr.ndim
    return pl.BlockSpec((1,) + arr.shape[1:],
                        lambda b, l, _nd=nd: (l,) + (0,) * (_nd - 1))


def _batch_spec(arr):
    nd = arr.ndim
    return pl.BlockSpec((1,) + arr.shape[1:],
                        lambda b, l, _nd=nd: (b,) + (0,) * (_nd - 1))


_SEMANTICS = pltpu.CompilerParams(dimension_semantics=("parallel", "arbitrary"))


def text_stack(x_embed, pt):
    Bb, T, Dt = x_embed.shape
    Dv = pt["resize_fc_w"].shape[1]
    n_layers = pt["qkv_w"].shape[0]
    kernel = functools.partial(_text_stack_kernel, n_heads=HEADS_T, eps=LN_EPS)
    return pl.pallas_call(
        kernel,
        grid=(Bb, n_layers),
        in_specs=[
            _batch_spec(x_embed),
            _per_layer_spec(pt["qkv_w"]), _per_layer_spec(pt["out_w"]),
            _per_layer_spec(pt["fc_w"]), _per_layer_spec(pt["proj_w"]),
            _per_layer_spec(pt["lp"]),
            _shared_spec(pt["head_p"]), _shared_spec(pt["text_projection"]),
            _shared_spec(pt["resize_fc_w"]),
        ],
        out_specs=pl.BlockSpec((1, T, Dv), lambda b, l: (b, 0, 0)),
        out_shape=jax.ShapeDtypeStruct((Bb, T, Dv), jnp.float32),
        scratch_shapes=[pltpu.VMEM((T, Dt), jnp.float32)],
        compiler_params=_SEMANTICS,
    )(x_embed, pt["qkv_w"], pt["out_w"], pt["fc_w"], pt["proj_w"], pt["lp"],
      pt["head_p"], pt["text_projection"], pt["resize_fc_w"])


def visual_stack(patches, txt_tokens, pv, ptail, lens_t, n_drop, ce_layers, n_layers_run):
    Bb, Np, _ = patches.shape
    T = txt_tokens.shape[1]
    Dv = pv["embed_p"].shape[1]
    L = 1 + Np + T
    kernel = functools.partial(
        _visual_stack_kernel, n_heads=HEADS_V, lens_t=lens_t,
        n_drop=n_drop, ce_layers=tuple(ce_layers), eps=LN_EPS)
    out = pl.pallas_call(
        kernel,
        grid=(Bb, n_layers_run),
        in_specs=[
            _batch_spec(patches), _batch_spec(txt_tokens),
            _shared_spec(pv["conv1_w"]), _shared_spec(pv["embed_p"]),
            _per_layer_spec(pv["qkv_w"]), _per_layer_spec(pv["out_w"]),
            _per_layer_spec(pv["fc_w"]), _per_layer_spec(pv["proj_w"]),
            _per_layer_spec(pv["lp"]),
            _shared_spec(ptail["neck_w"]), _shared_spec(ptail["w1"]),
            _shared_spec(ptail["w2"]), _shared_spec(ptail["w3"]),
            _shared_spec(ptail["tail_b"]),
        ],
        out_specs=pl.BlockSpec((1, 1, 4), lambda b, l: (b, 0, 0)),
        out_shape=jax.ShapeDtypeStruct((Bb, 1, 4), jnp.float32),
        scratch_shapes=[pltpu.VMEM((L, Dv), jnp.float32),      # resident activation
                        pltpu.VMEM((1, L), jnp.float32)],      # CE key-mask
        compiler_params=_SEMANTICS,
    )(patches, txt_tokens, pv["conv1_w"], pv["embed_p"],
      pv["qkv_w"], pv["out_w"], pv["fc_w"], pv["proj_w"], pv["lp"],
      ptail["neck_w"], ptail["w1"], ptail["w2"], ptail["w3"], ptail["tail_b"])
    return out[:, 0, :]                                         # (B, 4)


# ----------------------------- model composition ------------------------------
def fsvg_forward(params, image, text_ids, ce_keep_rate):
    pt = params["text"]
    # TODO(synk): token-embedding gather + pos-add stay as a single XLA gather/add.
    x_txt = jnp.take(pt["token_embedding"], text_ids, axis=0) + pt["positional_embedding"][None]
    txt_feat = text_stack(x_txt, pt)                            # (B, T, Dv)

    Bb, C, H, W = image.shape
    P = PATCH
    gh, gw = H // P, W // P
    # im2col for conv1 (kernel == stride == patch, no bias) -- plain-JAX reshape glue
    patches = image.reshape(Bb, C, gh, P, gw, P).transpose(0, 2, 4, 1, 3, 5)
    patches = patches.reshape(Bb, gh * gw, C * P * P)

    lens_t = txt_feat.shape[1]
    lens_s = gh * gw
    lens_keep = math.ceil(ce_keep_rate * lens_s) if ce_keep_rate < 1 else lens_s
    n_drop = lens_s - lens_keep
    n_layers_run = max(EXTRACT_LAYER) + 1
    return visual_stack(patches, txt_feat, params["visual"], params["tail"],
                        lens_t, n_drop, CE_LAYER, n_layers_run)  # (B, 4)


# ----------------------------- deterministic parameter init ------------------
def init_params(key):
    keys = iter(jax.random.split(key, 512))

    def nk():
        return next(keys)

    def w_init(shape):
        return jax.random.normal(nk(), shape, jnp.float32) * 0.02

    def make_stack(d, n_layers):
        lp = jnp.zeros((n_layers, 8, PACK_LANES), jnp.float32)
        lp = lp.at[:, 0, :d].set(1.0)                          # ln1_g
        lp = lp.at[:, 2, :d].set(1.0)                          # ln2_g
        lp = lp.at[:, 4, :d].set(w_init((n_layers, d)))        # out_b
        lp = lp.at[:, 5, :d].set(w_init((n_layers, d)))        # proj_b
        lp = lp.at[:, 6, :4 * d].set(w_init((n_layers, 4 * d)))  # fc_b
        lp = lp.at[:, 7, :3 * d].set(w_init((n_layers, 3 * d)))  # qkv_b
        return dict(
            qkv_w=w_init((n_layers, d, 3 * d)).astype(MM_DTYPE),
            out_w=w_init((n_layers, d, d)).astype(MM_DTYPE),
            fc_w=w_init((n_layers, d, 4 * d)).astype(MM_DTYPE),
            proj_w=w_init((n_layers, 4 * d, d)).astype(MM_DTYPE),
            lp=lp)

    n_patches = (IMSIZE // PATCH) ** 2
    cpp = IMG_C * PATCH * PATCH

    # visual: conv1 weight already flattened+transposed (hoisted layout work)
    embed_p = jnp.zeros((n_patches + 4, D_V), jnp.float32)
    embed_p = embed_p.at[0, :].set(w_init((D_V,)))                           # cls embedding
    embed_p = embed_p.at[1:2 + n_patches, :].set(w_init((1 + n_patches, D_V)))  # pos embedding
    embed_p = embed_p.at[2 + n_patches, :].set(1.0)                          # ln_pre gain
    visual = dict(conv1_w=w_init((cpp, D_V)).astype(MM_DTYPE),
                  embed_p=embed_p, **make_stack(D_V, V_LAYERS))

    # text: transformer stack + fused head params
    head_p = jnp.zeros((8, PACK_LANES), jnp.float32)
    head_p = head_p.at[0, :D_T].set(1.0)                       # ln_final gain
    head_p = head_p.at[2, :D_V].set(1.0)                       # resizer LN gain
    head_p = head_p.at[4, :D_V].set(w_init((D_V,)))            # resizer fc bias
    text = dict(
        token_embedding=w_init((VOCAB, D_T)),
        positional_embedding=w_init((TXT_LEN, D_T)),
        text_projection=w_init((D_T, EMBED_DIM)).astype(MM_DTYPE),
        resize_fc_w=w_init((EMBED_DIM, D_V)).astype(MM_DTYPE),
        head_p=head_p,
        **make_stack(D_T, T_LAYERS))

    # tail: neck linear + bbox MLP; biases packed into one (4, 256) buffer
    tail_b = jnp.zeros((4, NECK_DIM), jnp.float32)
    tail_b = tail_b.at[0, :].set(w_init((NECK_DIM,)))          # neck bias
    tail_b = tail_b.at[1, :].set(w_init((NECK_DIM,)))          # bbox layer1 bias
    tail_b = tail_b.at[2, :].set(w_init((NECK_DIM,)))          # bbox layer2 bias
    tail_b = tail_b.at[3, :4].set(w_init((4,)))                # bbox layer3 bias
    tail = dict(neck_w=w_init((D_V, NECK_DIM)).astype(MM_DTYPE),
                w1=w_init((NECK_DIM, NECK_DIM)).astype(MM_DTYPE),
                w2=w_init((NECK_DIM, NECK_DIM)).astype(MM_DTYPE),
                w3=w_init((NECK_DIM, 4)).astype(MM_DTYPE),
                tail_b=tail_b)

    return dict(visual=visual, text=text, tail=tail)


# ----------------------------- main ------------------------------------------
if __name__ == "__main__":
    key = jax.random.PRNGKey(0)
    pkey, ikey, tkey = jax.random.split(key, 3)
    params = init_params(pkey)

    image = jax.random.normal(ikey, (B, IMG_C, IMSIZE, IMSIZE), jnp.float32)   # NCHW
    text_ids = jax.random.randint(tkey, (B, TXT_LEN), 0, VOCAB)

    fwd = jax.jit(functools.partial(fsvg_forward, ce_keep_rate=CE_KEEP_RATE))
    pred_box = fwd(params, image, text_ids)
    jax.block_until_ready(pred_box)

    assert pred_box.shape == (B, 4)
    assert bool(jnp.all((pred_box >= 0.0) & (pred_box <= 1.0)))
    assert bool(jnp.all(jnp.isfinite(pred_box)))
    print("KERNEL_OK")
</pallas_src>

<mosaic_0001>
module attributes {stable_mosaic.version = 11 : i64} {
  func.func @_text_stack_kernel(%arg0: i32, %arg1: i32, %arg2: memref<1x4x16xf32, #tpu.memory_space<vmem>>, %arg3: memref<1x16x48xbf16, #tpu.memory_space<vmem>>, %arg4: memref<1x16x16xbf16, #tpu.memory_space<vmem>>, %arg5: memref<1x16x64xbf16, #tpu.memory_space<vmem>>, %arg6: memref<1x64x16xbf16, #tpu.memory_space<vmem>>, %arg7: memref<1x8x128xf32, #tpu.memory_space<vmem>>, %arg8: memref<8x128xf32, #tpu.memory_space<vmem>>, %arg9: memref<16x16xbf16, #tpu.memory_space<vmem>>, %arg10: memref<16x32xbf16, #tpu.memory_space<vmem>>, %arg11: memref<1x4x32xf32, #tpu.memory_space<vmem>>, %arg12: memref<4x16xf32, #tpu.memory_space<vmem>>) attributes {dimension_semantics = [#tpu.dimension_semantics<parallel>, #tpu.dimension_semantics<arbitrary>], iteration_bounds = array<i64: 2, 2>, scalar_prefetch = 0 : i64, scratch_operands = 1 : i64, tpu.core_type = #tpu.core_type<tc>, window_params = [{transform_indices = @transform_0, window_bounds = array<i64: 1, 4, 16>}, {transform_indices = @transform_1, window_bounds = array<i64: 1, 16, 48>}, {transform_indices = @transform_2, window_bounds = array<i64: 1, 16, 16>}, {transform_indices = @transform_3, window_bounds = array<i64: 1, 16, 64>}, {transform_indices = @transform_4, window_bounds = array<i64: 1, 64, 16>}, {transform_indices = @transform_5, window_bounds = array<i64: 1, 8, 128>}, {pipeline_mode = #tpu.pipeline_mode<synchronous>, transform_indices = @transform_6, window_bounds = array<i64: 8, 128>}, {pipeline_mode = #tpu.pipeline_mode<synchronous>, transform_indices = @transform_7, window_bounds = array<i64: 16, 16>}, {pipeline_mode = #tpu.pipeline_mode<synchronous>, transform_indices = @transform_8, window_bounds = array<i64: 16, 32>}, {transform_indices = @transform_9, window_bounds = array<i64: 1, 4, 32>}]} {
    %c0_i32 = arith.constant 0 : i32
    %0 = arith.cmpi eq, %arg1, %c0_i32 : i32
    %1 = arith.extui %0 : i1 to i32
    %c0_i32_0 = arith.constant 0 : i32
    %2 = arith.cmpi ne, %1, %c0_i32_0 : i32
    scf.if %2 {
      %c0_47 = arith.constant 0 : index
      %c0_48 = arith.constant 0 : index
      %c0_49 = arith.constant 0 : index
      %141 = vector.load %arg2[%c0_47, %c0_48, %c0_49] : memref<1x4x16xf32, #tpu.memory_space<vmem>>, vector<1x4x16xf32>
      %142 = vector.shape_cast %141 : vector<1x4x16xf32> to vector<4x16xf32>
      %c0_50 = arith.constant 0 : index
      %c0_51 = arith.constant 0 : index
      %143 = vector.load %arg12[%c0_50, %c0_51] : memref<4x16xf32, #tpu.memory_space<vmem>>, vector<4x16xf32>
      tpu.vector_store %arg12[%c0_50, %c0_51], %142 {strides = array<i32>} : memref<4x16xf32, #tpu.memory_space<vmem>>, vector<4x16xf32>,
    } else {
    }
    %3 = tpu.iota {dimensions = array<i32: 0>} : vector<4x4xi32>
    %4 = tpu.iota {dimensions = array<i32: 1>} : vector<4x4xi32>
    %5 = arith.cmpi sgt, %4, %3 : vector<4x4xi32>
    %cst = arith.constant -1.000000e+30 : f32
    %cst_1 = arith.constant 0.000000e+00 : f32
    %6 = vector.broadcast %cst : f32 to vector<4x4xf32>
    %7 = vector.broadcast %cst_1 : f32 to vector<4x4xf32>
    %8 = arith.select %5, %6, %7 : vector<4x4xi1>, vector<4x4xf32>
    %c0 = arith.constant 0 : index
    %c0_2 = arith.constant 0 : index
    %9 = vector.load %arg12[%c0, %c0_2] : memref<4x16xf32, #tpu.memory_space<vmem>>, vector<4x16xf32>
    %c0_3 = arith.constant 0 : index
    %c0_4 = arith.constant 0 : index
    %c0_5 = arith.constant 0 : index
    %10 = vector.load %arg3[%c0_3, %c0_4, %c0_5] : memref<1x16x48xbf16, #tpu.memory_space<vmem>>, vector<1x16x48xbf16>
    %11 = vector.shape_cast %10 : vector<1x16x48xbf16> to vector<16x48xbf16>
    %c0_6 = arith.constant 0 : index
    %c0_7 = arith.constant 0 : index
    %c0_8 = arith.constant 0 : index
    %12 = vector.load %arg4[%c0_6, %c0_7, %c0_8] : memref<1x16x16xbf16, #tpu.memory_space<vmem>>, vector<1x16x16xbf16>
    %13 = vector.shape_cast %12 : vector<1x16x16xbf16> to vector<16x16xbf16>
    %c0_9 = arith.constant 0 : index
    %c0_10 = arith.constant 0 : index
    %c0_11 = arith.constant 0 : index
    %14 = vector.load %arg5[%c0_9, %c0_10, %c0_11] : memref<1x16x64xbf16, #tpu.memory_space<vmem>>, vector<1x16x64xbf16>
    %15 = vector.shape_cast %14 : vector<1x16x64xbf16> to vector<16x64xbf16>
    %c0_12 = arith.constant 0 : index
    %c0_13 = arith.constant 0 : index
    %c0_14 = arith.constant 0 : index
    %16 = vector.load %arg6[%c0_12, %c0_13, %c0_14] : memref<1x64x16xbf16, #tpu.memory_space<vmem>>, vector<1x64x16xbf16>
    %17 = vector.shape_cast %16 : vector<1x64x16xbf16> to vector<64x16xbf16>
    %c0_15 = arith.constant 0 : index
    %c0_16 = arith.constant 0 : index
    %c0_17 = arith.constant 0 : index
    %18 = vector.load %arg7[%c0_15, %c0_16, %c0_17] : memref<1x8x128xf32, #tpu.memory_space<vmem>>, vector<1x8x128xf32>
    %19 = vector.shape_cast %18 : vector<1x8x128xf32> to vector<8x128xf32>
    %20 = vector.extract_strided_slice %19 {offsets = [0, 0], sizes = [1, 16], strides = [1, 1]} : vector<8x128xf32> to vector<1x16xf32>
    %21 = vector.extract_strided_slice %19 {offsets = [1, 0], sizes = [1, 16], strides = [1, 1]} : vector<8x128xf32> to vector<1x16xf32>
    %22 = vector.extract_strided_slice %19 {offsets = [2, 0], sizes = [1, 16], strides = [1, 1]} : vector<8x128xf32> to vector<1x16xf32>
    %23 = vector.extract_strided_slice %19 {offsets = [3, 0], sizes = [1, 16], strides = [1, 1]} : vector<8x128xf32> to vector<1x16xf32>
    %24 = vector.extract_strided_slice %19 {offsets = [4, 0], sizes = [1, 16], strides = [1, 1]} : vector<8x128xf32> to vector<1x16xf32>
    %25 = vector.extract_strided_slice %19 {offsets = [5, 0], sizes = [1, 16], strides = [1, 1]} : vector<8x128xf32> to vector<1x16xf32>
    %26 = vector.extract_strided_slice %19 {offsets = [6, 0], sizes = [1, 64], strides = [1, 1]} : vector<8x128xf32> to vector<1x64xf32>
    %27 = vector.extract_strided_slice %19 {offsets = [7, 0], sizes = [1, 48], strides = [1, 1]} : vector<8x128xf32> to vector<1x48xf32>
    %cst_18 = arith.constant dense<0.000000e+00> : vector<4xf32>
    %28 = vector.multi_reduction <add>, %9, %cst_18 [1] : vector<4x16xf32> to vector<4xf32>
    %29 = vector.shape_cast %28 : vector<4xf32> to vector<4x1xf32>
    %cst_19 = arith.constant 1.600000e+01 : f32
    %30 = vector.broadcast %cst_19 : f32 to vector<4x1xf32>
    %31 = arith.divf %29, %30 : vector<4x1xf32>
    %32 = vector.broadcast %31 : vector<4x1xf32> to vector<4x16xf32>
    %33 = arith.subf %9, %32 : vector<4x16xf32>
    %34 = arith.mulf %33, %33 : vector<4x16xf32>
    %cst_20 = arith.constant dense<0.000000e+00> : vector<4xf32>
    %35 = vector.multi_reduction <add>, %34, %cst_20 [1] : vector<4x16xf32> to vector<4xf32>
    %36 = vector.shape_cast %35 : vector<4xf32> to vector<4x1xf32>
    %cst_21 = arith.constant 1.600000e+01 : f32
    %37 = vector.broadcast %cst_21 : f32 to vector<4x1xf32>
    %38 = arith.divf %36, %37 : vector<4x1xf32>
    %39 = vector.broadcast %31 : vector<4x1xf32> to vector<4x16xf32>
    %40 = arith.subf %9, %39 : vector<4x16xf32>
    %cst_22 = arith.constant 9.99999974E-6 : f32
    %41 = vector.broadcast %cst_22 : f32 to vector<4x1xf32>
    %42 = arith.addf %38, %41 : vector<4x1xf32>
    %43 = math.rsqrt %42 : vector<4x1xf32>
    %44 = vector.broadcast %43 : vector<4x1xf32> to vector<4x16xf32>
    %45 = arith.mulf %40, %44 : vector<4x16xf32>
    %46 = vector.broadcast %20 : vector<1x16xf32> to vector<4x16xf32>
    %47 = arith.mulf %45, %46 : vector<4x16xf32>
    %48 = vector.broadcast %21 : vector<1x16xf32> to vector<4x16xf32>
    %49 = arith.addf %47, %48 : vector<4x16xf32>
    %50 = arith.truncf %49 : vector<4x16xf32> to vector<4x16xbf16>
    %cst_23 = arith.constant dense<0.000000e+00> : vector<4x48xf32>
    %51 = tpu.matmul %50, %11, %cst_23 {dimension_numbers = #tpu.dot_dimension_numbers<[1], [0], [0], [1], [0, 0, 1, 1], [], []>} : vector<4x16xbf16>, vector<16x48xbf16>, vector<4x48xf32> -> vector<4x48xf32>
    %52 = vector.broadcast %27 : vector<1x48xf32> to vector<4x48xf32>
    %53 = arith.addf %51, %52 : vector<4x48xf32>
    %54 = vector.extract_strided_slice %53 {offsets = [0, 0], sizes = [4, 8], strides = [1, 1]} : vector<4x48xf32> to vector<4x8xf32>
    %55 = vector.extract_strided_slice %53 {offsets = [0, 16], sizes = [4, 8], strides = [1, 1]} : vector<4x48xf32> to vector<4x8xf32>
    %56 = vector.extract_strided_slice %53 {offsets = [0, 32], sizes = [4, 8], strides = [1, 1]} : vector<4x48xf32> to vector<4x8xf32>
    %57 = tpu.transpose %55, [1, 0] : vector<4x8xf32> -> vector<8x4xf32>
    %cst_24 = arith.constant dense<0.000000e+00> : vector<4x4xf32>
    %58 = tpu.matmul %54, %57, %cst_24 {dimension_numbers = #tpu.dot_dimension_numbers<[1], [0], [0], [1], [0, 0, 1, 1], [], []>} : vector<4x8xf32>, vector<8x4xf32>, vector<4x4xf32> -> vector<4x4xf32>
    %cst_25 = arith.constant 0.353553385 : f32
    %59 = vector.broadcast %cst_25 : f32 to vector<4x4xf32>
    %60 = arith.mulf %58, %59 : vector<4x4xf32>
    %61 = arith.addf %60, %8 : vector<4x4xf32>
    %cst_26 = arith.constant dense<0xFF800000> : vector<4xf32>
    %62 = vector.multi_reduction <maximumf>, %61, %cst_26 [1] : vector<4x4xf32> to vector<4xf32>
    %63 = vector.shape_cast %62 : vector<4xf32> to vector<4x1xf32>
    %64 = vector.broadcast %63 : vector<4x1xf32> to vector<4x4xf32>
    %65 = arith.subf %61, %64 : vector<4x4xf32>
    %66 = math.exp %65 : vector<4x4xf32>
    %cst_27 = arith.constant dense<0.000000e+00> : vector<4xf32>
    %67 = vector.multi_reduction <add>, %66, %cst_27 [1] : vector<4x4xf32> to vector<4xf32>
    %68 = vector.shape_cast %67 : vector<4xf32> to vector<4x1xf32>
    %69 = tpu.reciprocal %68 {approx = true} : vector<4x1xf32> -> vector<4x1xf32>
    %70 = vector.broadcast %69 : vector<4x1xf32> to vector<4x4xf32>
    %71 = arith.mulf %66, %70 : vector<4x4xf32>
    %cst_28 = arith.constant dense<0.000000e+00> : vector<4x8xf32>
    %72 = tpu.matmul %71, %56, %cst_28 {dimension_numbers = #tpu.dot_dimension_numbers<[1], [0], [0], [1], [0, 0, 1, 1], [], []>} : vector<4x4xf32>, vector<4x8xf32>, vector<4x8xf32> -> vector<4x8xf32>
    %73 = vector.extract_strided_slice %53 {offsets = [0, 8], sizes = [4, 8], strides = [1, 1]} : vector<4x48xf32> to vector<4x8xf32>
    %74 = vector.extract_strided_slice %53 {offsets = [0, 24], sizes = [4, 8], strides = [1, 1]} : vector<4x48xf32> to vector<4x8xf32>
    %75 = vector.extract_strided_slice %53 {offsets = [0, 40], sizes = [4, 8], strides = [1, 1]} : vector<4x48xf32> to vector<4x8xf32>
    %76 = tpu.transpose %74, [1, 0] : vector<4x8xf32> -> vector<8x4xf32>
    %cst_29 = arith.constant dense<0.000000e+00> : vector<4x4xf32>
    %77 = tpu.matmul %73, %76, %cst_29 {dimension_numbers = #tpu.dot_dimension_numbers<[1], [0], [0], [1], [0, 0, 1, 1], [], []>} : vector<4x8xf32>, vector<8x4xf32>, vector<4x4xf32> -> vector<4x4xf32>
    %cst_30 = arith.constant 0.353553385 : f32
    %78 = vector.broadcast %cst_30 : f32 to vector<4x4xf32>
    %79 = arith.mulf %77, %78 : vector<4x4xf32>
    %80 = arith.addf %79, %8 : vector<4x4xf32>
    %cst_31 = arith.constant dense<0xFF800000> : vector<4xf32>
    %81 = vector.multi_reduction <maximumf>, %80, %cst_31 [1] : vector<4x4xf32> to vector<4xf32>
    %82 = vector.shape_cast %81 : vector<4xf32> to vector<4x1xf32>
    %83 = vector.broadcast %82 : vector<4x1xf32> to vector<4x4xf32>
    %84 = arith.subf %80, %83 : vector<4x4xf32>
    %85 = math.exp %84 : vector<4x4xf32>
    %cst_32 = arith.constant dense<0.000000e+00> : vector<4xf32>
    %86 = vector.multi_reduction <add>, %85, %cst_32 [1] : vector<4x4xf32> to vector<4xf32>
    %87 = vector.shape_cast %86 : vector<4xf32> to vector<4x1xf32>
    %88 = tpu.reciprocal %87 {approx = true} : vector<4x1xf32> -> vector<4x1xf32>
    %89 = vector.broadcast %88 : vector<4x1xf32> to vector<4x4xf32>
    %90 = arith.mulf %85, %89 : vector<4x4xf32>
    %cst_33 = arith.constant dense<0.000000e+00> : vector<4x8xf32>
    %91 = tpu.matmul %90, %75, %cst_33 {dimension_numbers = #tpu.dot_dimension_numbers<[1], [0], [0], [1], [0, 0, 1, 1], [], []>} : vector<4x4xf32>, vector<4x8xf32>, vector<4x8xf32> -> vector<4x8xf32>
    %92 = tpu.concatenate %72, %91 in 1 : vector<4x8xf32>, vector<4x8xf32> -> vector<4x16xf32>
    %93 = arith.truncf %92 : vector<4x16xf32> to vector<4x16xbf16>
    %cst_34 = arith.constant dense<0.000000e+00> : vector<4x16xf32>
    %94 = tpu.matmul %93, %13, %cst_34 {dimension_numbers = #tpu.dot_dimension_numbers<[1], [0], [0], [1], [0, 0, 1, 1], [], []>} : vector<4x16xbf16>, vector<16x16xbf16>, vector<4x16xf32> -> vector<4x16xf32>
    %95 = vector.broadcast %24 : vector<1x16xf32> to vector<4x16xf32>
    %96 = arith.addf %94, %95 : vector<4x16xf32>
    %97 = arith.addf %9, %96 : vector<4x16xf32>
    %cst_35 = arith.constant dense<0.000000e+00> : vector<4xf32>
    %98 = vector.multi_reduction <add>, %97, %cst_35 [1] : vector<4x16xf32> to vector<4xf32>
    %99 = vector.shape_cast %98 : vector<4xf32> to vector<4x1xf32>
    %cst_36 = arith.constant 1.600000e+01 : f32
    %100 = vector.broadcast %cst_36 : f32 to vector<4x1xf32>
    %101 = arith.divf %99, %100 : vector<4x1xf32>
    %102 = vector.broadcast %101 : vector<4x1xf32> to vector<4x16xf32>
    %103 = arith.subf %97, %102 : vector<4x16xf32>
    %104 = arith.mulf %103, %103 : vector<4x16xf32>
    %cst_37 = arith.constant dense<0.000000e+00> : vector<4xf32>
    %105 = vector.multi_reduction <add>, %104, %cst_37 [1] : vector<4x16xf32> to vector<4xf32>
    %106 = vector.shape_cast %105 : vector<4xf32> to vector<4x1xf32>
    %cst_38 = arith.constant 1.600000e+01 : f32
    %107 = vector.broadcast %cst_38 : f32 to vector<4x1xf32>
    %108 = arith.divf %106, %107 : vector<4x1xf32>
    %109 = vector.broadcast %101 : vector<4x1xf32> to vector<4x16xf32>
    %110 = arith.subf %97, %109 : vector<4x16xf32>
    %cst_39 = arith.constant 9.99999974E-6 : f32
    %111 = vector.broadcast %cst_39 : f32 to vector<4x1xf32>
    %112 = arith.addf %108, %111 : vector<4x1xf32>
    %113 = math.rsqrt %112 : vector<4x1xf32>
    %114 = vector.broadcast %113 : vector<4x1xf32> to vector<4x16xf32>
    %115 = arith.mulf %110, %114 : vector<4x16xf32>
    %116 = vector.broadcast %22 : vector<1x16xf32> to vector<4x16xf32>
    %117 = arith.mulf %115, %116 : vector<4x16xf32>
    %118 = vector.broadcast %23 : vector<1x16xf32> to vector<4x16xf32>
    %119 = arith.addf %117, %118 : vector<4x16xf32>
    %120 = arith.truncf %119 : vector<4x16xf32> to vector<4x16xbf16>
    %cst_40 = arith.constant dense<0.000000e+00> : vector<4x64xf32>
    %121 = tpu.matmul %120, %15, %cst_40 {dimension_numbers = #tpu.dot_dimension_numbers<[1], [0], [0], [1], [0, 0, 1, 1], [], []>} : vector<4x16xbf16>, vector<16x64xbf16>, vector<4x64xf32> -> vector<4x64xf32>
    %122 = vector.broadcast %26 : vector<1x64xf32> to vector<4x64xf32>
    %123 = arith.addf %121, %122 : vector<4x64xf32>
    %cst_41 = arith.constant 1.702000e+00 : f32
    %124 = vector.broadcast %cst_41 : f32 to vector<4x64xf32>
    %125 = arith.mulf %124, %123 : vector<4x64xf32>
    %126 = arith.negf %125 : vector<4x64xf32>
    %127 = math.exp %126 : vector<4x64xf32>
    %cst_42 = arith.constant 1.000000e+00 : f32
    %128 = vector.broadcast %cst_42 : f32 to vector<4x64xf32>
    %129 = arith.addf %128, %127 : vector<4x64xf32>
    %130 = arith.divf %128, %129 : vector<4x64xf32>
    %131 = arith.mulf %123, %130 : vector<4x64xf32>
    %132 = arith.truncf %131 : vector<4x64xf32> to vector<4x64xbf16>
    %cst_43 = arith.constant dense<0.000000e+00> : vector<4x16xf32>
    %133 = tpu.matmul %132, %17, %cst_43 {dimension_numbers = #tpu.dot_dimension_numbers<[1], [0], [0], [1], [0, 0, 1, 1], [], []>} : vector<4x64xbf16>, vector<64x16xbf16>, vector<4x16xf32> -> vector<4x16xf32>
    %134 = arith.addf %97, %133 : vector<4x16xf32>
    %135 = vector.broadcast %25 : vector<1x16xf32> to vector<4x16xf32>
    %136 = arith.addf %134, %135 : vector<4x16xf32>
    %c0_44 = arith.constant 0 : index
    %c0_45 = arith.constant 0 : index
    %137 = vector.load %arg12[%c0_44, %c0_45] : memref<4x16xf32, #tpu.memory_space<vmem>>, vector<4x16xf32>
    tpu.vector_store %arg12[%c0_44, %c0_45], %136 {strides = array<i32>} : memref<4x16xf32, #tpu.memory_space<vmem>>, vector<4x16xf32>,
    %c1_i32 = arith.constant 1 : i32
    %138 = arith.cmpi eq, %arg1, %c1_i32 : i32
    %139 = arith.extui %138 : i1 to i32
    %c0_i32_46 = arith.constant 0 : i32
    %140 = arith.cmpi ne, %139, %c0_i32_46 : i32
    scf.if %140 {
      %c0_47 = arith.constant 0 : index
      %c0_48 = arith.constant 0 : index
      %141 = vector.load %arg8[%c0_47, %c0_48] : memref<8x128xf32, #tpu.memory_space<vmem>>, vector<8x128xf32>
      %142 = vector.extract_strided_slice %141 {offsets = [0, 0], sizes = [1, 16], strides = [1, 1]} : vector<8x128xf32> to vector<1x16xf32>
      %143 = vector.extract_strided_slice %141 {offsets = [1, 0], sizes = [1, 16], strides = [1, 1]} : vector<8x128xf32> to vector<1x16xf32>
      %144 = vector.extract_strided_slice %141 {offsets = [2, 0], sizes = [1, 32], strides = [1, 1]} : vector<8x128xf32> to vector<1x32xf32>
      %145 = vector.extract_strided_slice %141 {offsets = [3, 0], sizes = [1, 32], strides = [1, 1]} : vector<8x128xf32> to vector<1x32xf32>
      %146 = vector.extract_strided_slice %141 {offsets = [4, 0], sizes = [1, 32], strides = [1, 1]} : vector<8x128xf32> to vector<1x32xf32>
      %cst_49 = arith.constant dense<0.000000e+00> : vector<4xf32>
      %147 = vector.multi_reduction <add>, %136, %cst_49 [1] : vector<4x16xf32> to vector<4xf32>
      %148 = vector.shape_cast %147 : vector<4xf32> to vector<4x1xf32>
      %cst_50 = arith.constant 1.600000e+01 : f32
      %149 = vector.broadcast %cst_50 : f32 to vector<4x1xf32>
      %150 = arith.divf %148, %149 : vector<4x1xf32>
      %151 = vector.broadcast %150 : vector<4x1xf32> to vector<4x16xf32>
      %152 = arith.subf %136, %151 : vector<4x16xf32>
      %153 = arith.mulf %152, %152 : vector<4x16xf32>
      %cst_51 = arith.constant dense<0.000000e+00> : vector<4xf32>
      %154 = vector.multi_reduction <add>, %153, %cst_51 [1] : vector<4x16xf32> to vector<4xf32>
      %155 = vector.shape_cast %154 : vector<4xf32> to vector<4x1xf32>
      %cst_52 = arith.constant 1.600000e+01 : f32
      %156 = vector.broadcast %cst_52 : f32 to vector<4x1xf32>
      %157 = arith.divf %155, %156 : vector<4x1xf32>
      %158 = vector.broadcast %150 : vector<4x1xf32> to vector<4x16xf32>
      %159 = arith.subf %136, %158 : vector<4x16xf32>
      %cst_53 = arith.constant 9.99999974E-6 : f32
      %160 = vector.broadcast %cst_53 : f32 to vector<4x1xf32>
      %161 = arith.addf %157, %160 : vector<4x1xf32>
      %162 = math.rsqrt %161 : vector<4x1xf32>
      %163 = vector.broadcast %162 : vector<4x1xf32> to vector<4x16xf32>
      %164 = arith.mulf %159, %163 : vector<4x16xf32>
      %165 = vector.broadcast %142 : vector<1x16xf32> to vector<4x16xf32>
      %166 = arith.mulf %164, %165 : vector<4x16xf32>
      %167 = vector.broadcast %143 : vector<1x16xf32> to vector<4x16xf32>
      %168 = arith.addf %166, %167 : vector<4x16xf32>
      %169 = arith.truncf %168 : vector<4x16xf32> to vector<4x16xbf16>
      %c0_54 = arith.constant 0 : index
      %c0_55 = arith.constant 0 : index
      %170 = vector.load %arg9[%c0_54, %c0_55] : memref<16x16xbf16, #tpu.memory_space<vmem>>, vector<16x16xbf16>
      %cst_56 = arith.constant dense<0.000000e+00> : vector<4x16xf32>
      %171 = tpu.matmul %169, %170, %cst_56 {dimension_numbers = #tpu.dot_dimension_numbers<[1], [0], [0], [1], [0, 0, 1, 1], [], []>} : vector<4x16xbf16>, vector<16x16xbf16>, vector<4x16xf32> -> vector<4x16xf32>
      %172 = arith.truncf %171 : vector<4x16xf32> to vector<4x16xbf16>
      %c0_57 = arith.constant 0 : index
      %c0_58 = arith.constant 0 : index
      %173 = vector.load %arg10[%c0_57, %c0_58] : memref<16x32xbf16, #tpu.memory_space<vmem>>, vector<16x32xbf16>
      %cst_59 = arith.constant dense<0.000000e+00> : vector<4x32xf32>
      %174 = tpu.matmul %172, %173, %cst_59 {dimension_numbers = #tpu.dot_dimension_numbers<[1], [0], [0], [1], [0, 0, 1, 1], [], []>} : vector<4x16xbf16>, vector<16x32xbf16>, vector<4x32xf32> -> vector<4x32xf32>
      %175 = vector.broadcast %146 : vector<1x32xf32> to vector<4x32xf32>
      %176 = arith.addf %174, %175 : vector<4x32xf32>
      %cst_60 = arith.constant dense<0.000000e+00> : vector<4xf32>
      %177 = vector.multi_reduction <add>, %176, %cst_60 [1] : vector<4x32xf32> to vector<4xf32>
      %178 = vector.shape_cast %177 : vector<4xf32> to vector<4x1xf32>
      %cst_61 = arith.constant 3.200000e+01 : f32
      %179 = vector.broadcast %cst_61 : f32 to vector<4x1xf32>
      %180 = arith.divf %178, %179 : vector<4x1xf32>
      %181 = vector.broadcast %180 : vector<4x1xf32> to vector<4x32xf32>
      %182 = arith.subf %176, %181 : vector<4x32xf32>
      %183 = arith.mulf %182, %182 : vector<4x32xf32>
      %cst_62 = arith.constant dense<0.000000e+00> : vector<4xf32>
      %184 = vector.multi_reduction <add>, %183, %cst_62 [1] : vector<4x32xf32> to vector<4xf32>
      %185 = vector.shape_cast %184 : vector<4xf32> to vector<4x1xf32>
      %cst_63 = arith.constant 3.200000e+01 : f32
      %186 = vector.broadcast %cst_63 : f32 to vector<4x1xf32>
      %187 = arith.divf %185, %186 : vector<4x1xf32>
      %188 = vector.broadcast %180 : vector<4x1xf32> to vector<4x32xf32>
      %189 = arith.subf %176, %188 : vector<4x32xf32>
      %cst_64 = arith.constant 9.99999996E-13 : f32
      %190 = vector.broadcast %cst_64 : f32 to vector<4x1xf32>
      %191 = arith.addf %187, %190 : vector<4x1xf32>
      %192 = math.rsqrt %191 : vector<4x1xf32>
      %193 = vector.broadcast %192 : vector<4x1xf32> to vector<4x32xf32>
      %194 = arith.mulf %189, %193 : vector<4x32xf32>
      %195 = vector.broadcast %144 : vector<1x32xf32> to vector<4x32xf32>
      %196 = arith.mulf %194, %195 : vector<4x32xf32>
      %197 = vector.broadcast %145 : vector<1x32xf32> to vector<4x32xf32>
      %198 = arith.addf %196, %197 : vector<4x32xf32>
      %c0_65 = arith.constant 0 : index
      %c0_66 = arith.constant 0 : index
      %c0_67 = arith.constant 0 : index
      %199 = vector.load %arg11[%c0_65, %c0_66, %c0_67] : memref<1x4x32xf32, #tpu.memory_space<vmem>>, vector<1x4x32xf32>
      %200 = vector.shape_cast %199 : vector<1x4x32xf32> to vector<4x32xf32>
      %201 = vector.shape_cast %198 : vector<4x32xf32> to vector<1x4x32xf32>
      tpu.vector_store %arg11[%c0_65, %c0_66, %c0_67], %201 {strides = array<i32>} : memref<1x4x32xf32, #tpu.memory_space<vmem>>, vector<1x4x32xf32>,
    } else {
    }
    return
  }
  func.func @transform_0(%arg0: i32, %arg1: i32) -> (i32, i32, i32) {
    %c0_i32 = arith.constant 0 : i32
    %c0_i32_0 = arith.constant 0 : i32
    %c0_i32_1 = arith.constant 0 : i32
    return %arg0, %c0_i32, %c0_i32_0 : i32, i32, i32
  }
  func.func @transform_1(%arg0: i32, %arg1: i32) -> (i32, i32, i32) {
    %c0_i32 = arith.constant 0 : i32
    %c0_i32_0 = arith.constant 0 : i32
    %c0_i32_1 = arith.constant 0 : i32
    return %arg1, %c0_i32, %c0_i32_0 : i32, i32, i32
  }
  func.func @transform_2(%arg0: i32, %arg1: i32) -> (i32, i32, i32) {
    %c0_i32 = arith.constant 0 : i32
    %c0_i32_0 = arith.constant 0 : i32
    %c0_i32_1 = arith.constant 0 : i32
    return %arg1, %c0_i32, %c0_i32_0 : i32, i32, i32
  }
  func.func @transform_3(%arg0: i32, %arg1: i32) -> (i32, i32, i32) {
    %c0_i32 = arith.constant 0 : i32
    %c0_i32_0 = arith.constant 0 : i32
    %c0_i32_1 = arith.constant 0 : i32
    return %arg1, %c0_i32, %c0_i32_0 : i32, i32, i32
  }
  func.func @transform_4(%arg0: i32, %arg1: i32) -> (i32, i32, i32) {
    %c0_i32 = arith.constant 0 : i32
    %c0_i32_0 = arith.constant 0 : i32
    %c0_i32_1 = arith.constant 0 : i32
    return %arg1, %c0_i32, %c0_i32_0 : i32, i32, i32
  }
  func.func @transform_5(%arg0: i32, %arg1: i32) -> (i32, i32, i32) {
    %c0_i32 = arith.constant 0 : i32
    %c0_i32_0 = arith.constant 0 : i32
    %c0_i32_1 = arith.constant 0 : i32
    return %arg1, %c0_i32, %c0_i32_0 : i32, i32, i32
  }
  func.func @transform_6(%arg0: i32, %arg1: i32) -> (i32, i32) {
    %c0_i32 = arith.constant 0 : i32
    %c0_i32_0 = arith.constant 0 : i32
    %c0_i32_1 = arith.constant 0 : i32
    return %c0_i32, %c0_i32_0 : i32, i32
  }
  func.func @transform_7(%arg0: i32, %arg1: i32) -> (i32, i32) {
    %c0_i32 = arith.constant 0 : i32
    %c0_i32_0 = arith.constant 0 : i32
    %c0_i32_1 = arith.constant 0 : i32
    return %c0_i32, %c0_i32_0 : i32, i32
  }
  func.func @transform_8(%arg0: i32, %arg1: i32) -> (i32, i32) {
    %c0_i32 = arith.constant 0 : i32
    %c0_i32_0 = arith.constant 0 : i32
    %c0_i32_1 = arith.constant 0 : i32
    return %c0_i32, %c0_i32_0 : i32, i32
  }
  func.func @transform_9(%arg0: i32, %arg1: i32) -> (i32, i32, i32) {
    %c0_i32 = arith.constant 0 : i32
    %c0_i32_0 = arith.constant 0 : i32
    %c0_i32_1 = arith.constant 0 : i32
    return %arg0, %c0_i32, %c0_i32_0 : i32, i32, i32
  }
}

module attributes {stable_mosaic.version = 11 : i64} {
  func.func @_visual_stack_kernel(%arg0: i32, %arg1: i32, %arg2: memref<1x4x768xf32, #tpu.memory_space<vmem>>, %arg3: memref<1x4x32xf32, #tpu.memory_space<vmem>>, %arg4: memref<768x32xbf16, #tpu.memory_space<vmem>>, %arg5: memref<8x32xf32, #tpu.memory_space<vmem>>, %arg6: memref<1x32x96xbf16, #tpu.memory_space<vmem>>, %arg7: memref<1x32x32xbf16, #tpu.memory_space<vmem>>, %arg8: memref<1x32x128xbf16, #tpu.memory_space<vmem>>, %arg9: memref<1x128x32xbf16, #tpu.memory_space<vmem>>, %arg10: memref<1x8x128xf32, #tpu.memory_space<vmem>>, %arg11: memref<32x256xbf16, #tpu.memory_space<vmem>>, %arg12: memref<256x256xbf16, #tpu.memory_space<vmem>>, %arg13: memref<256x256xbf16, #tpu.memory_space<vmem>>, %arg14: memref<256x4xbf16, #tpu.memory_space<vmem>>, %arg15: memref<4x256xf32, #tpu.memory_space<vmem>>, %arg16: memref<1x1x4xf32, #tpu.memory_space<vmem>>, %arg17: memref<9x32xf32, #tpu.memory_space<vmem>>, %arg18: memref<1x9xf32, #tpu.memory_space<vmem>>) attributes {dimension_semantics = [#tpu.dimension_semantics<parallel>, #tpu.dimension_semantics<arbitrary>], iteration_bounds = array<i64: 2, 4>, scalar_prefetch = 0 : i64, scratch_operands = 2 : i64, tpu.core_type = #tpu.core_type<tc>, window_params = [{transform_indices = @transform_0, window_bounds = array<i64: 1, 4, 768>}, {transform_indices = @transform_1, window_bounds = array<i64: 1, 4, 32>}, {pipeline_mode = #tpu.pipeline_mode<synchronous>, transform_indices = @transform_2, window_bounds = array<i64: 768, 32>}, {pipeline_mode = #tpu.pipeline_mode<synchronous>, transform_indices = @transform_3, window_bounds = array<i64: 8, 32>}, {transform_indices = @transform_4, window_bounds = array<i64: 1, 32, 96>}, {transform_indices = @transform_5, window_bounds = array<i64: 1, 32, 32>}, {transform_indices = @transform_6, window_bounds = array<i64: 1, 32, 128>}, {transform_indices = @transform_7, window_bounds = array<i64: 1, 128, 32>}, {transform_indices = @transform_8, window_bounds = array<i64: 1, 8, 128>}, {pipeline_mode = #tpu.pipeline_mode<synchronous>, transform_indices = @transform_9, window_bounds = array<i64: 32, 256>}, {pipeline_mode = #tpu.pipeline_mode<synchronous>, transform_indices = @transform_10, window_bounds = array<i64: 256, 256>}, {pipeline_mode = #tpu.pipeline_mode<synchronous>, transform_indices = @transform_11, window_bounds = array<i64: 256, 256>}, {pipeline_mode = #tpu.pipeline_mode<synchronous>, transform_indices = @transform_12, window_bounds = array<i64: 256, 4>}, {pipeline_mode = #tpu.pipeline_mode<synchronous>, transform_indices = @transform_13, window_bounds = array<i64: 4, 256>}, {transform_indices = @transform_14, window_bounds = array<i64: 1, 1, 4>}]} {
    %c0_i32 = arith.constant 0 : i32
    %0 = arith.cmpi eq, %arg1, %c0_i32 : i32
    %1 = arith.extui %0 : i1 to i32
    %c0_i32_0 = arith.constant 0 : i32
    %2 = arith.cmpi ne, %1, %c0_i32_0 : i32
    scf.if %2 {
      %c0_51 = arith.constant 0 : index
      %c0_52 = arith.constant 0 : index
      %156 = vector.load %arg4[%c0_51, %c0_52] : memref<768x32xbf16, #tpu.memory_space<vmem>>, vector<768x32xbf16>
      %c0_53 = arith.constant 0 : index
      %c0_54 = arith.constant 0 : index
      %c0_55 = arith.constant 0 : index
      %157 = vector.load %arg2[%c0_53, %c0_54, %c0_55] : memref<1x4x768xf32, #tpu.memory_space<vmem>>, vector<1x4x768xf32>
      %158 = vector.shape_cast %157 : vector<1x4x768xf32> to vector<4x768xf32>
      %159 = arith.truncf %158 : vector<4x768xf32> to vector<4x768xbf16>
      %cst_56 = arith.constant dense<0.000000e+00> : vector<4x32xf32>
      %160 = tpu.matmul %159, %156, %cst_56 {dimension_numbers = #tpu.dot_dimension_numbers<[1], [0], [0], [1], [0, 0, 1, 1], [], []>} : vector<4x768xbf16>, vector<768x32xbf16>, vector<4x32xf32> -> vector<4x32xf32>
      %c0_57 = arith.constant 0 : index
      %c0_58 = arith.constant 0 : index
      %161 = vector.load %arg5[%c0_57, %c0_58] : memref<8x32xf32, #tpu.memory_space<vmem>>, vector<8x32xf32>
      %162 = vector.extract_strided_slice %161 {offsets = [0, 0], sizes = [1, 32], strides = [1, 1]} : vector<8x32xf32> to vector<1x32xf32>
      %163 = vector.extract_strided_slice %161 {offsets = [1, 0], sizes = [5, 32], strides = [1, 1]} : vector<8x32xf32> to vector<5x32xf32>
      %164 = vector.extract_strided_slice %161 {offsets = [6, 0], sizes = [1, 32], strides = [1, 1]} : vector<8x32xf32> to vector<1x32xf32>
      %165 = vector.extract_strided_slice %161 {offsets = [7, 0], sizes = [1, 32], strides = [1, 1]} : vector<8x32xf32> to vector<1x32xf32>
      %166 = vector.extract_strided_slice %163 {offsets = [0, 0], sizes = [1, 32], strides = [1, 1]} : vector<5x32xf32> to vector<1x32xf32>
      %167 = arith.addf %162, %166 : vector<1x32xf32>
      %cst_59 = arith.constant dense<0.000000e+00> : vector<1xf32>
      %168 = vector.multi_reduction <add>, %167, %cst_59 [1] : vector<1x32xf32> to vector<1xf32>
      %169 = vector.shape_cast %168 : vector<1xf32> to vector<1x1xf32>
      %cst_60 = arith.constant 3.200000e+01 : f32
      %170 = vector.broadcast %cst_60 : f32 to vector<1x1xf32>
      %171 = arith.divf %169, %170 : vector<1x1xf32>
      %172 = vector.broadcast %171 : vector<1x1xf32> to vector<1x32xf32>
      %173 = arith.subf %167, %172 : vector<1x32xf32>
      %174 = arith.mulf %173, %173 : vector<1x32xf32>
      %cst_61 = arith.constant dense<0.000000e+00> : vector<1xf32>
      %175 = vector.multi_reduction <add>, %174, %cst_61 [1] : vector<1x32xf32> to vector<1xf32>
      %176 = vector.shape_cast %175 : vector<1xf32> to vector<1x1xf32>
      %cst_62 = arith.constant 3.200000e+01 : f32
      %177 = vector.broadcast %cst_62 : f32 to vector<1x1xf32>
      %178 = arith.divf %176, %177 : vector<1x1xf32>
      %179 = vector.broadcast %171 : vector<1x1xf32> to vector<1x32xf32>
      %180 = arith.subf %167, %179 : vector<1x32xf32>
      %cst_63 = arith.constant 9.99999974E-6 : f32
      %181 = vector.broadcast %cst_63 : f32 to vector<1x1xf32>
      %182 = arith.addf %178, %181 : vector<1x1xf32>
      %183 = math.rsqrt %182 : vector<1x1xf32>
      %184 = vector.broadcast %183 : vector<1x1xf32> to vector<1x32xf32>
      %185 = arith.mulf %180, %184 : vector<1x32xf32>
      %186 = arith.mulf %185, %164 : vector<1x32xf32>
      %187 = arith.addf %186, %165 : vector<1x32xf32>
      %188 = vector.extract_strided_slice %163 {offsets = [1, 0], sizes = [4, 32], strides = [1, 1]} : vector<5x32xf32> to vector<4x32xf32>
      %189 = arith.addf %160, %188 : vector<4x32xf32>
      %cst_64 = arith.constant dense<0.000000e+00> : vector<4xf32>
      %190 = vector.multi_reduction <add>, %189, %cst_64 [1] : vector<4x32xf32> to vector<4xf32>
      %191 = vector.shape_cast %190 : vector<4xf32> to vector<4x1xf32>
      %cst_65 = arith.constant 3.200000e+01 : f32
      %192 = vector.broadcast %cst_65 : f32 to vector<4x1xf32>
      %193 = arith.divf %191, %192 : vector<4x1xf32>
      %194 = vector.broadcast %193 : vector<4x1xf32> to vector<4x32xf32>
      %195 = arith.subf %189, %194 : vector<4x32xf32>
      %196 = arith.mulf %195, %195 : vector<4x32xf32>
      %cst_66 = arith.constant dense<0.000000e+00> : vector<4xf32>
      %197 = vector.multi_reduction <add>, %196, %cst_66 [1] : vector<4x32xf32> to vector<4xf32>
      %198 = vector.shape_cast %197 : vector<4xf32> to vector<4x1xf32>
      %cst_67 = arith.constant 3.200000e+01 : f32
      %199 = vector.broadcast %cst_67 : f32 to vector<4x1xf32>
      %200 = arith.divf %198, %199 : vector<4x1xf32>
      %201 = vector.broadcast %193 : vector<4x1xf32> to vector<4x32xf32>
      %202 = arith.subf %189, %201 : vector<4x32xf32>
      %cst_68 = arith.constant 9.99999974E-6 : f32
      %203 = vector.broadcast %cst_68 : f32 to vector<4x1xf32>
      %204 = arith.addf %200, %203 : vector<4x1xf32>
      %205 = math.rsqrt %204 : vector<4x1xf32>
      %206 = vector.broadcast %205 : vector<4x1xf32> to vector<4x32xf32>
      %207 = arith.mulf %202, %206 : vector<4x32xf32>
      %208 = vector.broadcast %164 : vector<1x32xf32> to vector<4x32xf32>
      %209 = arith.mulf %207, %208 : vector<4x32xf32>
      %210 = vector.broadcast %165 : vector<1x32xf32> to vector<4x32xf32>
      %211 = arith.addf %209, %210 : vector<4x32xf32>
      %c0_69 = arith.constant 0 : index
      %c0_70 = arith.constant 0 : index
      %c0_71 = arith.constant 0 : index
      %212 = vector.load %arg3[%c0_69, %c0_70, %c0_71] : memref<1x4x32xf32, #tpu.memory_space<vmem>>, vector<1x4x32xf32>
      %213 = vector.shape_cast %212 : vector<1x4x32xf32> to vector<4x32xf32>
      %214 = tpu.concatenate %187, %211, %213 in 0 : vector<1x32xf32>, vector<4x32xf32>, vector<4x32xf32> -> vector<9x32xf32>
      %c0_72 = arith.constant 0 : index
      %c0_73 = arith.constant 0 : index
      %215 = vector.load %arg17[%c0_72, %c0_73] : memref<9x32xf32, #tpu.memory_space<vmem>>, vector<9x32xf32>
      tpu.vector_store %arg17[%c0_72, %c0_73], %214 {strides = array<i32>} : memref<9x32xf32, #tpu.memory_space<vmem>>, vector<9x32xf32>,
      %cst_74 = arith.constant 0.000000e+00 : f32
      %216 = vector.broadcast %cst_74 : f32 to vector<1x9xf32>
      %c0_75 = arith.constant 0 : index
      %c0_76 = arith.constant 0 : index
      %217 = vector.load %arg18[%c0_75, %c0_76] : memref<1x9xf32, #tpu.memory_space<vmem>>, vector<1x9xf32>
      tpu.vector_store %arg18[%c0_75, %c0_76], %216 {strides = array<i32>} : memref<1x9xf32, #tpu.memory_space<vmem>>, vector<1x9xf32>,
    } else {
    }
    %c0 = arith.constant 0 : index
    %c0_1 = arith.constant 0 : index
    %3 = vector.load %arg17[%c0, %c0_1] : memref<9x32xf32, #tpu.memory_space<vmem>>, vector<9x32xf32>
    %c0_2 = arith.constant 0 : index
    %c0_3 = arith.constant 0 : index
    %4 = vector.load %arg18[%c0_2, %c0_3] : memref<1x9xf32, #tpu.memory_space<vmem>>, vector<1x9xf32>
    %c0_4 = arith.constant 0 : index
    %c0_5 = arith.constant 0 : index
    %c0_6 = arith.constant 0 : index
    %5 = vector.load %arg6[%c0_4, %c0_5, %c0_6] : memref<1x32x96xbf16, #tpu.memory_space<vmem>>, vector<1x32x96xbf16>
    %6 = vector.shape_cast %5 : vector<1x32x96xbf16> to vector<32x96xbf16>
    %c0_7 = arith.constant 0 : index
    %c0_8 = arith.constant 0 : index
    %c0_9 = arith.constant 0 : index
    %7 = vector.load %arg7[%c0_7, %c0_8, %c0_9] : memref<1x32x32xbf16, #tpu.memory_space<vmem>>, vector<1x32x32xbf16>
    %8 = vector.shape_cast %7 : vector<1x32x32xbf16> to vector<32x32xbf16>
    %c0_10 = arith.constant 0 : index
    %c0_11 = arith.constant 0 : index
    %c0_12 = arith.constant 0 : index
    %9 = vector.load %arg8[%c0_10, %c0_11, %c0_12] : memref<1x32x128xbf16, #tpu.memory_space<vmem>>, vector<1x32x128xbf16>
    %10 = vector.shape_cast %9 : vector<1x32x128xbf16> to vector<32x128xbf16>
    %c0_13 = arith.constant 0 : index
    %c0_14 = arith.constant 0 : index
    %c0_15 = arith.constant 0 : index
    %11 = vector.load %arg9[%c0_13, %c0_14, %c0_15] : memref<1x128x32xbf16, #tpu.memory_space<vmem>>, vector<1x128x32xbf16>
    %12 = vector.shape_cast %11 : vector<1x128x32xbf16> to vector<128x32xbf16>
    %c0_16 = arith.constant 0 : index
    %c0_17 = arith.constant 0 : index
    %c0_18 = arith.constant 0 : index
    %13 = vector.load %arg10[%c0_16, %c0_17, %c0_18] : memref<1x8x128xf32, #tpu.memory_space<vmem>>, vector<1x8x128xf32>
    %14 = vector.shape_cast %13 : vector<1x8x128xf32> to vector<8x128xf32>
    %15 = vector.extract_strided_slice %14 {offsets = [0, 0], sizes = [1, 32], strides = [1, 1]} : vector<8x128xf32> to vector<1x32xf32>
    %16 = vector.extract_strided_slice %14 {offsets = [1, 0], sizes = [1, 32], strides = [1, 1]} : vector<8x128xf32> to vector<1x32xf32>
    %17 = vector.extract_strided_slice %14 {offsets = [2, 0], sizes = [1, 32], strides = [1, 1]} : vector<8x128xf32> to vector<1x32xf32>
    %18 = vector.extract_strided_slice %14 {offsets = [3, 0], sizes = [1, 32], strides = [1, 1]} : vector<8x128xf32> to vector<1x32xf32>
    %19 = vector.extract_strided_slice %14 {offsets = [4, 0], sizes = [1, 32], strides = [1, 1]} : vector<8x128xf32> to vector<1x32xf32>
    %20 = vector.extract_strided_slice %14 {offsets = [5, 0], sizes = [1, 32], strides = [1, 1]} : vector<8x128xf32> to vector<1x32xf32>
    %21 = vector.extract_strided_slice %14 {offsets = [6, 0], sizes = [1, 128], strides = [1, 1]} : vector<8x128xf32> to vector<1x128xf32>
    %22 = vector.extract_strided_slice %14 {offsets = [7, 0], sizes = [1, 96], strides = [1, 1]} : vector<8x128xf32> to vector<1x96xf32>
    %cst = arith.constant dense<0.000000e+00> : vector<9xf32>
    %23 = vector.multi_reduction <add>, %3, %cst [1] : vector<9x32xf32> to vector<9xf32>
    %24 = vector.shape_cast %23 : vector<9xf32> to vector<9x1xf32>
    %cst_19 = arith.constant 3.200000e+01 : f32
    %25 = vector.broadcast %cst_19 : f32 to vector<9x1xf32>
    %26 = arith.divf %24, %25 : vector<9x1xf32>
    %27 = vector.broadcast %26 : vector<9x1xf32> to vector<9x32xf32>
    %28 = arith.subf %3, %27 : vector<9x32xf32>
    %29 = arith.mulf %28, %28 : vector<9x32xf32>
    %cst_20 = arith.constant dense<0.000000e+00> : vector<9xf32>
    %30 = vector.multi_reduction <add>, %29, %cst_20 [1] : vector<9x32xf32> to vector<9xf32>
    %31 = vector.shape_cast %30 : vector<9xf32> to vector<9x1xf32>
    %cst_21 = arith.constant 3.200000e+01 : f32
    %32 = vector.broadcast %cst_21 : f32 to vector<9x1xf32>
    %33 = arith.divf %31, %32 : vector<9x1xf32>
    %34 = vector.broadcast %26 : vector<9x1xf32> to vector<9x32xf32>
    %35 = arith.subf %3, %34 : vector<9x32xf32>
    %cst_22 = arith.constant 9.99999974E-6 : f32
    %36 = vector.broadcast %cst_22 : f32 to vector<9x1xf32>
    %37 = arith.addf %33, %36 : vector<9x1xf32>
    %38 = math.rsqrt %37 : vector<9x1xf32>
    %39 = vector.broadcast %38 : vector<9x1xf32> to vector<9x32xf32>
    %40 = arith.mulf %35, %39 : vector<9x32xf32>
    %41 = vector.broadcast %15 : vector<1x32xf32> to vector<9x32xf32>
    %42 = arith.mulf %40, %41 : vector<9x32xf32>
    %43 = vector.broadcast %16 : vector<1x32xf32> to vector<9x32xf32>
    %44 = arith.addf %42, %43 : vector<9x32xf32>
    %45 = arith.truncf %44 : vector<9x32xf32> to vector<9x32xbf16>
    %cst_23 = arith.constant dense<0.000000e+00> : vector<9x96xf32>
    %46 = tpu.matmul %45, %6, %cst_23 {dimension_numbers = #tpu.dot_dimension_numbers<[1], [0], [0], [1], [0, 0, 1, 1], [], []>} : vector<9x32xbf16>, vector<32x96xbf16>, vector<9x96xf32> -> vector<9x96xf32>
    %47 = vector.broadcast %22 : vector<1x96xf32> to vector<9x96xf32>
    %48 = arith.addf %46, %47 : vector<9x96xf32>
    %49 = vector.extract_strided_slice %48 {offsets = [0, 0], sizes = [9, 16], strides = [1, 1]} : vector<9x96xf32> to vector<9x16xf32>
    %50 = vector.extract_strided_slice %48 {offsets = [0, 32], sizes = [9, 16], strides = [1, 1]} : vector<9x96xf32> to vector<9x16xf32>
    %51 = vector.extract_strided_slice %48 {offsets = [0, 64], sizes = [9, 16], strides = [1, 1]} : vector<9x96xf32> to vector<9x16xf32>
    %52 = tpu.transpose %50, [1, 0] : vector<9x16xf32> -> vector<16x9xf32>
    %cst_24 = arith.constant dense<0.000000e+00> : vector<9x9xf32>
    %53 = tpu.matmul %49, %52, %cst_24 {dimension_numbers = #tpu.dot_dimension_numbers<[1], [0], [0], [1], [0, 0, 1, 1], [], []>} : vector<9x16xf32>, vector<16x9xf32>, vector<9x9xf32> -> vector<9x9xf32>
    %cst_25 = arith.constant 2.500000e-01 : f32
    %54 = vector.broadcast %cst_25 : f32 to vector<9x9xf32>
    %55 = arith.mulf %53, %54 : vector<9x9xf32>
    %56 = vector.broadcast %4 : vector<1x9xf32> to vector<9x9xf32>
    %57 = arith.addf %55, %56 : vector<9x9xf32>
    %cst_26 = arith.constant dense<0xFF800000> : vector<9xf32>
    %58 = vector.multi_reduction <maximumf>, %57, %cst_26 [1] : vector<9x9xf32> to vector<9xf32>
    %59 = vector.shape_cast %58 : vector<9xf32> to vector<9x1xf32>
    %60 = vector.broadcast %59 : vector<9x1xf32> to vector<9x9xf32>
    %61 = arith.subf %57, %60 : vector<9x9xf32>
    %62 = math.exp %61 : vector<9x9xf32>
    %cst_27 = arith.constant dense<0.000000e+00> : vector<9xf32>
    %63 = vector.multi_reduction <add>, %62, %cst_27 [1] : vector<9x9xf32> to vector<9xf32>
    %64 = vector.shape_cast %63 : vector<9xf32> to vector<9x1xf32>
    %65 = tpu.reciprocal %64 {approx = true} : vector<9x1xf32> -> vector<9x1xf32>
    %66 = vector.broadcast %65 : vector<9x1xf32> to vector<9x9xf32>
    %67 = arith.mulf %62, %66 : vector<9x9xf32>
    %cst_28 = arith.constant dense<0.000000e+00> : vector<9x16xf32>
    %68 = tpu.matmul %67, %51, %cst_28 {dimension_numbers = #tpu.dot_dimension_numbers<[1], [0], [0], [1], [0, 0, 1, 1], [], []>} : vector<9x9xf32>, vector<9x16xf32>, vector<9x16xf32> -> vector<9x16xf32>
    %69 = vector.extract_strided_slice %62 {offsets = [5, 1], sizes = [4, 4], strides = [1, 1]} : vector<9x9xf32> to vector<4x4xf32>
    %70 = vector.extract_strided_slice %64 {offsets = [5, 0], sizes = [4, 1], strides = [1, 1]} : vector<9x1xf32> to vector<4x1xf32>
    %71 = vector.broadcast %70 : vector<4x1xf32> to vector<4x4xf32>
    %72 = arith.divf %69, %71 : vector<4x4xf32>
    %cst_29 = arith.constant dense<0.000000e+00> : vector<4xf32>
    %73 = vector.multi_reduction <add>, %72, %cst_29 [0] : vector<4x4xf32> to vector<4xf32>
    %74 = vector.shape_cast %73 : vector<4xf32> to vector<1x4xf32>
    %75 = vector.extract_strided_slice %48 {offsets = [0, 16], sizes = [9, 16], strides = [1, 1]} : vector<9x96xf32> to vector<9x16xf32>
    %76 = vector.extract_strided_slice %48 {offsets = [0, 48], sizes = [9, 16], strides = [1, 1]} : vector<9x96xf32> to vector<9x16xf32>
    %77 = vector.extract_strided_slice %48 {offsets = [0, 80], sizes = [9, 16], strides = [1, 1]} : vector<9x96xf32> to vector<9x16xf32>
    %78 = tpu.transpose %76, [1, 0] : vector<9x16xf32> -> vector<16x9xf32>
    %cst_30 = arith.constant dense<0.000000e+00> : vector<9x9xf32>
    %79 = tpu.matmul %75, %78, %cst_30 {dimension_numbers = #tpu.dot_dimension_numbers<[1], [0], [0], [1], [0, 0, 1, 1], [], []>} : vector<9x16xf32>, vector<16x9xf32>, vector<9x9xf32> -> vector<9x9xf32>
    %cst_31 = arith.constant 2.500000e-01 : f32
    %80 = vector.broadcast %cst_31 : f32 to vector<9x9xf32>
    %81 = arith.mulf %79, %80 : vector<9x9xf32>
    %82 = vector.broadcast %4 : vector<1x9xf32> to vector<9x9xf32>
    %83 = arith.addf %81, %82 : vector<9x9xf32>
    %cst_32 = arith.constant dense<0xFF800000> : vector<9xf32>
    %84 = vector.multi_reduction <maximumf>, %83, %cst_32 [1] : vector<9x9xf32> to vector<9xf32>
    %85 = vector.shape_cast %84 : vector<9xf32> to vector<9x1xf32>
    %86 = vector.broadcast %85 : vector<9x1xf32> to vector<9x9xf32>
    %87 = arith.subf %83, %86 : vector<9x9xf32>
    %88 = math.exp %87 : vector<9x9xf32>
    %cst_33 = arith.constant dense<0.000000e+00> : vector<9xf32>
    %89 = vector.multi_reduction <add>, %88, %cst_33 [1] : vector<9x9xf32> to vector<9xf32>
    %90 = vector.shape_cast %89 : vector<9xf32> to vector<9x1xf32>
    %91 = tpu.reciprocal %90 {approx = true} : vector<9x1xf32> -> vector<9x1xf32>
    %92 = vector.broadcast %91 : vector<9x1xf32> to vector<9x9xf32>
    %93 = arith.mulf %88, %92 : vector<9x9xf32>
    %cst_34 = arith.constant dense<0.000000e+00> : vector<9x16xf32>
    %94 = tpu.matmul %93, %77, %cst_34 {dimension_numbers = #tpu.dot_dimension_numbers<[1], [0], [0], [1], [0, 0, 1, 1], [], []>} : vector<9x9xf32>, vector<9x16xf32>, vector<9x16xf32> -> vector<9x16xf32>
    %95 = vector.extract_strided_slice %88 {offsets = [5, 1], sizes = [4, 4], strides = [1, 1]} : vector<9x9xf32> to vector<4x4xf32>
    %96 = vector.extract_strided_slice %90 {offsets = [5, 0], sizes = [4, 1], strides = [1, 1]} : vector<9x1xf32> to vector<4x1xf32>
    %97 = vector.broadcast %96 : vector<4x1xf32> to vector<4x4xf32>
    %98 = arith.divf %95, %97 : vector<4x4xf32>
    %cst_35 = arith.constant dense<0.000000e+00> : vector<4xf32>
    %99 = vector.multi_reduction <add>, %98, %cst_35 [0] : vector<4x4xf32> to vector<4xf32>
    %100 = vector.shape_cast %99 : vector<4xf32> to vector<1x4xf32>
    %101 = arith.addf %74, %100 : vector<1x4xf32>
    %102 = tpu.concatenate %68, %94 in 1 : vector<9x16xf32>, vector<9x16xf32> -> vector<9x32xf32>
    %103 = arith.truncf %102 : vector<9x32xf32> to vector<9x32xbf16>
    %cst_36 = arith.constant dense<0.000000e+00> : vector<9x32xf32>
    %104 = tpu.matmul %103, %8, %cst_36 {dimension_numbers = #tpu.dot_dimension_numbers<[1], [0], [0], [1], [0, 0, 1, 1], [], []>} : vector<9x32xbf16>, vector<32x32xbf16>, vector<9x32xf32> -> vector<9x32xf32>
    %105 = vector.broadcast %19 : vector<1x32xf32> to vector<9x32xf32>
    %106 = arith.addf %104, %105 : vector<9x32xf32>
    %107 = arith.addf %3, %106 : vector<9x32xf32>
    %cst_37 = arith.constant dense<0.000000e+00> : vector<9xf32>
    %108 = vector.multi_reduction <add>, %107, %cst_37 [1] : vector<9x32xf32> to vector<9xf32>
    %109 = vector.shape_cast %108 : vector<9xf32> to vector<9x1xf32>
    %cst_38 = arith.constant 3.200000e+01 : f32
    %110 = vector.broadcast %cst_38 : f32 to vector<9x1xf32>
    %111 = arith.divf %109, %110 : vector<9x1xf32>
    %112 = vector.broadcast %111 : vector<9x1xf32> to vector<9x32xf32>
    %113 = arith.subf %107, %112 : vector<9x32xf32>
    %114 = arith.mulf %113, %113 : vector<9x32xf32>
    %cst_39 = arith.constant dense<0.000000e+00> : vector<9xf32>
    %115 = vector.multi_reduction <add>, %114, %cst_39 [1] : vector<9x32xf32> to vector<9xf32>
    %116 = vector.shape_cast %115 : vector<9xf32> to vector<9x1xf32>
    %cst_40 = arith.constant 3.200000e+01 : f32
    %117 = vector.broadcast %cst_40 : f32 to vector<9x1xf32>
    %118 = arith.divf %116, %117 : vector<9x1xf32>
    %119 = vector.broadcast %111 : vector<9x1xf32> to vector<9x32xf32>
    %120 = arith.subf %107, %119 : vector<9x32xf32>
    %cst_41 = arith.constant 9.99999974E-6 : f32
    %121 = vector.broadcast %cst_41 : f32 to vector<9x1xf32>
    %122 = arith.addf %118, %121 : vector<9x1xf32>
    %123 = math.rsqrt %122 : vector<9x1xf32>
    %124 = vector.broadcast %123 : vector<9x1xf32> to vector<9x32xf32>
    %125 = arith.mulf %120, %124 : vector<9x32xf32>
    %126 = vector.broadcast %17 : vector<1x32xf32> to vector<9x32xf32>
    %127 = arith.mulf %125, %126 : vector<9x32xf32>
    %128 = vector.broadcast %18 : vector<1x32xf32> to vector<9x32xf32>
    %129 = arith.addf %127, %128 : vector<9x32xf32>
    %130 = arith.truncf %129 : vector<9x32xf32> to vector<9x32xbf16>
    %cst_42 = arith.constant dense<0.000000e+00> : vector<9x128xf32>
    %131 = tpu.matmul %130, %10, %cst_42 {dimension_numbers = #tpu.dot_dimension_numbers<[1], [0], [0], [1], [0, 0, 1, 1], [], []>} : vector<9x32xbf16>, vector<32x128xbf16>, vector<9x128xf32> -> vector<9x128xf32>
    %132 = vector.broadcast %21 : vector<1x128xf32> to vector<9x128xf32>
    %133 = arith.addf %131, %132 : vector<9x128xf32>
    %cst_43 = arith.constant 1.702000e+00 : f32
    %134 = vector.broadcast %cst_43 : f32 to vector<9x128xf32>
    %135 = arith.mulf %134, %133 : vector<9x128xf32>
    %136 = arith.negf %135 : vector<9x128xf32>
    %137 = math.exp %136 : vector<9x128xf32>
    %cst_44 = arith.constant 1.000000e+00 : f32
    %138 = vector.broadcast %cst_44 : f32 to vector<9x128xf32>
    %139 = arith.addf %138, %137 : vector<9x128xf32>
    %140 = arith.divf %138, %139 : vector<9x128xf32>
    %141 = arith.mulf %133, %140 : vector<9x128xf32>
    %142 = arith.truncf %141 : vector<9x128xf32> to vector<9x128xbf16>
    %cst_45 = arith.constant dense<0.000000e+00> : vector<9x32xf32>
    %143 = tpu.matmul %142, %12, %cst_45 {dimension_numbers = #tpu.dot_dimension_numbers<[1], [0], [0], [1], [0, 0, 1, 1], [], []>} : vector<9x128xbf16>, vector<128x32xbf16>, vector<9x32xf32> -> vector<9x32xf32>
    %144 = arith.addf %107, %143 : vector<9x32xf32>
    %145 = vector.broadcast %20 : vector<1x32xf32> to vector<9x32xf32>
    %146 = arith.addf %144, %145 : vector<9x32xf32>
    %cst_46 = arith.constant 8.000000e+00 : f32
    %147 = vector.broadcast %cst_46 : f32 to vector<1x4xf32>
    %148 = arith.divf %101, %147 : vector<1x4xf32>
    %c0_47 = arith.constant 0 : index
    %c0_48 = arith.constant 0 : index
    %149 = vector.load %arg17[%c0_47, %c0_48] : memref<9x32xf32, #tpu.memory_space<vmem>>, vector<9x32xf32>
    tpu.vector_store %arg17[%c0_47, %c0_48], %146 {strides = array<i32>} : memref<9x32xf32, #tpu.memory_space<vmem>>, vector<9x32xf32>,
    %c2_i32 = arith.constant 2 : i32
    %150 = arith.cmpi eq, %arg1, %c2_i32 : i32
    %151 = arith.extui %150 : i1 to i32
    %c0_i32_49 = arith.constant 0 : i32
    %152 = arith.cmpi ne, %151, %c0_i32_49 : i32
    scf.if %152 {
      %156 = tpu.iota {dimensions = array<i32: 1>} : vector<1x4xi32>
      %157 = arith.sitofp %156 : vector<1x4xi32> to vector<1x4xf32>
      %158 = tpu.iota {dimensions = array<i32: 1>} : vector<1x9xi32>
      %159 = arith.sitofp %158 : vector<1x9xi32> to vector<1x9xf32>
      %c0_51 = arith.constant 0 : index
      %c0_52 = arith.constant 0 : index
      %160 = vector.load %arg18[%c0_51, %c0_52] : memref<1x9xf32, #tpu.memory_space<vmem>>, vector<1x9xf32>
      %cst_53 = arith.constant dense<0x7F800000> : vector<1xf32>
      %161 = vector.multi_reduction <minimumf>, %148, %cst_53 [1] : vector<1x4xf32> to vector<1xf32>
      %162 = vector.shape_cast %161 : vector<1xf32> to vector<1x1xf32>
      %163 = vector.broadcast %162 : vector<1x1xf32> to vector<1x4xf32>
      %164 = arith.cmpf oeq, %148, %163 : vector<1x4xf32>
      %cst_54 = arith.constant 1.000000e+09 : f32
      %165 = vector.broadcast %cst_54 : f32 to vector<1x4xf32>
      %166 = arith.select %164, %157, %165 : vector<1x4xi1>, vector<1x4xf32>
      %cst_55 = arith.constant dense<0x7F800000> : vector<1xf32>
      %167 = vector.multi_reduction <minimumf>, %166, %cst_55 [1] : vector<1x4xf32> to vector<1xf32>
      %168 = vector.shape_cast %167 : vector<1xf32> to vector<1x1xf32>
      %cst_56 = arith.constant 1.000000e+00 : f32
      %169 = vector.broadcast %cst_56 : f32 to vector<1x1xf32>
      %170 = arith.addf %168, %169 : vector<1x1xf32>
      %171 = vector.broadcast %170 : vector<1x1xf32> to vector<1x9xf32>
      %172 = arith.cmpf oeq, %159, %171 : vector<1x9xf32>
      %cst_57 = arith.constant -1.000000e+30 : f32
      %173 = vector.broadcast %cst_57 : f32 to vector<1x9xf32>
      %174 = arith.select %172, %173, %160 : vector<1x9xi1>, vector<1x9xf32>
      %c0_58 = arith.constant 0 : index
      %c0_59 = arith.constant 0 : index
      %175 = vector.load %arg18[%c0_58, %c0_59] : memref<1x9xf32, #tpu.memory_space<vmem>>, vector<1x9xf32>
      tpu.vector_store %arg18[%c0_58, %c0_59], %174 {strides = array<i32>} : memref<1x9xf32, #tpu.memory_space<vmem>>, vector<1x9xf32>,
    } else {
    }
    %c3_i32 = arith.constant 3 : i32
    %153 = arith.cmpi eq, %arg1, %c3_i32 : i32
    %154 = arith.extui %153 : i1 to i32
    %c0_i32_50 = arith.constant 0 : i32
    %155 = arith.cmpi ne, %154, %c0_i32_50 : i32
    scf.if %155 {
      %156 = vector.extract_strided_slice %146 {offsets = [0, 0], sizes = [1, 32], strides = [1, 1]} : vector<9x32xf32> to vector<1x32xf32>
      %c0_51 = arith.constant 0 : index
      %c0_52 = arith.constant 0 : index
      %157 = vector.load %arg15[%c0_51, %c0_52] : memref<4x256xf32, #tpu.memory_space<vmem>>, vector<1x256xf32>
      %c1 = arith.constant 1 : index
      %c0_53 = arith.constant 0 : index
      %158 = vector.load %arg15[%c1, %c0_53] : memref<4x256xf32, #tpu.memory_space<vmem>>, vector<1x256xf32>
      %c2 = arith.constant 2 : index
      %c0_54 = arith.constant 0 : index
      %159 = vector.load %arg15[%c2, %c0_54] : memref<4x256xf32, #tpu.memory_space<vmem>>, vector<1x256xf32>
      %c3 = arith.constant 3 : index
      %c0_55 = arith.constant 0 : index
      %160 = vector.load %arg15[%c3, %c0_55] : memref<4x256xf32, #tpu.memory_space<vmem>>, vector<1x4xf32>
      %161 = arith.truncf %156 : vector<1x32xf32> to vector<1x32xbf16>
      %c0_56 = arith.constant 0 : index
      %c0_57 = arith.constant 0 : index
      %162 = vector.load %arg11[%c0_56, %c0_57] : memref<32x256xbf16, #tpu.memory_space<vmem>>, vector<32x256xbf16>
      %cst_58 = arith.constant dense<0.000000e+00> : vector<1x256xf32>
      %163 = tpu.matmul %161, %162, %cst_58 {dimension_numbers = #tpu.dot_dimension_numbers<[1], [0], [0], [1], [0, 0, 1, 1], [], []>} : vector<1x32xbf16>, vector<32x256xbf16>, vector<1x256xf32> -> vector<1x256xf32>
      %164 = arith.addf %163, %157 : vector<1x256xf32>
      %165 = arith.truncf %164 : vector<1x256xf32> to vector<1x256xbf16>
      %c0_59 = arith.constant 0 : index
      %c0_60 = arith.constant 0 : index
      %166 = vector.load %arg12[%c0_59, %c0_60] : memref<256x256xbf16, #tpu.memory_space<vmem>>, vector<256x256xbf16>
      %cst_61 = arith.constant dense<0.000000e+00> : vector<1x256xf32>
      %167 = tpu.matmul %165, %166, %cst_61 {dimension_numbers = #tpu.dot_dimension_numbers<[1], [0], [0], [1], [0, 0, 1, 1], [], []>} : vector<1x256xbf16>, vector<256x256xbf16>, vector<1x256xf32> -> vector<1x256xf32>
      %168 = arith.addf %167, %158 : vector<1x256xf32>
      %cst_62 = arith.constant 0.000000e+00 : f32
      %169 = vector.broadcast %cst_62 : f32 to vector<1x256xf32>
      %170 = arith.maximumf %168, %169 : vector<1x256xf32>
      %171 = arith.truncf %170 : vector<1x256xf32> to vector<1x256xbf16>
      %c0_63 = arith.constant 0 : index
      %c0_64 = arith.constant 0 : index
      %172 = vector.load %arg13[%c0_63, %c0_64] : memref<256x256xbf16, #tpu.memory_space<vmem>>, vector<256x256xbf16>
      %cst_65 = arith.constant dense<0.000000e+00> : vector<1x256xf32>
      %173 = tpu.matmul %171, %172, %cst_65 {dimension_numbers = #tpu.dot_dimension_numbers<[1], [0], [0], [1], [0, 0, 1, 1], [], []>} : vector<1x256xbf16>, vector<256x256xbf16>, vector<1x256xf32> -> vector<1x256xf32>
      %174 = arith.addf %173, %159 : vector<1x256xf32>
      %cst_66 = arith.constant 0.000000e+00 : f32
      %175 = vector.broadcast %cst_66 : f32 to vector<1x256xf32>
      %176 = arith.maximumf %174, %175 : vector<1x256xf32>
      %177 = arith.truncf %176 : vector<1x256xf32> to vector<1x256xbf16>
      %c0_67 = arith.constant 0 : index
      %c0_68 = arith.constant 0 : index
      %178 = vector.load %arg14[%c0_67, %c0_68] : memref<256x4xbf16, #tpu.memory_space<vmem>>, vector<256x4xbf16>
      %cst_69 = arith.constant dense<0.000000e+00> : vector<1x4xf32>
      %179 = tpu.matmul %177, %178, %cst_69 {dimension_numbers = #tpu.dot_dimension_numbers<[1], [0], [0], [1], [0, 0, 1, 1], [], []>} : vector<1x256xbf16>, vector<256x4xbf16>, vector<1x4xf32> -> vector<1x4xf32>
      %180 = arith.addf %179, %160 : vector<1x4xf32>
      %181 = arith.negf %180 : vector<1x4xf32>
      %182 = math.exp %181 : vector<1x4xf32>
      %cst_70 = arith.constant 1.000000e+00 : f32
      %183 = vector.broadcast %cst_70 : f32 to vector<1x4xf32>
      %184 = arith.addf %183, %182 : vector<1x4xf32>
      %185 = arith.divf %183, %184 : vector<1x4xf32>
      %c0_71 = arith.constant 0 : index
      %c0_72 = arith.constant 0 : index
      %c0_73 = arith.constant 0 : index
      %186 = vector.load %arg16[%c0_71, %c0_72, %c0_73] : memref<1x1x4xf32, #tpu.memory_space<vmem>>, vector<1x1x4xf32>
      %187 = vector.shape_cast %186 : vector<1x1x4xf32> to vector<1x4xf32>
      %188 = vector.shape_cast %185 : vector<1x4xf32> to vector<1x1x4xf32>
      tpu.vector_store %arg16[%c0_71, %c0_72, %c0_73], %188 {strides = array<i32>} : memref<1x1x4xf32, #tpu.memory_space<vmem>>, vector<1x1x4xf32>,
    } else {
    }
    return
  }
  func.func @transform_0(%arg0: i32, %arg1: i32) -> (i32, i32, i32) {
    %c0_i32 = arith.constant 0 : i32
    %c0_i32_0 = arith.constant 0 : i32
    %c0_i32_1 = arith.constant 0 : i32
    return %arg0, %c0_i32, %c0_i32_0 : i32, i32, i32
  }
  func.func @transform_1(%arg0: i32, %arg1: i32) -> (i32, i32, i32) {
    %c0_i32 = arith.constant 0 : i32
    %c0_i32_0 = arith.constant 0 : i32
    %c0_i32_1 = arith.constant 0 : i32
    return %arg0, %c0_i32, %c0_i32_0 : i32, i32, i32
  }
  func.func @transform_2(%arg0: i32, %arg1: i32) -> (i32, i32) {
    %c0_i32 = arith.constant 0 : i32
    %c0_i32_0 = arith.constant 0 : i32
    %c0_i32_1 = arith.constant 0 : i32
    return %c0_i32, %c0_i32_0 : i32, i32
  }
  func.func @transform_3(%arg0: i32, %arg1: i32) -> (i32, i32) {
    %c0_i32 = arith.constant 0 : i32
    %c0_i32_0 = arith.constant 0 : i32
    %c0_i32_1 = arith.constant 0 : i32
    return %c0_i32, %c0_i32_0 : i32, i32
  }
  func.func @transform_4(%arg0: i32, %arg1: i32) -> (i32, i32, i32) {
    %c0_i32 = arith.constant 0 : i32
    %c0_i32_0 = arith.constant 0 : i32
    %c0_i32_1 = arith.constant 0 : i32
    return %arg1, %c0_i32, %c0_i32_0 : i32, i32, i32
  }
  func.func @transform_5(%arg0: i32, %arg1: i32) -> (i32, i32, i32) {
    %c0_i32 = arith.constant 0 : i32
    %c0_i32_0 = arith.constant 0 : i32
    %c0_i32_1 = arith.constant 0 : i32
    return %arg1, %c0_i32, %c0_i32_0 : i32, i32, i32
  }
  func.func @transform_6(%arg0: i32, %arg1: i32) -> (i32, i32, i32) {
    %c0_i32 = arith.constant 0 : i32
    %c0_i32_0 = arith.constant 0 : i32
    %c0_i32_1 = arith.constant 0 : i32
    return %arg1, %c0_i32, %c0_i32_0 : i32, i32, i32
  }
  func.func @transform_7(%arg0: i32, %arg1: i32) -> (i32, i32, i32) {
    %c0_i32 = arith.constant 0 : i32
    %c0_i32_0 = arith.constant 0 : i32
    %c0_i32_1 = arith.constant 0 : i32
    return %arg1, %c0_i32, %c0_i32_0 : i32, i32, i32
  }
  func.func @transform_8(%arg0: i32, %arg1: i32) -> (i32, i32, i32) {
    %c0_i32 = arith.constant 0 : i32
    %c0_i32_0 = arith.constant 0 : i32
    %c0_i32_1 = arith.constant 0 : i32
    return %arg1, %c0_i32, %c0_i32_0 : i32, i32, i32
  }
  func.func @transform_9(%arg0: i32, %arg1: i32) -> (i32, i32) {
    %c0_i32 = arith.constant 0 : i32
    %c0_i32_0 = arith.constant 0 : i32
    %c0_i32_1 = arith.constant 0 : i32
    return %c0_i32, %c0_i32_0 : i32, i32
  }
  func.func @transform_10(%arg0: i32, %arg1: i32) -> (i32, i32) {
    %c0_i32 = arith.constant 0 : i32
    %c0_i32_0 = arith.constant 0 : i32
    %c0_i32_1 = arith.constant 0 : i32
    return %c0_i32, %c0_i32_0 : i32, i32
  }
  func.func @transform_11(%arg0: i32, %arg1: i32) -> (i32, i32) {
    %c0_i32 = arith.constant 0 : i32
    %c0_i32_0 = arith.constant 0 : i32
    %c0_i32_1 = arith.constant 0 : i32
    return %c0_i32, %c0_i32_0 : i32, i32
  }
  func.func @transform_12(%arg0: i32, %arg1: i32) -> (i32, i32) {
    %c0_i32 = arith.constant 0 : i32
    %c0_i32_0 = arith.constant 0 : i32
    %c0_i32_1 = arith.constant 0 : i32
    return %c0_i32, %c0_i32_0 : i32, i32
  }
  func.func @transform_13(%arg0: i32, %arg1: i32) -> (i32, i32) {
    %c0_i32 = arith.constant 0 : i32
    %c0_i32_0 = arith.constant 0 : i32
    %c0_i32_1 = arith.constant 0 : i32
    return %c0_i32, %c0_i32_0 : i32, i32
  }
  func.func @transform_14(%arg0: i32, %arg1: i32) -> (i32, i32, i32) {
    %c0_i32 = arith.constant 0 : i32
    %c0_i32_0 = arith.constant 0 : i32
    %c0_i32_1 = arith.constant 0 : i32
    return %arg0, %c0_i32, %c0_i32_0 : i32, i32, i32
  }
}

</mosaic_0001>

<bundles_post_ra>
// kernel: fsvg_forward.2
= control target key start
LH: loop header
LB: loop body
LE: loop exit
PB: predicated region body
PF: predicated region fallthrough
CT: control target
= control target key end

     0   :  { %s1705_s30 = smov 0   ;;  %s1707_s10 = smov 0   ;;  %s1914_s0 = inlined_call_operand.vmem [shape: f32[2,4,16], index: 0, kind: input, shape index: {}]   ;;  %s1915_s1 = inlined_call_operand.vmem [shape: bf16[2,16,48], index: 1, kind: input, shape index: {}]   ;;  %s1916_s2 = inlined_call_operand.vmem [shape: bf16[2,16,16], index: 2, kind: input, shape index: {}]   ;;  %s1917_s3 = inlined_call_operand.vmem [shape: bf16[2,16,64], index: 3, kind: input, shape index: {}]   ;;  %s1918_s4 = inlined_call_operand.vmem [shape: bf16[2,64,16], index: 4, kind: input, shape index: {}]   ;;  %s1919_s5 = inlined_call_operand.vmem [shape: f32[2,8,128], index: 5, kind: input, shape index: {}]   ;;  %s1920_s6 = inlined_call_operand.vmem [shape: f32[8,128], index: 6, kind: input, shape index: {}]   ;;  %s1921_s7 = inlined_call_operand.vmem [shape: bf16[16,16], index: 7, kind: input, shape index: {}]   ;;  %s1922_s8 = inlined_call_operand.vmem [shape: bf16[16,32], index: 8, kind: input, shape index: {}]   ;;  %s1923_s9 = inlined_call_operand.vmem [shape: f32[2,4,32], index: 9, kind: output, shape index: {}]  }
   0x1   :  { %1926 = sst [smem:[#allocation7_spill]] %s1914_s0  ;;  %s1709_s11 = smov 0  }
   0x2   :  { %1927 = sst [smem:[#allocation8_spill]] %s1915_s1  ;;  %s1711_s12 = smov 0  }
   0x3   :  { %s1713_s13 = smov 0  }
   0x4 LB: > { %1928 = sst [smem:[#allocation3_spill]] %s1635_s11  ;;  %s28_s14 = sadd.s32 1, %s1635_s11  ;;  %s1643_s13 = sphi %s1713_s13, %s19_s13   ;;  %s1639_s12 = sphi %s1711_s12, %s1937_s12   ;;  %s1635_s11 = sphi %s1709_s11, %s1936_s11   ;;  %s1631_s10 = sphi %s1707_s10, %s1935_s10   ;;  %s1627_s30 = sphi %s1705_s30, %s1934_s30  }
   0x5   : > { %1929 = sst [smem:[#allocation4_spill]] %s1639_s12  ;;  %s31_s15 = sadd.s32 1, %s1639_s12 }
   0x6   : > { %p29_p0 = scmp.ge.s32.totalorder %s28_s14, 2  ;;  %p1397_p1 = scmp.ge.s32.totalorder %s1643_s13, 1 }
   0x7   : > { %p347_p2 = scmp.lt.s32.totalorder %s1643_s13, 5 }
   0x8   : > { %s1939_s14 = smov (%p29_p0, %s28_s14), 0  ;;  %s1941_s15 = smov (!%p29_p0, %s31_s15), %s1639_s12 }
   0x9   : > { %1930 = sst [smem:[#allocation5_spill]] %s1939_s14  ;;  %p348_p3 = pnand %p1397_p1, %p347_p2 }
   0xa   : > { %p33_p4 = scmp.ge.s32.totalorder %s1941_s15, 2  ;;  %p405_p5 = scmp.lt.s32.totalorder (!%p348_p3), %s1631_s10, 1 }
   0xb   : > { %351 = sbr.rel (%p348_p3) target bundleno = 3592 (0xe08), region = 56  ;;  %p409_p6 = scmp.lt.s32.totalorder (!%p348_p3), %s1627_s30, 1 }
   0xc   : > { %s1943_s15 = smov (%p33_p4, %s1941_s15), 0  ;;  %s1932_s0 = sld [smem:[#allocation7_spill]] (!%p348_p3) }
   0xd   : > { %1931 = sst [smem:[#allocation6_spill]] %s1943_s15  ;;  %s1933_s1 = sld [smem:[#allocation8_spill]] (!%p348_p3) }
   0xe   : > { %p1409_p7 = scmp.ne.s32.totalorder (!%p348_p3), %s1627_s30, 0 }
  0x12   : > { %s1945_s10 = smov (!%p405_p5, %s1631_s10), 1  ;;  %vm443_vm0 = vcmask (!%p1409_p7), 125952  }
  0x13   : > { %s410_s16 = scalar_select %p409_p6, %s1627_s30, 1 }
  0x14   : > { %s1398_s17 = sshll.u32 %s1945_s10, 2  ;;  %441 = sbr.rel (%p1409_p7) target bundleno = 27 (0x1b), region = 60 }
  0x15   : > { %s408_s20 = scalar_lea.vmem %s1932_s0, %s1398_s17  ;;  %s1742_s21 = sshll.u32 %s410_s16, 3 }
  0x16   : > { %s413_s24 = scalar_lea.vmem %s1933_s1, %s1742_s21  ;;  %s418_s27 = scalar_lea.vmem %s1916_s2, %s1742_s21  ;;  %v442_v0 = vld [vmem:[%s408_s20] sm:$0xf] (!%p1409_p7) }
  0x17   : > { %s423_s10 = scalar_lea.vmem %s1917_s3, %s1742_s21  ;;  %s1440_s18 = sshll.u32 %s410_s16, 5  ;;  %444 = vst.msk [vmem:[#allocation2] sm:$0xf] (!%p1409_p7), %vm443_vm0, %v442_v0 }
  0x18   : > { %s1759_s15 = scalar_lea.vmem %s1918_s4, %s1440_s18  ;;  %s432_s23 = scalar_lea.vmem %s1919_s5, %s1742_s21 }
  0x19   : > { %s1768_s11 = scalar_lea.vmem %s1923_s9, %s1398_s17 }
  0x1b PF: > { %vm467_vm1 = vcmask 125952   ;;  %v1576_v8 = vld [vmem:[%s413_s24] sm:$0xff]   ;;  %v1645_v9 = vmov 0.0   ;;  %vm1646_vm2 = vmmov 0   ;;  %v445_v12 = vlaneseq  ;;  %s1647_s12 = smov 120   ;;  %s1648_s14 = smov 112  }
  0x1c   : > { %1464 = vmatprep.subr.bf16.mxu1 %v1645_v9  ;;  %1466 = vmatprep.mubr.msk.bf16.mxu1 %vm1646_vm2, %v1645_v9  ;;  %v1792_v16 = vld [vmem:[%s432_s23] sm:$0xff]  ;;  %vm503_vm3 = vcmask 130048   ;;  %s1649_s16 = smov 104   ;;  %vm550_vm4 = vcmask 64512   ;;  %vm627_vm6 = vcmask 27648   ;;  %s1650_s17 = smov 88  }
  0x1d   : > { %1465 = vmatpush3.bf16.msra.mxu1 %v1576_v8  ;;  %1480 = vmatprep.subr.mxu0 %v1645_v9  ;;  %v1784_v14 = vshrl.u32 %v445_v12, 7  ;;  %v448_v35 = vand.u32 127, %v445_v12  ;;  %s1651_s20 = smov 96   ;;  %vm645_vm7 = vcmask 1043456   ;;  %vm641_vm8 = vcmask 31744   ;;  %s1652_s26 = smov 8  }
  0x1e   : > { %v1771_v1 = vld [vmem:[#allocation2] sm:$0xf]  ;;  %1470 = vmatprep.subr.mxu1 %v1645_v9  ;;  %1482 = vmatprep.mubr.msk.f32.mxu0 %vm1646_vm2, %v1645_v9  ;;  %vm1056_vm9 = vcmask 523264   ;;  %p1430_p8 = scmp.ne.s32.totalorder %s1627_s30, 1 }
  0x1f   : > { %v468_v2 = vsel %vm467_vm1, %v1771_v1, 0.0  ;;  %v484_v15 = vsub.s32 0, %v1784_v14  ;;  %v489_v17 = vsub.s32 1, %v1784_v14  ;;  %v495_v25 = vsub.s32 7, %v1784_v14 }
  0x20   : > { %469 = vadd.xlane.f32.xlu0 %v468_v2  ;;  %vm449_vm5 = vcmp.gt.s32.totalorder %v448_v35, %v1784_v14  ;;  %v1577_v2 = vld [vmem:[%s418_s27] sm:$0xff]   ;;  %vm1654_vm10 = vmmov (!%p1430_p8), 0   ;;  %vm1243_vm11 = vcmask (!%p1430_p8), 257024  }
  0x21   : > { %v485_v18 = vrot.slane %v1792_v16, %v484_v15  ;;  %v490_v21 = vrot.slane %v1792_v16, %v489_v17  ;;  %v496_v26 = vrot.slane %v1792_v16, %v495_v25  ;;  %v450_v37 = vsel %vm449_vm5, -1e+30, %v1645_v9 }
  0xad   : > { %v470_v3 = vpop.xlane.xlu0 %469 }
  0xae   : > { %v472_v4 = vmul.f32 0.0625, %v470_v3 }
  0xb0   : > { %v473_v5 = vsub.f32 %v1771_v1, %v472_v4 }
  0xb2   : > { %v474_v6 = vmul.f32 %v473_v5, %v473_v5 }
  0xb4   : > { %v475_v7 = vsel %vm467_vm1, %v474_v6, 0.0 }
  0xb5   : > { %476 = vadd.xlane.f32.xlu0 %v475_v7 }
 0x142   : > { %v477_v10 = vpop.xlane.xlu0 %476 }
 0x143   : > { %v478_v11 = vmul.f32 0.0625, %v477_v10 }
 0x145   : > { %v479_v13 = vadd.f32 1e-05, %v478_v11  ;;  %v894_v11 = vsub.s32 4, %v1784_v14 }
 0x147   : > { %1583 = vrsqrt.f32 %v479_v13  ;;  %v895_v12 = vrot.slane %v1792_v16, %v894_v11 }
 0x151   : > { %v1584_v19 = vpop.eup %1583 }
 0x152   : > { %v481_v20 = vmul.f32 %v1584_v19, %v473_v5 }
 0x154   : > { %v486_v22 = vmul.f32 %v485_v18, %v481_v20 }
 0x156   : > { %v491_v23 = vadd.f32 %v490_v21, %v486_v22 }
 0x158   : > { %v492_v24 = vpack.c.bf16 %v491_v23, %v491_v23 }
 0x15a   : > { %1467 = vmatmul.mubr.msk.bf16.vlgmr.msra.gmra.mrb[0].mxu1 %vm503_vm3, %v492_v24 }
 0x15b   : > { %1472 = vmatprep.mubr.msk.f32.mxu1 %vm1646_vm2, %v1645_v9 }
 0x22d   : > { %v541_v27 = vpop.f32.mrb[0].mxu1 }
 0x22e   : > { %v542_v28 = vadd.f32 %v541_v27, %v496_v26  ;;  %v1468_v29 = vpop.f32.mrb[1].mxu1 }
 0x22f   : > { %v544_v30 = vpop.f32.mrb[2].mxu1  ;;  %v1578_v29 = vld [vmem:[%s423_s10] sm:$0xff]  }
 0x230   : > { %718 = vrot.lane.b32.xlu0 %v542_v28, %s1647_s12  ;;  %548 = vrot.lane.b32.xlu1 %v542_v28, %s1648_s14  ;;  %v1469_v31 = vpop.f32.mrb[3].mxu1 }
 0x234   : > { %720 = vrot.lane.b32.xlu1 %v542_v28, %s1649_s16 }
 0x2a2   : > { %v549_v32 = vpop.permute.xlu1 %548  ;;  %v719_v34 = vpop.permute.xlu0 %718 }
 0x2a3   : > { %1471 = vmatpush3.xpose.msk.msra.mxu1 %vm550_vm4, %v549_v32  ;;  %v961_v32 = vsub.s32 2, %v1784_v14 }
 0x2a4   : > { %1475 = vmatprep.subr.mxu1 %v1645_v9 }
 0x2a6   : > { %1473 = vmatmul.mubr.msk.f32.vlgmr.msra.gmra.mrb[4].mxu1 %vm550_vm4, %v542_v28  ;;  %v721_v33 = vpop.permute.xlu1 %720 }
 0x2a7   : > { %1481 = vmatpush3.xpose.msk.msra.mxu0 %vm550_vm4, %v721_v33  ;;  %1477 = vmatprep.mubr.msk.f32.mxu1 %vm1646_vm2, %v1645_v9  ;;  %v966_v33 = vsub.s32 3, %v1784_v14 }
 0x2a8   : > { %1490 = vmatprep.subr.bf16.mxu0 %v1645_v9 }
 0x2aa   : > { %1483 = vmatmul.mubr.msk.f32.vlgmr.msra.gmra.mrb[0].mxu0 %vm550_vm4, %v719_v34  ;;  %v962_v34 = vrot.slane %v1792_v16, %v961_v32 }
 0x2ab   : > { %1492 = vmatprep.mubr.msk.bf16.mxu0 %vm1646_vm2, %v1645_v9  ;;  %1491 = vmatpush3.bf16.msra.mxu0 %v1577_v2 }
 0x2ac   : > { %1502 = vmatprep.subr.bf16.mxu0 %v1645_v9 }
 0x379   : > { %v621_v36 = vpop.f32.mrb[4].mxu1 }
 0x37a   : > { %v625_v38 = vmul.f32 0.35355338, %v621_v36  ;;  %v1474_v39 = vpop.f32.mrb[5].mxu1 }
 0x37c   : > { %v626_v40 = vadd.f32 %v625_v38, %v450_v37 }
 0x37d   : > { %v792_v41 = vpop.f32.mrb[0].mxu0 }
 0x37e   : > { %v796_v42 = vmul.f32 0.35355338, %v792_v41  ;;  %v1484_v43 = vpop.f32.mrb[1].mxu0  ;;  %v628_v44 = vsel %vm627_vm6, %v626_v40, -inf  ;;  %v1579_v41 = vld [vmem:[%s1759_s15] sm:$0xff]  }
 0x37f   : > { %629 = vmax.xlane.f32.xlu1 %v628_v44  ;;  %v1581_v43 = vld [vmem:[%s1759_s15 + $0x10] sm:$0xff]   ;;  %v1582_v44 = vld [vmem:[%s1759_s15 + $0x18] sm:$0xff]  }
 0x380   : > { %v797_v45 = vadd.f32 %v796_v42, %v450_v37  ;;  %v967_v37 = vrot.slane %v1792_v16, %v966_v33  ;;  %v1580_v42 = vld [vmem:[%s1759_s15 + $0x8] sm:$0xff]  }
 0x382   : > { %v798_v46 = vsel %vm627_vm6, %v797_v45, -inf }
 0x383   : > { %799 = vmax.xlane.f32.xlu0 %v798_v46 }
 0x399   : > { %809 = vrot.lane.b32.xlu0 %v542_v28, %s1650_s17 }
 0x40c   : > { %v630_v47 = vpop.xlane.xlu1 %629 }
 0x40d   : > { %v631_v48 = vsub.f32 %v626_v40, %v630_v47 }
 0x40f   : > { %v632_v49 = vmul.f32 1.442695, %v631_v48 }
 0x410   : > { %v800_v50 = vpop.xlane.xlu0 %799 }
 0x411   : > { %1585 = vpow2.f32 %v632_v49  ;;  %v801_v51 = vsub.f32 %v797_v45, %v800_v50  ;;  %v972_v45 = vsub.s32 6, %v1784_v14 }
 0x413   : > { %v802_v52 = vmul.f32 1.442695, %v801_v51  ;;  %v973_v46 = vrot.slane %v1792_v16, %v972_v45 }
 0x414   : > { %v810_v62 = vpop.permute.xlu0 %809 }
 0x415   : > { %1587 = vpow2.f32 %v802_v52 }
 0x41b   : > { %v1586_v53 = vpop.eup %1585 }
 0x41c   : > { %v634_v54 = vsel %vm627_vm6, %v1586_v53, 0.0 }
 0x41d   : > { %635 = vadd.xlane.f32.xlu1 %v634_v54 }
 0x41f   : > { %v1588_v55 = vpop.eup %1587 }
 0x420   : > { %v804_v56 = vsel %vm627_vm6, %v1588_v55, 0.0 }
 0x421   : > { %805 = vadd.xlane.f32.xlu1 %v804_v56 }
 0x432   : > { %639 = vrot.lane.b32.xlu1 %v542_v28, %s1651_s20 }
 0x4aa   : > { %v636_v57 = vpop.xlane.xlu1 %635 }
 0x4ab   : > { %1589 = vrcp.f32 %v636_v57 }
 0x4ae   : > { %v806_v58 = vpop.xlane.xlu1 %805 }
 0x4af   : > { %1591 = vrcp.f32 %v806_v58  ;;  %v1103_v58 = vsub.s32 5, %v1784_v14 }
 0x4b2   : > { %v640_v59 = vpop.permute.xlu1 %639 }
 0x4b3   : > { %1476 = vmatpush3.msk.msra.mxu1 %vm645_vm7, %v640_v59  ;;  %v1104_v59 = vrot.slane %v1792_v16, %v1103_v58 }
 0x4b4   : > { %1485 = vmatprep.subr.mxu1 %v1645_v9 }
 0x4b5   : > { %v1590_v60 = vpop.eup %1589 }
 0x4b6   : > { %v638_v61 = vmul.f32 %v1590_v60, %v1586_v53 }
 0x4b8   : > { %1478 = vmatmul.mubr.msk.f32.vlgmr.msra.gmra.mrb[6].mxu1 %vm641_vm8, %v638_v61 }
 0x4b9   : > { %v1592_v63 = vpop.eup %1591  ;;  %1486 = vmatpush3.msk.msra.mxu1 %vm645_vm7, %v810_v62  ;;  %1487 = vmatprep.mubr.msk.f32.mxu1 %vm1646_vm2, %v1645_v9 }
 0x4ba   : > { %v808_v0 = vmul.f32 %v1592_v63, %v1588_v55  ;;  %1496 = vmatprep.subr.bf16.mxu1 %v1645_v9 }
 0x4bc   : > { %1488 = vmatmul.mubr.msk.f32.vlgmr.msra.gmra.mrb[8].mxu1 %vm641_vm8, %v808_v0 }
 0x4bd   : > { %1498 = vmatprep.mubr.msk.bf16.mxu1 %vm1646_vm2, %v1645_v9  ;;  %1497 = vmatpush3.bf16.msra.mxu1 %v1578_v29 }
 0x58b   : > { %v714_v3 = vpop.f32.mrb[6].mxu1 }
 0x58c   : > { %v1479_v4 = vpop.f32.mrb[7].mxu1 }
 0x58f   : > { %v882_v5 = vpop.f32.mrb[8].mxu1 }
 0x590   : > { %887 = vrot.lane.b32.xlu1 %v882_v5, %s1652_s26  ;;  %v1489_v6 = vpop.f32.mrb[9].mxu1 }
 0x602   : > { %v888_v7 = vpop.permute.xlu1 %887 }
 0x603   : > { %v890_v8 = vsel %vm550_vm4, %v714_v3, %v888_v7 }
 0x604   : > { %v891_v10 = vpack.c.bf16 %v890_v8, %v890_v8  ;;  %v1599_v8 = vld [vmem:[%s1921_s7] sm:$0xff] (!%p1430_p8)  }
 0x606   : > { %1493 = vmatmul.mubr.msk.bf16.vlgmr.msra.gmra.mrb[4].mxu0 %vm503_vm3, %v891_v10  ;;  %v1653_v10 = vmov (!%p1430_p8), 0.0  }
 0x607   : > { %1510 = vmatprep.mubr.msk.bf16.mxu0 %vm1646_vm2, %v1645_v9  ;;  %1503 = vmatpush3.bf16.msra.mxu0 %v1579_v41 }
 0x608   : > { %1504 = vmatprep.subr.bf16.mxu0 %v1645_v9  ;;  %1520 = vmatprep.subr.bf16.mxu1 (!%p1430_p8), %v1653_v10 }
 0x60b   : > { %1505 = vmatpush3.bf16.msra.mxu0 %v1580_v42 }
 0x60c   : > { %1506 = vmatprep.subr.bf16.mxu0 %v1645_v9 }
 0x60f   : > { %1507 = vmatpush3.bf16.msra.mxu0 %v1581_v43 }
 0x610   : > { %1508 = vmatprep.subr.bf16.mxu0 %v1645_v9 }
 0x613   : > { %1509 = vmatpush3.bf16.msra.mxu0 %v1582_v44 }
 0x614   : > { %1514 = vmatprep.subr.bf16.mxu0 (!%p1430_p8), %v1653_v10 }
 0x6d9   : > { %v939_v13 = vpop.f32.mrb[4].mxu0 }
 0x6da   : > { %v940_v18 = vadd.f32 %v939_v13, %v895_v12  ;;  %v1494_v19 = vpop.f32.mrb[5].mxu0 }
 0x6db   : > { %v942_v20 = vpop.f32.mrb[6].mxu0  ;;  %v1111_v19 = vld [vmem:[%s1920_s6] sm:$0xff] (!%p1430_p8) }
 0x6dc   : > { %v945_v21 = vadd.f32 %v940_v18, %v1771_v1  ;;  %v1495_v22 = vpop.f32.mrb[7].mxu0  ;;  %v1128_v20 = vrot.slane (!%p1430_p8), %v1111_v19, %v484_v15 }
 0x6de   : > { %v946_v23 = vsel %vm467_vm1, %v945_v21, 0.0 }
 0x6df   : > { %947 = vadd.xlane.f32.xlu1 %v946_v23  ;;  %v1133_v23 = vrot.slane (!%p1430_p8), %v1111_v19, %v489_v17  ;;  %v1193_v17 = vrot.slane (!%p1430_p8), %v1111_v19, %v894_v11 }
 0x76c   : > { %v948_v24 = vpop.xlane.xlu1 %947 }
 0x76d   : > { %v949_v25 = vmul.f32 0.0625, %v948_v24 }
 0x76f   : > { %v950_v26 = vsub.f32 %v945_v21, %v949_v25 }
 0x771   : > { %v951_v27 = vmul.f32 %v950_v26, %v950_v26 }
 0x773   : > { %v952_v28 = vsel %vm467_vm1, %v951_v27, 0.0  ;;  %v1600_v27 = vld [vmem:[%s1922_s8] sm:$0xff] (!%p1430_p8)  }
 0x774   : > { %953 = vadd.xlane.f32.xlu0 %v952_v28 }
 0x801   : > { %v954_v30 = vpop.xlane.xlu0 %953 }
 0x802   : > { %v955_v1 = vmul.f32 0.0625, %v954_v30 }
 0x804   : > { %v956_v31 = vadd.f32 1e-05, %v955_v1 }
 0x806   : > { %1593 = vrsqrt.f32 %v956_v31 }
 0x810   : > { %v1594_v35 = vpop.eup %1593 }
 0x811   : > { %v958_v36 = vmul.f32 %v1594_v35, %v950_v26 }
 0x813   : > { %v963_v38 = vmul.f32 %v962_v34, %v958_v36 }
 0x815   : > { %v968_v39 = vadd.f32 %v967_v37, %v963_v38 }
 0x817   : > { %v969_v40 = vpack.c.bf16 %v968_v39, %v968_v39 }
 0x819   : > { %1499 = vmatmul.mubr.msk.bf16.vlgmr.msra.gmra.mrb[12].mxu1 %vm503_vm3, %v969_v40 }
 0x81a   : > { %1522 = vmatprep.mubr.msk.bf16.mxu1 (!%p1430_p8), %vm1654_vm10, %v1653_v10  ;;  %1521 = vmatpush3.bf16.msra.mxu1 (!%p1430_p8), %v1600_v27 }
 0x8ec   : > { %v1017_v47 = vpop.f32.mrb[12].mxu1 }
 0x8ed   : > { %v1018_v48 = vadd.f32 %v1017_v47, %v973_v46  ;;  %v1500_v49 = vpop.f32.mrb[13].mxu1  ;;  %v1261_v46 = vrot.slane (!%p1430_p8), %v1111_v19, %v961_v32 }
 0x8ee   : > { %v1020_v50 = vpop.f32.mrb[14].mxu1 }
 0x8ef   : > { %v1424_v51 = vmul.f32 -1.702, %v1018_v48  ;;  %v1501_v52 = vpop.f32.mrb[15].mxu1 }
 0x8f1   : > { %v1025_v53 = vmul.f32 1.442695, %v1424_v51 }
 0x8f3   : > { %1595 = vpow2.f32 %v1025_v53 }
 0x8fd   : > { %v1596_v54 = vpop.eup %1595 }
 0x8fe   : > { %v1027_v55 = vadd.f32 1.0, %v1596_v54 }
 0x900   : > { %1597 = vrcp.f32 %v1027_v55 }
 0x90a   : > { %v1598_v56 = vpop.eup %1597 }
 0x90b   : > { %v1030_v57 = vmul.f32 %v1598_v56, %v1018_v48  ;;  %v1266_v48 = vrot.slane (!%p1430_p8), %v1111_v19, %v966_v33 }
 0x90d   : > { %v1031_v9 = vpack.c.bf16 %v1030_v57, %v1030_v57 }
 0x90f   : > { %1511 = vmatmul.mubr.msk.bf16.vlgmr.msra.gmra.mrb[8].mxu0 %vm1056_vm9, %v1031_v9 }
 0x910   : > { %1516 = vmatprep.mubr.msk.bf16.mxu0 (!%p1430_p8), %vm1654_vm10, %v1653_v10  ;;  %1515 = vmatpush3.bf16.msra.mxu0 (!%p1430_p8), %v1599_v8 }
 0x9e1   : > { %1110 = sbr.rel (%p1430_p8) target bundleno = 3592 (0xe08), region = 64 }
 0x9e2   : > { %v1094_v60 = vpop.f32.mrb[8].mxu0 }
 0x9e3   : > { %v1100_v61 = vadd.f32 %v1094_v60, %v945_v21  ;;  %v1512_v62 = vpop.f32.mrb[9].mxu0 }
 0x9e4   : > { %v1097_v63 = vpop.f32.mrb[10].mxu0 }
 0x9e5   : > { %v1105_v0 = vadd.f32 %v1104_v59, %v1100_v61  ;;  %v1513_v2 = vpop.f32.mrb[11].mxu0 }
 0x9e7   : > { %1106 = vst.msk [vmem:[#allocation2] sm:$0xf] %vm467_vm1, %v1105_v0  ;;  %v1112_v3 = vsel (!%p1430_p8), %vm467_vm1, %v1105_v0, 0.0 }
 0x9e8   : > { %1113 = vadd.xlane.f32.xlu0 %v1112_v3 }
 0xa75   : > { %v1114_v4 = vpop.xlane.xlu0 %1113 }
 0xa76   : > { %v1115_v5 = vmul.f32 0.0625, %v1114_v4 }
 0xa78   : > { %v1116_v6 = vsub.f32 %v1105_v0, %v1115_v5 }
 0xa7a   : > { %v1117_v7 = vmul.f32 %v1116_v6, %v1116_v6 }
 0xa7c   : > { %v1118_v16 = vsel %vm467_vm1, %v1117_v7, 0.0 }
 0xa7d   : > { %1119 = vadd.xlane.f32.xlu0 %v1118_v16 }
 0xb0a   : > { %v1120_v12 = vpop.xlane.xlu0 %1119 }
 0xb0b   : > { %v1121_v13 = vmul.f32 0.0625, %v1120_v12 }
 0xb0d   : > { %v1122_v18 = vadd.f32 1e-05, %v1121_v13 }
 0xb0f   : > { %1601 = vrsqrt.f32 %v1122_v18 }
 0xb19   : > { %v1602_v21 = vpop.eup %1601 }
 0xb1a   : > { %v1124_v22 = vmul.f32 %v1602_v21, %v1116_v6 }
 0xb1c   : > { %v1129_v24 = vmul.f32 %v1128_v20, %v1124_v22 }
 0xb1e   : > { %v1134_v25 = vadd.f32 %v1133_v23, %v1129_v24 }
 0xb20   : > { %v1135_v26 = vpack.c.bf16 %v1134_v25, %v1134_v25 }
 0xb22   : > { %1517 = vmatmul.mubr.msk.bf16.vlgmr.msra.gmra.mrb[0].mxu0 %vm503_vm3, %v1135_v26 }
 0xbf5   : > { %v1181_v28 = vpop.f32.mrb[0].mxu0 }
 0xbf6   : > { %v1187_v29 = vpack.c.bf16 %v1181_v28, %v1181_v28  ;;  %v1518_v30 = vpop.f32.mrb[1].mxu0 }
 0xbf7   : > { %v1184_v1 = vpop.f32.mrb[2].mxu0 }
 0xbf8   : > { %v1519_v15 = vpop.f32.mrb[3].mxu0  ;;  %1523 = vmatmul.mubr.msk.bf16.vlgmr.msra.gmra.mrb[0].mxu1 %vm503_vm3, %v1187_v29 }
 0xccb   : > { %v1237_v31 = vpop.f32.mrb[0].mxu1 }
 0xccc   : > { %v1238_v34 = vadd.f32 %v1237_v31, %v1193_v17  ;;  %v1524_v35 = vpop.f32.mrb[1].mxu1 }
 0xccd   : > { %v1240_v36 = vpop.f32.mrb[2].mxu1 }
 0xcce   : > { %v1525_v37 = vpop.f32.mrb[3].mxu1  ;;  %v1244_v38 = vsel %vm1243_vm11, %v1238_v34, 0.0 }
 0xccf   : > { %1245 = vadd.xlane.f32.xlu1 %v1244_v38 }
 0xd5c   : > { %v1246_v39 = vpop.xlane.xlu1 %1245 }
 0xd5d   : > { %v1248_v40 = vmul.f32 0.03125, %v1246_v39 }
 0xd5f   : > { %v1249_v41 = vsub.f32 %v1238_v34, %v1248_v40 }
 0xd61   : > { %v1250_v42 = vmul.f32 %v1249_v41, %v1249_v41 }
 0xd63   : > { %v1251_v43 = vsel %vm1243_vm11, %v1250_v42, 0.0 }
 0xd64   : > { %1252 = vadd.xlane.f32.xlu1 %v1251_v43 }
 0xdf1   : > { %v1253_v44 = vpop.xlane.xlu1 %1252 }
 0xdf2   : > { %v1254_v45 = vmul.f32 0.03125, %v1253_v44 }
 0xdf4   : > { %v1255_v11 = vadd.f32 1e-12, %v1254_v45 }
 0xdf6   : > { %1603 = vrsqrt.f32 %v1255_v11 }
 0xe00   : > { %v1604_v47 = vpop.eup %1603 }
 0xe01   : > { %v1257_v49 = vmul.f32 %v1604_v47, %v1249_v41 }
 0xe03   : > { %v1262_v50 = vmul.f32 %v1261_v46, %v1257_v49 }
 0xe05   : > { %v1267_v51 = vadd.f32 %v1266_v48, %v1262_v50 }
 0xe07   : > { %1268 = vst.msk [vmem:[%s1768_s11] sm:$0xf] %vm1243_vm11, %v1267_v51 }
 0xe08 PF: > { %s19_s13 = sadd.s32 1, %s1643_s13   ;;  %s1934_s30 = sld [smem:[#allocation3_spill]] }
 0xe09   : > { %p16_p9 = scmp.ge.s32.totalorder %s19_s13, 6   ;;  %s1935_s10 = sld [smem:[#allocation4_spill]] }
 0xe0a   : > { %s1936_s11 = sld [smem:[#allocation5_spill]]  ;;  %s1937_s12 = sld [smem:[#allocation6_spill]] }
 0xe0b   :  { %18 = sbr.rel (!%p16_p9) target bundleno = 4 (0x4), region = 109 }

// kernel: fsvg_forward.3
= control target key start
LH: loop header
LB: loop body
LE: loop exit
PB: predicated region body
PF: predicated region fallthrough
CT: control target
= control target key end

     0   :  { %s4715_s0 = inlined_call_operand.vmem [shape: f32[2,4,768], index: 0, kind: input, shape index: {}]   ;;  %s4716_s1 = inlined_call_operand.vmem [shape: f32[2,4,32], index: 1, kind: input, shape index: {}]   ;;  %s4717_s2 = inlined_call_operand.vmem [shape: bf16[768,32], index: 2, kind: input, shape index: {}]   ;;  %s4718_s3 = inlined_call_operand.vmem [shape: f32[8,32], index: 3, kind: input, shape index: {}]   ;;  %s4719_s4 = inlined_call_operand.vmem [shape: bf16[4,32,96], index: 4, kind: input, shape index: {}]   ;;  %s4720_s5 = inlined_call_operand.vmem [shape: bf16[4,32,32], index: 5, kind: input, shape index: {}]   ;;  %s4721_s6 = inlined_call_operand.vmem [shape: bf16[4,32,128], index: 6, kind: input, shape index: {}]   ;;  %s4722_s7 = inlined_call_operand.vmem [shape: bf16[4,128,32], index: 7, kind: input, shape index: {}]   ;;  %s4723_s8 = inlined_call_operand.vmem [shape: f32[4,8,128], index: 8, kind: input, shape index: {}]   ;;  %s4724_s9 = inlined_call_operand.vmem [shape: bf16[32,256], index: 9, kind: input, shape index: {}]   ;;  %s4725_s10 = inlined_call_operand.vmem [shape: bf16[256,256], index: 10, kind: input, shape index: {}]   ;;  %s4726_s11 = inlined_call_operand.vmem [shape: bf16[256,256], index: 11, kind: input, shape index: {}]   ;;  %s4727_s12 = inlined_call_operand.vmem [shape: bf16[256,4], index: 12, kind: input, shape index: {}]   ;;  %s4728_s13 = inlined_call_operand.vmem [shape: f32[4,256], index: 13, kind: input, shape index: {}]   ;;  %s4729_s14 = inlined_call_operand.hbm [shape: f32[2,1,4], index: 14, kind: output, shape index: {}]  }
   0x1   :  { %4744 = sst [smem:[#allocation18_spill]] %s4715_s0 }
   0x2   :  { %4745 = sst [smem:[#allocation19_spill]] %s4716_s1 }
   0x3   :  { %4746 = sst [smem:[#allocation20_spill]] %s4727_s12 }
   0x4   :  { %4747 = sst [smem:[#allocation21_spill]] %s4728_s13 }
   0x5   :  { %4748 = sst [smem:[#allocation22_spill]] %s4729_s14 }
   0x6   :  { %19 = vsyncpa [#allocation5], 0 }
   0x7   :  { %21 = vsyncpa [#allocation5 + $0x1], 0  ;;  %s3936_s29 = smov 0   ;;  %s3938_s30 = smov 0  }
   0x8   :  { %s3940_s15 = smov 0   ;;  %s3942_s16 = smov 0  }
   0x9   :  { %s3944_s17 = smov 0   ;;  %s3946_s18 = smov 0  }
   0xa   :  { %s3948_s19 = smov 0   ;;  %s3950_s20 = smov 0  }
   0xb LB: > { %4749 = sst [smem:[#allocation7_spill]] %s3818_s29  ;;  %s3006_s21 = sadd.s32 4294967295, %s3846_s20   ;;  %s3846_s20 = sphi %s3950_s20, %s27_s20   ;;  %s3842_s19 = sphi %s3948_s19, %s4784_s19   ;;  %s3838_s18 = sphi %s3946_s18, %s4783_s18   ;;  %s3834_s17 = sphi %s3944_s17, %s4782_s17   ;;  %s3830_s16 = sphi %s3942_s16, %s4781_s16   ;;  %s3826_s15 = sphi %s3940_s15, %s4780_s15   ;;  %s3822_s30 = sphi %s3938_s30, %s4786_s30   ;;  %s3818_s29 = sphi %s3936_s29, %s4785_s29  }
   0xc   : > { %4750 = sst [smem:[#allocation8_spill]] %s3826_s15  ;;  %s3007_s22 = sadd.s32 4294967294, %s3846_s20  }
   0xd   : > { %4751 = sst [smem:[#allocation9_spill]] %s3834_s17  ;;  %s36_s23 = sadd.s32 1, %s3838_s18 }
   0xe   : > { %4752 = sst [smem:[#allocation10_spill]] %s3838_s18  ;;  %p37_p0 = scmp.ge.s32.totalorder %s36_s23, 4 }
   0xf   : > { %4753 = sst [smem:[#allocation11_spill]] %s3842_s19  ;;  %s39_s24 = sadd.s32 1, %s3842_s19 }
  0x10   : > { %4754 = sst [smem:[#allocation12_spill]] %s3846_s20  ;;  %p385_p1 = scmp.ne.s32.totalorder %s3826_s15, %s3822_s30 }
  0x11   : > { %p386_p2 = scmp.eq.s32.totalorder %s3006_s21, 7  ;;  %s4788_s23 = smov (%p37_p0, %s36_s23), 0 }
  0x12   : > { %4755 = sst [smem:[#allocation13_spill]] %s4788_s23  ;;  %s4790_s24 = smov (!%p37_p0, %s39_s24), %s3842_s19 }
  0x13   : > { %p3985_p3 = por %p386_p2, %p385_p1  ;;  %p391_p4 = scmp.ne.s32.totalorder %s3822_s30, %s3818_s29 }
  0x14   : > { %p41_p5 = scmp.ge.s32.totalorder %s4790_s24, 2  ;;  %p392_p6 = scmp.eq.s32.totalorder %s3007_s22, 7 }
  0x15   : > { %s4756_s25 = scalar_select %p3985_p3, 1, 0 }
  0x16   : > { %p3010_p7 = scmp.ge.s32.totalorder %s3846_s20, 1  ;;  %p485_p8 = scmp.lt.s32.totalorder %s3846_s20, 9 }
  0x17   : > { %4757 = sst [smem:[#allocation14_spill]] %s4756_s25  ;;  %s4792_s24 = smov (%p41_p5, %s4790_s24), 0 }
  0x18   : > { %4758 = sst [smem:[#allocation15_spill]] %s4792_s24  ;;  %p3995_p9 = por %p392_p6, %p391_p4 }
  0x19   : > { %p486_p10 = pnand %p3010_p7, %p485_p8  ;;  %s372_s27 = ssub.s32 %s3842_s19, %s4792_s24 }
  0x1a   : > { %s4759_s26 = scalar_select %p3995_p9, 1, 0 }
  0x1b   : > { %s375_s28 = sadd.s32 1, %s3826_s15  ;;  %p373_p11 = scmp.eq.s32.totalorder %s372_s27, 0 }
  0x1c   : > { %4760 = sst [smem:[#allocation16_spill]] %s4759_s26  ;;  %489 = sbr.rel (%p486_p10) target bundleno = 4929 (0x1341), region = 76 }
  0x1d   : > { %s4003_s21 = scalar_select %p373_p11, %s3826_s15, %s375_s28  }
  0x1e   : > { %p558_p12 = scmp.lt.s32.totalorder (!%p486_p10), %s3834_s17, 1  ;;  %p567_p13 = scmp.lt.s32.totalorder (!%p486_p10), %s3830_s16, 3 }
  0x1f   : > { %4761 = sst [smem:[#allocation17_spill]] %s4003_s21  ;;  %s4762_s1 = sld [smem:[#allocation19_spill]] (!%p486_p10) }
  0x20   : > { %s4763_s0 = sld [smem:[#allocation18_spill]] (!%p486_p10)  ;;  %s4764_s12 = sand.u32 (!%p486_p10), 1, %s3822_s30  }
  0x21   : > { %p3022_p0 = scmp.ne.s32.totalorder (!%p486_p10), %s3830_s16, 0 }
  0x23   : > { %s559_s23 = scalar_select %p558_p12, %s3834_s17, 1 }
  0x24   : > { %s568_s18 = scalar_select %p567_p13, %s3830_s16, 3 }
  0x25   : > { %s3420_s29 = smul.u32 24, %s559_s23  ;;  %s3012_s26 = sshll.u32 %s559_s23, 2  ;;  %v3504_v0 = vld [vmem:[%s4717_s2 + $0x40] sm:$0xff] (!%p3022_p0)   ;;  %v3508_v4 = vld [vmem:[%s4717_s2 + $0x48] sm:$0xff] (!%p3022_p0)   ;;  %v3512_v8 = vld [vmem:[%s4717_s2 + $0x50] sm:$0xff] (!%p3022_p0)   ;;  %vm715_vm0 = vcmask (!%p3022_p0), 253952  }
  0x26   : > { %s4013_s27 = scalar_lea.vmem %s4762_s1, %s3012_s26  ;;  %s3198_s28 = sshll.u32 %s568_s18, 4  ;;  %v3505_v1 = vld [vmem:[%s4717_s2] sm:$0xff] (!%p3022_p0)   ;;  %3202 = vmatprep.subr.bf16.mxu0 (!%p3022_p0), %v3504_v0  ;;  %v3509_v5 = vld [vmem:[%s4717_s2 + $0x8] sm:$0xff] (!%p3022_p0)   ;;  %v3513_v9 = vld [vmem:[%s4717_s2 + $0x10] sm:$0xff] (!%p3022_p0)   ;;  %vm1146_vm1 = vcmask (!%p3022_p0), 257024   ;;  %vm1184_vm2 = vcmask (!%p3022_p0), 65536  }
  0x27   : > { %s4018_s15 = scalar_lea.vmem %s4763_s0, %s3420_s29  ;;  %s4023_s25 = scalar_lea.vmem %s4719_s4, %s3198_s28  ;;  %v3506_v2 = vld [vmem:[%s4717_s2 + $0xc0] sm:$0xff] (!%p3022_p0)   ;;  %3203 = vmatpush3.bf16.msra.mxu0 (!%p3022_p0), %v3505_v1  ;;  %v3510_v6 = vld [vmem:[%s4717_s2 + $0xc8] sm:$0xff] (!%p3022_p0)   ;;  %v3514_v10 = vld [vmem:[%s4717_s2 + $0xd0] sm:$0xff] (!%p3022_p0)   ;;  %vm1177_vm3 = vcmask (!%p3022_p0), 1040384   ;;  %vm1179_vm4 = vcmask (!%p3022_p0), 1044480   ;;  %vm1181_vm5 = vcmask (!%p3022_p0), 261120  }
  0x28   : > { %s4028_s23 = scalar_lea.vmem %s4720_s5, %s3198_s28  ;;  %s4033_s24 = scalar_lea.vmem %s4721_s6, %s3198_s28  ;;  %v3507_v3 = vld [vmem:[%s4717_s2 + $0x80] sm:$0xff] (!%p3022_p0)   ;;  %3224 = vmatprep.subr.bf16.mxu1 (!%p3022_p0), %v3506_v2  ;;  %3204 = vmatprep.subr.bf16.mxu0 (!%p3022_p0), %v3508_v4  ;;  %v3511_v7 = vld [vmem:[%s4717_s2 + $0x88] sm:$0xff] (!%p3022_p0)   ;;  %v3515_v11 = vld [vmem:[%s4717_s2 + $0x90] sm:$0xff] (!%p3022_p0)  }
  0x29   : > { %s3201_s26 = sshll.u32 %s568_s18, 6  ;;  %s3021_s1 = sshll.u32 %s568_s18, 3  ;;  %3225 = vmatpush3.bf16.msra.mxu1 (!%p3022_p0), %v3507_v3  ;;  %v3516_v12 = vld [vmem:[%s4717_s2 + $0x58] sm:$0xff] (!%p3022_p0)   ;;  %v3520_v16 = vld [vmem:[%s4717_s2 + $0x60] sm:$0xff] (!%p3022_p0)   ;;  %v3524_v20 = vld [vmem:[%s4717_s2 + $0x68] sm:$0xff] (!%p3022_p0)  }
  0x2a   : > { %s4038_s21 = scalar_lea.vmem %s4722_s7, %s3201_s26  ;;  %s4043_s0 = scalar_lea.vmem %s4723_s8, %s3021_s1  ;;  %3226 = vmatprep.subr.bf16.mxu1 (!%p3022_p0), %v3510_v6  ;;  %v3517_v13 = vld [vmem:[%s4717_s2 + $0x18] sm:$0xff] (!%p3022_p0)   ;;  %v3521_v17 = vld [vmem:[%s4717_s2 + $0x20] sm:$0xff] (!%p3022_p0)   ;;  %v3525_v21 = vld [vmem:[%s4717_s2 + $0x28] sm:$0xff] (!%p3022_p0)  }
  0x2b   : > { %s4047_s17 = scalar_lea.vmem [#allocation4], %s4764_s12  ;;  %595 = sbr.rel (%p3022_p0) target bundleno = 639 (0x27f), region = 80  ;;  %3205 = vmatpush3.bf16.msra.mxu0 (!%p3022_p0), %v3509_v5  ;;  %v3518_v14 = vld [vmem:[%s4717_s2 + $0xd8] sm:$0xff] (!%p3022_p0)   ;;  %v3522_v18 = vld [vmem:[%s4717_s2 + $0xe0] sm:$0xff] (!%p3022_p0)   ;;  %v3526_v22 = vld [vmem:[%s4717_s2 + $0xe8] sm:$0xff] (!%p3022_p0)  }
  0x2c   : > { %3206 = vmatprep.subr.bf16.mxu0 (!%p3022_p0), %v3512_v8  ;;  %v3519_v15 = vld [vmem:[%s4717_s2 + $0x98] sm:$0xff] (!%p3022_p0)   ;;  %v3523_v19 = vld [vmem:[%s4717_s2 + $0xa0] sm:$0xff] (!%p3022_p0)   ;;  %v3527_v23 = vld [vmem:[%s4717_s2 + $0xa8] sm:$0xff] (!%p3022_p0)  }
  0x2d   : > { %3227 = vmatpush3.bf16.msra.mxu1 (!%p3022_p0), %v3511_v7  ;;  %v3528_v24 = vld [vmem:[%s4717_s2 + $0x70] sm:$0xff] (!%p3022_p0)   ;;  %v3532_v28 = vld [vmem:[%s4717_s2 + $0x78] sm:$0xff] (!%p3022_p0)   ;;  %v692_v31 = vld [vmem:[%s4018_s15] sm:$0xff] (!%p3022_p0) }
  0x2e   : > { %3228 = vmatprep.subr.bf16.mxu1 (!%p3022_p0), %v3514_v10  ;;  %v3529_v25 = vld [vmem:[%s4717_s2 + $0x30] sm:$0xff] (!%p3022_p0)   ;;  %v3533_v29 = vld [vmem:[%s4717_s2 + $0x38] sm:$0xff] (!%p3022_p0)   ;;  %v698_v32 = vcombine.high (!%p3022_p0), %v692_v31, %v692_v31  ;;  %v704_v34 = vpack.c.bf16 (!%p3022_p0), %v692_v31, %v692_v31  ;;  %v3537_v35 = vld [vmem:[%s4717_s2 + $0x140] sm:$0xff] (!%p3022_p0)  }
  0x2f   : > { %3207 = vmatpush3.bf16.msra.mxu0 (!%p3022_p0), %v3513_v9  ;;  %v3530_v26 = vld [vmem:[%s4717_s2 + $0xf0] sm:$0xff] (!%p3022_p0)   ;;  %v3534_v30 = vld [vmem:[%s4717_s2 + $0xf8] sm:$0xff] (!%p3022_p0)   ;;  %v693_v36 = vld [vmem:[%s4018_s15 + $0x8] sm:$0xff] (!%p3022_p0) }
  0x30   : > { %3208 = vmatprep.subr.bf16.mxu0 (!%p3022_p0), %v3516_v12  ;;  %v3531_v27 = vld [vmem:[%s4717_s2 + $0xb0] sm:$0xff] (!%p3022_p0)   ;;  %v3536_v33 = vld [vmem:[%s4717_s2 + $0xb8] sm:$0xff] (!%p3022_p0)   ;;  %v705_v37 = vpack.c.bf16 (!%p3022_p0), %v698_v32, %v698_v32  ;;  %v699_v38 = vcombine.high (!%p3022_p0), %v693_v36, %v693_v36  ;;  %v3539_v39 = vld [vmem:[%s4717_s2 + $0x100] sm:$0xff] (!%p3022_p0)   ;;  %v706_v40 = vpack.c.bf16 (!%p3022_p0), %v693_v36, %v693_v36  ;;  %v3848_v32 = vmov (!%p3022_p0), 0.0  }
  0x31   : > { %3229 = vmatpush3.bf16.msra.mxu1 (!%p3022_p0), %v3515_v11  ;;  %v3540_v41 = vld [vmem:[%s4717_s2 + $0x148] sm:$0xff] (!%p3022_p0)   ;;  %v3542_v44 = vld [vmem:[%s4717_s2 + $0x150] sm:$0xff] (!%p3022_p0)   ;;  %v3544_v46 = vld [vmem:[%s4717_s2 + $0x158] sm:$0xff] (!%p3022_p0)   ;;  %1185 = vst.msk [vmem:[#allocation3] sm:$0x1] (!%p3022_p0), %vm1184_vm2, %v3848_v32 }
  0x32   : > { %3230 = vmatprep.subr.bf16.mxu1 %v3518_v14  ;;  %1058 = vmatprep.mubr.bf16.mxu0 %v705_v37  ;;  %v707_v42 = vpack.c.bf16 %v699_v38, %v699_v38  ;;  %v3541_v43 = vld [vmem:[%s4717_s2 + $0x108] sm:$0xff]   ;;  %v3543_v45 = vld [vmem:[%s4717_s2 + $0x110] sm:$0xff]   ;;  %v3545_v47 = vld [vmem:[%s4717_s2 + $0x118] sm:$0xff]  }
  0x33   : > { %3209 = vmatpush3.bf16.msra.mxu0 %v3517_v13  ;;  %v3546_v48 = vld [vmem:[%s4717_s2 + $0x160] sm:$0xff]   ;;  %v694_v49 = vld [vmem:[%s4018_s15 + $0x10] sm:$0xff]  ;;  %v3548_v52 = vld [vmem:[%s4717_s2 + $0x168] sm:$0xff]  }
  0x34   : > { %3210 = vmatprep.subr.bf16.mxu0 %v3520_v16  ;;  %1098 = vmatprep.mubr.bf16.mxu1 %v707_v42  ;;  %v700_v50 = vcombine.high %v694_v49, %v694_v49  ;;  %v3547_v51 = vld [vmem:[%s4717_s2 + $0x120] sm:$0xff]   ;;  %v3549_v54 = vld [vmem:[%s4717_s2 + $0x128] sm:$0xff]   ;;  %v3550_v55 = vld [vmem:[%s4717_s2 + $0x170] sm:$0xff]   ;;  %v708_v59 = vpack.c.bf16 %v694_v49, %v694_v49 }
  0x35   : > { %3231 = vmatpush3.bf16.msra.mxu1 %v3519_v15  ;;  %v3551_v56 = vld [vmem:[%s4717_s2 + $0x130] sm:$0xff]   ;;  %v3552_v57 = vld [vmem:[%s4717_s2 + $0x178] sm:$0xff]   ;;  %v4198_v60 = vld [vmem:[%s4013_s27] sm:$0xf] }
  0x36   : > { %3232 = vmatprep.subr.bf16.mxu1 %v3522_v18  ;;  %v709_v53 = vpack.c.bf16 %v700_v50, %v700_v50  ;;  %v3553_v58 = vld [vmem:[%s4717_s2 + $0x138] sm:$0xff]   ;;  %v1175_v61 = vrot.slane %v4198_v60, 3  ;;  %v4207_v62 = vld [vmem:[%s4718_s3] sm:$0xff] }
  0x37   : > { %3211 = vmatpush3.bf16.msra.mxu0 %v3521_v17  ;;  %v1024_v0 = vrot.slane %v4207_v62, 2  ;;  %v712_v13 = vrot.slane %v4207_v62, 1 }
  0x38   : > { %3212 = vmatprep.subr.bf16.mxu0 %v3524_v20  ;;  %1183 = vst.msk [vmem:[#allocation2 + $0x8] sm:$0x1] %vm715_vm0, %v1175_v61 }
  0x39   : > { %3233 = vmatpush3.bf16.msra.mxu1 %v3523_v19  ;;  %v714_v19 = vadd.f32 %v712_v13, %v4207_v62 }
  0x3a   : > { %3234 = vmatprep.subr.bf16.mxu1 %v3526_v22 }
  0x3b   : > { %3213 = vmatpush3.bf16.msra.mxu0 %v3525_v21  ;;  %v716_v21 = vsel %vm715_vm0, %v714_v19, 0.0 }
  0x3c   : > { %3214 = vmatprep.subr.bf16.mxu0 %v3528_v24 }
  0x3d   : > { %3235 = vmatpush3.bf16.msra.mxu1 %v3527_v23 }
  0x3e   : > { %3236 = vmatprep.subr.bf16.mxu1 %v3530_v26 }
  0x3f   : > { %3215 = vmatpush3.bf16.msra.mxu0 %v3529_v25 }
  0x40   : > { %3216 = vmatprep.subr.bf16.mxu0 %v3532_v28 }
  0x41   : > { %3237 = vmatpush3.bf16.msra.mxu1 %v3531_v27 }
  0x42   : > { %3238 = vmatprep.subr.bf16.mxu1 %v3534_v30 }
  0x43   : > { %3217 = vmatpush3.bf16.msra.mxu0 %v3533_v29 }
  0x44   : > { %3246 = vmatprep.subr.bf16.mxu0 %v3537_v35  ;;  %v1160_v35 = vlaneseq }
  0x45   : > { %3239 = vmatpush3.bf16.msra.mxu1 %v3536_v33 }
  0x46   : > { %1059 = vmatmul.mubr.bf16.vlgmr.msra.gmra.mrb[0].mxu0 %v704_v34 }
  0x47   : > { %3247 = vmatpush3.bf16.msra.mxu0 %v3539_v39  ;;  %1138 = vmatprep.mubr.bf16.mxu0 %v709_v53  ;;  %v1161_v39 = vshrl.u32 %v1160_v35, 7 }
  0x48   : > { %1099 = vmatmul.mubr.bf16.vlgmr.msra.gmra.mrb[0].mxu1 %v706_v40  ;;  %3248 = vmatprep.subr.bf16.mxu0 %v3540_v41 }
  0x49   : > { %v1162_v41 = vsub.s32 6, %v1161_v39  ;;  %v1167_v42 = vsub.s32 7, %v1161_v39 }
  0x4b   : > { %3249 = vmatpush3.bf16.msra.mxu0 %v3541_v43  ;;  %v1163_v43 = vrot.slane %v4207_v62, %v1162_v41 }
  0x4c   : > { %3250 = vmatprep.subr.bf16.mxu0 %v3542_v44 }
  0x4f   : > { %3251 = vmatpush3.bf16.msra.mxu0 %v3543_v45  ;;  %v1168_v45 = vrot.slane %v4207_v62, %v1167_v42 }
  0x50   : > { %3252 = vmatprep.subr.bf16.mxu0 %v3544_v46 }
  0x53   : > { %3253 = vmatpush3.bf16.msra.mxu0 %v3545_v47 }
  0x54   : > { %3254 = vmatprep.subr.bf16.mxu0 %v3546_v48  ;;  %v730_v48 = vrot.slane %v4207_v62, 6 }
  0x57   : > { %3255 = vmatpush3.bf16.msra.mxu0 %v3547_v51  ;;  %v733_v51 = vrot.slane %v4207_v62, 7 }
  0x58   : > { %3256 = vmatprep.subr.bf16.mxu0 %v3548_v52 }
  0x5b   : > { %3257 = vmatpush3.bf16.msra.mxu0 %v3549_v54 }
  0x5c   : > { %3258 = vmatprep.subr.bf16.mxu0 %v3550_v55 }
  0x5f   : > { %3259 = vmatpush3.bf16.msra.mxu0 %v3551_v56 }
  0x60   : > { %3260 = vmatprep.subr.bf16.mxu0 %v3552_v57 }
  0x63   : > { %3261 = vmatpush3.bf16.msra.mxu0 %v3553_v58 }
  0x66   : > { %1139 = vmatmul.mubr.bf16.vlgmr.msra.gmra.mrb[4].mxu0 %v708_v59 }
 0x119   : > { %v3218_v63 = vpop.f32.mrb[0].mxu0 }
 0x11a   : > { %v3219_v1 = vpop.f32.mrb[1].mxu0 }
 0x11b   : > { %v3220_v2 = vadd.f32 %v3219_v1, %v3218_v63  ;;  %v3221_v3 = vpop.f32.mrb[2].mxu0  ;;  %v3240_v4 = vpop.f32.mrb[0].mxu1 }
 0x11c   : > { %v3222_v5 = vpop.f32.mrb[3].mxu0  ;;  %v3241_v6 = vpop.f32.mrb[1].mxu1 }
 0x11d   : > { %v1061_v7 = vadd.f32 %v3220_v2, %v1024_v0  ;;  %v3242_v8 = vadd.f32 %v3241_v6, %v3240_v4  ;;  %v3243_v9 = vpop.f32.mrb[2].mxu1 }
 0x11e   : > { %v3244_v10 = vpop.f32.mrb[3].mxu1 }
 0x11f   : > { %v1101_v11 = vadd.f32 %v3242_v8, %v1061_v7 }
 0x139   : > { %v3262_v12 = vpop.f32.mrb[4].mxu0 }
 0x13a   : > { %v3263_v14 = vpop.f32.mrb[5].mxu0 }
 0x13b   : > { %v3264_v15 = vadd.f32 %v3263_v14, %v3262_v12  ;;  %v3265_v16 = vpop.f32.mrb[6].mxu0 }
 0x13c   : > { %v3266_v17 = vpop.f32.mrb[7].mxu0 }
 0x13d   : > { %v1141_v18 = vadd.f32 %v3264_v15, %v1101_v11 }
 0x13f   : > { %v1147_v20 = vsel %vm1146_vm1, %v1141_v18, 0.0 }
 0x140   : > { %1148 = vadd.xlane.f32.xlu0 %v1147_v20 }
 0x144   : > { %717 = vadd.xlane.f32.xlu0 %v716_v21 }
 0x1cd   : > { %v1149_v22 = vpop.xlane.xlu0 %1148 }
 0x1ce   : > { %v1150_v23 = vmul.f32 0.03125, %v1149_v22 }
 0x1d0   : > { %v1151_v24 = vsub.f32 %v1141_v18, %v1150_v23 }
 0x1d1   : > { %v718_v25 = vpop.xlane.xlu0 %717 }
 0x1d2   : > { %v720_v26 = vmul.f32 0.03125, %v718_v25  ;;  %v1152_v27 = vmul.f32 %v1151_v24, %v1151_v24 }
 0x1d4   : > { %v721_v28 = vsub.f32 %v714_v19, %v720_v26  ;;  %v1153_v29 = vsel %vm1146_vm1, %v1152_v27, 0.0 }
 0x1d5   : > { %1154 = vadd.xlane.f32.xlu1 %v1153_v29 }
 0x1d6   : > { %v722_v30 = vmul.f32 %v721_v28, %v721_v28 }
 0x1d8   : > { %v723_v31 = vsel %vm715_vm0, %v722_v30, 0.0 }
 0x1d9   : > { %724 = vadd.xlane.f32.xlu1 %v723_v31 }
 0x262   : > { %v1155_v33 = vpop.xlane.xlu1 %1154 }
 0x263   : > { %v1156_v34 = vmul.f32 0.03125, %v1155_v33 }
 0x265   : > { %v1157_v36 = vadd.f32 1e-05, %v1156_v34 }
 0x266   : > { %v725_v37 = vpop.xlane.xlu1 %724 }
 0x267   : > { %3555 = vrsqrt.f32 %v1157_v36  ;;  %v726_v38 = vmul.f32 0.03125, %v725_v37 }
 0x269   : > { %v727_v40 = vadd.f32 1e-05, %v726_v38 }
 0x26b   : > { %3557 = vrsqrt.f32 %v727_v40 }
 0x271   : > { %v3556_v44 = vpop.eup %3555 }
 0x272   : > { %v1159_v46 = vmul.f32 %v3556_v44, %v1151_v24 }
 0x274   : > { %v1164_v47 = vmul.f32 %v1163_v43, %v1159_v46 }
 0x275   : > { %v3558_v49 = vpop.eup %3557 }
 0x276   : > { %v1169_v50 = vadd.f32 %v1168_v45, %v1164_v47  ;;  %v729_v52 = vmul.f32 %v3558_v49, %v721_v28 }
 0x278   : > { %v732_v53 = vmul.f32 %v730_v48, %v729_v52  ;;  %v1172_v54 = vrot.slane %v1169_v50, 7 }
 0x27a   : > { %v735_v55 = vadd.f32 %v733_v51, %v732_v53 }
 0x27c   : > { %v1178_v56 = vsel %vm1177_vm3, %v735_v55, %v1172_v54 }
 0x27d   : > { %v1180_v57 = vsel %vm1179_vm4, %v1178_v56, %v1175_v61 }
 0x27e   : > { %1182 = vst.msk [vmem:[#allocation2] sm:$0xff] %vm1181_vm5, %v1180_v57 }
 0x27f PF: > { %vm1218_vm6 = vcmask 261120   ;;  %v4222_v59 = vld [vmem:[#allocation2 + $0x8] sm:$0x1]  ;;  %vm1222_vm7 = vcmask 253952   ;;  %v3584_v8 = vld [vmem:[%s4023_s25] sm:$0xff]   ;;  %v3849_v9 = vmov 0.0   ;;  %v1247_v15 = vlaneseq }
 0x280   : > { %v1223_v63 = vsel %vm1222_vm7, %v4222_v59, 0.0  ;;  %3324 = vmatprep.subr.bf16.mxu1 %v3849_v9  ;;  %3360 = vmatprep.subr.bf16.mxu0 %v3849_v9  ;;  %v3585_v10 = vld [vmem:[%s4023_s25 + $0x8] sm:$0xff]   ;;  %vm3850_vm8 = vmmov 0   ;;  %v4248_v20 = vld [vmem:[%s4043_s0] sm:$0xff]  ;;  %vm1326_vm9 = vcmask 130048   ;;  %s3851_s0 = smov 96  }
 0x281   : > { %3325 = vmatpush3.bf16.msra.mxu1 %v3584_v8  ;;  %3328 = vmatprep.mubr.msk.bf16.mxu1 %vm3850_vm8, %v3849_v9  ;;  %v4242_v18 = vshrl.u32 %v1247_v15, 7  ;;  %s3852_s25 = smov 80   ;;  %s3853_s27 = smov 112   ;;  %vm4267_vm10 = vmpackc.low %vm1326_vm9, %vm1326_vm9  ;;  %vm1420_vm11 = vcmask 72704   ;;  %vm1424_vm12 = vcmask 65536   ;;  %vm1455_vm13 = vcmask 1040384  }
 0x282   : > { %3326 = vmatprep.subr.bf16.mxu1 %v3849_v9  ;;  %3364 = vmatprep.mubr.msk.bf16.mxu0 %vm3850_vm8, %v3849_v9  ;;  %s3854_s22 = smov 64   ;;  %vm3855_vm14 = vmmov 1   ;;  %vm1539_vm0 = vcmask 1042432   ;;  %s3856_s12 = smov 48   ;;  %vm1544_vm1 = vcmask 35848  }
 0x283   : > { %v4245_v19 = vsub.s32 0, %v4242_v18  ;;  %v4253_v24 = vsub.s32 1, %v4242_v18  ;;  %v1262_v33 = vsub.s32 7, %v4242_v18  ;;  %vm4285_vm15 = vmpackc.low %vm1455_vm13, %vm3855_vm14  ;;  %s3857_s15 = smov 16   ;;  %p3105_p1 = scmp.ne.s32.totalorder %s3830_s16, 2 }
 0x284   : > { %vm2073_vm2 = vcmask (!%p3105_p1), 39944   ;;  %vm2083_vm3 = vcmask (!%p3105_p1), 32776  }
 0x285   : > { %v4220_v58 = vld [vmem:[#allocation2] sm:$0xff]  ;;  %3327 = vmatpush3.bf16.msra.mxu1 %v3585_v10  ;;  %v1250_v23 = vrot.slane %v4248_v20, %v4245_v19  ;;  %v1256_v28 = vrot.slane %v4248_v20, %v4253_v24  ;;  %v1263_v34 = vrot.slane %v4248_v20, %v1262_v33  ;;  %v4276_v49 = vld [vmem:[#allocation3] ss:$0 sm:$0xff] }
 0x286   : > { %v1219_v62 = vsel %vm1218_vm6, %v4220_v58, 0.0 }
 0x287   : > { %1220 = vadd.xlane.f32.xlu0 %v1219_v62 }
 0x28b   : > { %1224 = vadd.xlane.f32.xlu0 %v1223_v63 }
 0x314   : > { %v1221_v0 = vpop.xlane.xlu0 %1220 }
 0x315   : > { %v1227_v60 = vmul.f32 0.03125, %v1221_v0 }
 0x317   : > { %v1229_v61 = vsub.f32 %v4220_v58, %v1227_v60 }
 0x318   : > { %v1225_v1 = vpop.xlane.xlu0 %1224 }
 0x319   : > { %v1228_v2 = vmul.f32 0.03125, %v1225_v1  ;;  %v1231_v3 = vmul.f32 %v1229_v61, %v1229_v61 }
 0x31b   : > { %v1230_v4 = vsub.f32 %v4222_v59, %v1228_v2  ;;  %v1233_v5 = vsel %vm1218_vm6, %v1231_v3, 0.0 }
 0x31c   : > { %1234 = vadd.xlane.f32.xlu1 %v1233_v5 }
 0x31d   : > { %v1232_v6 = vmul.f32 %v1230_v4, %v1230_v4 }
 0x31f   : > { %v1236_v7 = vsel %vm1222_vm7, %v1232_v6, 0.0 }
 0x320   : > { %1237 = vadd.xlane.f32.xlu1 %v1236_v7 }
 0x3a9   : > { %v1235_v11 = vpop.xlane.xlu1 %1234 }
 0x3aa   : > { %v1239_v12 = vmul.f32 0.03125, %v1235_v11 }
 0x3ac   : > { %v1241_v13 = vadd.f32 1e-05, %v1239_v12 }
 0x3ad   : > { %v1238_v14 = vpop.xlane.xlu1 %1237 }
 0x3ae   : > { %3598 = vrsqrt.f32 %v1241_v13  ;;  %v1240_v16 = vmul.f32 0.03125, %v1238_v14 }
 0x3b0   : > { %v1242_v17 = vadd.f32 1e-05, %v1240_v16 }
 0x3b2   : > { %3600 = vrsqrt.f32 %v1242_v17 }
 0x3b8   : > { %v3599_v21 = vpop.eup %3598 }
 0x3b9   : > { %v1245_v22 = vmul.f32 %v3599_v21, %v1229_v61 }
 0x3bb   : > { %v1251_v27 = vmul.f32 %v1250_v23, %v1245_v22 }
 0x3bc   : > { %v3601_v25 = vpop.eup %3600 }
 0x3bd   : > { %v1246_v26 = vmul.f32 %v3601_v25, %v1230_v4  ;;  %v1257_v30 = vadd.f32 %v1256_v28, %v1251_v27 }
 0x3bf   : > { %v1252_v29 = vmul.f32 %v1250_v23, %v1246_v26 }
 0x3c1   : > { %v1258_v31 = vadd.f32 %v1256_v28, %v1252_v29 }
 0x3c3   : > { %v1259_v32 = vpack.c.bf16 %v1258_v31, %v1257_v30 }
 0x3c5   : > { %3329 = vmatmul.mubr.msk.bf16.vlgmr.msra.gmra.mrb[0].mxu1 %vm1218_vm6, %v1259_v32 }
 0x498   : > { %v1313_v35 = vpop.f32.mrb[0].mxu1 }
 0x499   : > { %v1314_v36 = vadd.f32 %v1313_v35, %v1263_v34  ;;  %v3330_v37 = vpop.f32.mrb[1].mxu1 }
 0x49a   : > { %v1316_v38 = vpop.f32.mrb[2].mxu1 }
 0x49b   : > { %v1317_v39 = vadd.f32 %v1316_v38, %v1263_v34  ;;  %v3331_v40 = vpop.f32.mrb[3].mxu1  ;;  %3336 = vmatprep.mubr.msk.f32.mxu1 %vm1326_vm9, %v1314_v36 }
 0x49d   : > { %v4261_v41 = vpack.i.bf16 %v1317_v39, %v1314_v36 }
 0x49f   : > { %3560 = vrot.lane.b32.xlu0 %v4261_v41, %s3851_s0 }
 0x4a3   : > { %3570 = vrot.lane.b32.xlu0 %v4261_v41, %s3852_s25 }
 0x4a7   : > { %1552 = vrot.lane.b32.xlu0 %v1314_v36, %s3853_s27 }
 0x4ab   : > { %1554 = vrot.lane.b32.xlu0 %v1317_v39, %s3853_s27 }
 0x511   : > { %v3561_v42 = vpop.permute.xlu0 %3560 }
 0x512   : > { %v3563_v43 = vunpack.i.h.bf16 %v3561_v42  ;;  %v3562_v44 = vunpack.i.l.bf16 %v3561_v42 }
 0x514   : > { %v3396_v46 = vpack.c.bf16 %v3563_v43, %v3562_v44 }
 0x515   : > { %v3571_v6 = vpop.permute.xlu0 %3570 }
 0x516   : > { %3398 = vmatprep.subr.msk.bf16.mxu1 %vm4267_vm10, %v3396_v46  ;;  %v3573_v8 = vunpack.i.h.bf16 %v3571_v6  ;;  %v3572_v10 = vunpack.i.l.bf16 %v3571_v6 }
 0x517   : > { %3401 = vmatpush3.bf16.xpose.msk.msra.mxu1 %vm4267_vm10, %v3396_v46 }
 0x518   : > { %v3408_v17 = vpack.c.bf16 %v3573_v8, %v3572_v10 }
 0x519   : > { %v1553_v27 = vpop.permute.xlu0 %1552 }
 0x51d   : > { %v1555_v29 = vpop.permute.xlu0 %1554 }
 0x51e   : > { %3337 = vmatmul.mubr.msk.f32.vlgmr.msra.gmra.mrb[4].mxu1 %vm1326_vm9, %v1317_v39 }
 0x5f1   : > { %v3338_v47 = vpop.f32.mrb[4].mxu1 }
 0x5f2   : > { %v1401_v48 = vpop.f32.mrb[5].mxu1  ;;  %v1411_v50 = vmul.f32 0.25, %v3338_v47 }
 0x5f3   : > { %v1410_v51 = vmul.f32 0.25, %v1401_v48 }
 0x5f4   : > { %v1419_v54 = vadd.f32 %v4276_v49, %v1411_v50 }
 0x5f5   : > { %v1418_v52 = vadd.f32 %v4276_v49, %v1410_v51 }
 0x5f6   : > { %v1425_v55 = vsel %vm1424_vm12, %v1419_v54, -inf }
 0x5f7   : > { %v1421_v53 = vsel %vm1420_vm11, %v1418_v52, -inf }
 0x5f8   : > { %1422 = vmax.xlane.f32.xlu1 %v1421_v53 }
 0x5fc   : > { %1426 = vmax.xlane.f32.xlu1 %v1425_v55 }
 0x685   : > { %v1423_v56 = vpop.xlane.xlu1 %1422 }
 0x686   : > { %v1428_v57 = vsub.f32 %v1418_v52, %v1423_v56 }
 0x688   : > { %v1430_v0 = vmul.f32 1.442695, %v1428_v57 }
 0x689   : > { %v1427_v62 = vpop.xlane.xlu1 %1426 }
 0x68a   : > { %v1429_v63 = vsub.f32 %v1419_v54, %v1427_v62 }
 0x68c   : > { %v1432_v60 = vmul.f32 1.442695, %v1429_v63 }
 0x68e   : > { %3602 = vpow2.f32 %v1432_v60 }
 0x68f   : > { %3604 = vpow2.f32 %v1430_v0 }
 0x698   : > { %v3603_v61 = vpop.eup %3602 }
 0x699   : > { %v1437_v1 = vsel %vm1424_vm12, %v3603_v61, 0.0  ;;  %v3605_v2 = vpop.eup %3604 }
 0x69a   : > { %1438 = vadd.xlane.f32.xlu1 %v1437_v1  ;;  %v1434_v3 = vsel %vm1420_vm11, %v3605_v2, 0.0 }
 0x69e   : > { %1435 = vadd.xlane.f32.xlu1 %v1434_v3 }
 0x6af   : > { %3565 = vrot.lane.b32.xlu1 %v4261_v41, %s3854_s22 }
 0x727   : > { %v1439_v4 = vpop.xlane.xlu1 %1438 }
 0x728   : > { %3606 = vrcp.f32 %v1439_v4 }
 0x72b   : > { %v1436_v5 = vpop.xlane.xlu1 %1435 }
 0x72c   : > { %3608 = vrcp.f32 %v1436_v5 }
 0x72f   : > { %v3566_v7 = vpop.permute.xlu1 %3565 }
 0x730   : > { %v3568_v11 = vunpack.i.h.bf16 %v3566_v7  ;;  %v3567_v12 = vunpack.i.l.bf16 %v3566_v7 }
 0x732   : > { %v3607_v14 = vpop.eup %3606  ;;  %v3402_v16 = vpack.c.bf16 %v3568_v11, %v3567_v12 }
 0x733   : > { %v1443_v21 = vmul.f32 %v3607_v14, %v3603_v61 }
 0x734   : > { %3404 = vmatprep.subr.msk.bf16.mxu1 %vm4285_vm15, %v3402_v16 }
 0x735   : > { %3407 = vmatpush3.bf16.msk.msra.mxu1 %vm4285_vm15, %v3402_v16  ;;  %v1541_v25 = vrot.slane %v1443_v21, 5 }
 0x736   : > { %v3609_v22 = vpop.eup %3608  ;;  %3410 = vmatprep.subr.msk.bf16.mxu1 %vm4267_vm10, %v3408_v17 }
 0x737   : > { %v1442_v23 = vmul.f32 %v3609_v22, %v3605_v2  ;;  %v3586_v22 = vld [vmem:[%s4028_s23] sm:$0xff]  }
 0x738   : > { %3361 = vmatpush3.bf16.msra.mxu0 %v3586_v22  ;;  %v3593_v22 = vld [vmem:[%s4038_s21 + $0x18] sm:$0xff]  }
 0x739   : > { %3343 = vmatprep.mubr.msk.f32.mxu1 %vm1420_vm11, %v1442_v23  ;;  %v1540_v26 = vrot.slane %v1442_v23, 5  ;;  %3362 = vmatprep.subr.bf16.mxu0 %v3849_v9  ;;  %v3587_v23 = vld [vmem:[%s4028_s23 + $0x8] sm:$0xff]   ;;  %s3858_s23 = smov (!%p3105_p1), 1  }
 0x73a   : > { %3344 = vmatmul.mubr.msk.f32.vlgmr.msra.gmra.mrb[6].mxu1 %vm1420_vm11, %v1443_v21 }
 0x73b   : > { %v1542_v28 = vsel %vm1539_vm0, %v1540_v26, %v1541_v25  ;;  %3350 = vmatprep.mubr.msk.f32.mxu1 %vm1326_vm9, %v1553_v27 }
 0x73c   : > { %v1545_v56 = vsel %vm1544_vm1, %v1542_v28, 0.0  ;;  %3363 = vmatpush3.bf16.msra.mxu0 %v3587_v23  ;;  %v3594_v23 = vld [vmem:[%s4038_s21 + $0x20] sm:$0xff]  }
 0x73d   : > { %v1546_v62 = vrot.slane %v1545_v56, 4  ;;  %3376 = vmatprep.subr.bf16.mxu0 %v3849_v9 }
 0x73e   : > { %3413 = vmatpush3.bf16.xpose.msk.msra.mxu1 %vm4267_vm10, %v3408_v17 }
 0x73f   : > { %v1547_v60 = vadd.f32 %v1546_v62, %v1545_v56 }
 0x741   : > { %v1548_v3 = vrot.slane %v1547_v60, 2 }
 0x743   : > { %v1549_v7 = vadd.f32 %v1548_v3, %v1547_v60 }
 0x745   : > { %3351 = vmatmul.mubr.msk.f32.vlgmr.msra.gmra.mrb[8].mxu1 %vm1326_vm9, %v1555_v29  ;;  %v1550_v11 = vrot.slane %v1549_v7, 1 }
 0x747   : > { %v1551_v14 = vadd.f32 %v1550_v11, %v1549_v7 }
 0x80d   : > { %v4302_v30 = vpop.f32.mrb[6].mxu1 }
 0x80e   : > { %v4304_v31 = vpop.f32.mrb[7].mxu1 }
 0x818   : > { %v3352_v32 = vpop.f32.mrb[8].mxu1 }
 0x819   : > { %v1644_v33 = vmul.f32 0.25, %v3352_v32  ;;  %v1634_v34 = vpop.f32.mrb[9].mxu1 }
 0x81a   : > { %v1643_v35 = vmul.f32 0.25, %v1634_v34 }
 0x81b   : > { %v1646_v36 = vadd.f32 %v4276_v49, %v1644_v33 }
 0x81c   : > { %v1645_v37 = vadd.f32 %v4276_v49, %v1643_v35 }
 0x81d   : > { %v1650_v38 = vsel %vm1424_vm12, %v1646_v36, -inf }
 0x81e   : > { %1651 = vmax.xlane.f32.xlu0 %v1650_v38  ;;  %v1647_v39 = vsel %vm1420_vm11, %v1645_v37, -inf }
 0x81f   : > { %1648 = vmax.xlane.f32.xlu1 %v1647_v39 }
 0x830   : > { %3575 = vrot.lane.b32.xlu1 %v4261_v41, %s3856_s12 }
 0x8ab   : > { %v1652_v40 = vpop.xlane.xlu0 %1651 }
 0x8ac   : > { %v1654_v42 = vsub.f32 %v1646_v36, %v1652_v40  ;;  %v1649_v43 = vpop.xlane.xlu1 %1648  ;;  %v1788_v36 = vsub.s32 4, %v4242_v18 }
 0x8ad   : > { %v1653_v44 = vsub.f32 %v1645_v37, %v1649_v43 }
 0x8ae   : > { %v1657_v45 = vmul.f32 1.442695, %v1654_v42  ;;  %v1789_v37 = vrot.slane %v4248_v20, %v1788_v36 }
 0x8af   : > { %v1655_v46 = vmul.f32 1.442695, %v1653_v44 }
 0x8b0   : > { %v3576_v47 = vpop.permute.xlu1 %3575 }
 0x8b1   : > { %3610 = vpow2.f32 %v1655_v46  ;;  %v3578_v48 = vunpack.i.h.bf16 %v3576_v47  ;;  %v3577_v50 = vunpack.i.l.bf16 %v3576_v47 }
 0x8b2   : > { %3612 = vpow2.f32 %v1657_v45 }
 0x8b3   : > { %v3414_v49 = vpack.c.bf16 %v3578_v48, %v3577_v50 }
 0x8b5   : > { %3416 = vmatprep.subr.msk.bf16.mxu1 %vm4285_vm15, %v3414_v49 }
 0x8b6   : > { %3419 = vmatpush3.bf16.msk.msra.mxu1 %vm4285_vm15, %v3414_v49 }
 0x8b7   : > { %3368 = vmatprep.subr.bf16.mxu1 %v3849_v9 }
 0x8bb   : > { %v3611_v41 = vpop.eup %3610 }
 0x8bc   : > { %v1659_v51 = vsel %vm1420_vm11, %v3611_v41, 0.0  ;;  %v3613_v52 = vpop.eup %3612 }
 0x8bd   : > { %1660 = vadd.xlane.f32.xlu0 %v1659_v51  ;;  %v1662_v53 = vsel %vm1424_vm12, %v3613_v52, 0.0 }
 0x8c1   : > { %1663 = vadd.xlane.f32.xlu0 %v1662_v53 }
 0x94a   : > { %v1661_v54 = vpop.xlane.xlu0 %1660 }
 0x94b   : > { %3614 = vrcp.f32 %v1661_v54  ;;  %v3588_v54 = vld [vmem:[%s4033_s24] sm:$0xff]  }
 0x94e   : > { %v1664_v55 = vpop.xlane.xlu0 %1663 }
 0x94f   : > { %3616 = vrcp.f32 %v1664_v55  ;;  %v3589_v55 = vld [vmem:[%s4033_s24 + $0x8] sm:$0xff]  }
 0x955   : > { %v3615_v57 = vpop.eup %3614 }
 0x956   : > { %v1667_v63 = vmul.f32 %v3615_v57, %v3611_v41 }
 0x958   : > { %3357 = vmatprep.mubr.msk.f32.mxu1 %vm1420_vm11, %v1667_v63  ;;  %v1763_v2 = vrot.slane %v1667_v63, 5 }
 0x959   : > { %v3617_v0 = vpop.eup %3616 }
 0x95a   : > { %v1668_v61 = vmul.f32 %v3617_v0, %v3613_v52 }
 0x95c   : > { %v1764_v1 = vrot.slane %v1668_v61, 5  ;;  %3358 = vmatmul.mubr.msk.f32.vlgmr.msra.gmra.mrb[10].mxu1 %vm1420_vm11, %v1668_v61  ;;  %v1876_v61 = vsub.s32 2, %v4242_v18 }
 0x95d   : > { %3372 = vmatprep.mubr.msk.bf16.mxu1 %vm3850_vm8, %v3849_v9  ;;  %3369 = vmatpush3.bf16.msra.mxu1 %v3588_v54 }
 0x95e   : > { %v1765_v4 = vsel %vm1539_vm0, %v1763_v2, %v1764_v1  ;;  %3370 = vmatprep.subr.bf16.mxu1 %v3849_v9  ;;  %v1877_v1 = vrot.slane %v4248_v20, %v1876_v61  ;;  %v1882_v2 = vsub.s32 3, %v4242_v18  ;;  %v2072_v61 = vld [vmem:[#allocation3] sm:$0x1] (!%p3105_p1) }
 0x95f   : > { %v1767_v5 = vsel %vm1544_vm1, %v1765_v4, 0.0 }
 0x960   : > { %v1768_v6 = vrot.slane %v1767_v5, 4 }
 0x961   : > { %3371 = vmatpush3.bf16.msra.mxu1 %v3589_v55 }
 0x962   : > { %v1769_v8 = vadd.f32 %v1768_v6, %v1767_v5 }
 0x964   : > { %v1770_v10 = vrot.slane %v1769_v8, 2 }
 0x966   : > { %v1771_v12 = vadd.f32 %v1770_v10, %v1769_v8  ;;  %v1883_v8 = vrot.slane %v4248_v20, %v1882_v2 }
 0x968   : > { %v1772_v13 = vrot.slane %v1771_v12, 1 }
 0x96a   : > { %v1773_v16 = vadd.f32 %v1772_v13, %v1771_v12 }
 0x96c   : > { %v1774_v17 = vadd.f32 %v1773_v16, %v1551_v14  ;;  %v3590_v14 = vld [vmem:[%s4038_s21] sm:$0xff]   ;;  %v3591_v16 = vld [vmem:[%s4038_s21 + $0x8] sm:$0xff]  }
 0x96e   : > { %v4323_v21 = vmul.f32 0.125, %v1774_v17  ;;  %v3592_v17 = vld [vmem:[%s4038_s21 + $0x10] sm:$0xff]  }
 0xa2f   : > { %v3359_v25 = vpop.f32.mrb[10].mxu1 }
 0xa30   : > { %v1748_v26 = vpop.f32.mrb[11].mxu1 }
 0xa31   : > { %v3579_v27 = vpack.i.bf16 %v3359_v25, %v1748_v26  ;;  %v3595_v25 = vld [vmem:[%s4038_s21 + $0x28] sm:$0xff]   ;;  %v3596_v26 = vld [vmem:[%s4038_s21 + $0x30] sm:$0xff]  }
 0xa33   : > { %3580 = vrot.lane.b32.xlu0 %v3579_v27, %s3857_s15  ;;  %v3597_v27 = vld [vmem:[%s4038_s21 + $0x38] sm:$0xff]  }
 0xaa5   : > { %v3581_v28 = vpop.permute.xlu0 %3580 }
 0xaa6   : > { %v3583_v29 = vunpack.i.h.bf16 %v3581_v28  ;;  %v3582_v32 = vunpack.i.l.bf16 %v3581_v28  ;;  %v1889_v28 = vsub.s32 6, %v4242_v18 }
 0xaa8   : > { %v1784_v33 = vsel %vm1326_vm9, %v4302_v30, %v3583_v29  ;;  %v1783_v34 = vsel %vm1326_vm9, %v4304_v31, %v3582_v32  ;;  %v1890_v29 = vrot.slane %v4248_v20, %v1889_v28 }
 0xaa9   : > { %v1785_v35 = vpack.c.bf16 %v1784_v33, %v1783_v34 }
 0xaab   : > { %3365 = vmatmul.mubr.msk.bf16.vlgmr.msra.gmra.mrb[0].mxu0 %vm1218_vm6, %v1785_v35 }
 0xaac   : > { %3392 = vmatprep.mubr.msk.bf16.mxu0 %vm3850_vm8, %v3849_v9  ;;  %3377 = vmatpush3.bf16.msra.mxu0 %v3590_v14 }
 0xaad   : > { %3378 = vmatprep.subr.bf16.mxu0 %v3849_v9 }
 0xab0   : > { %3379 = vmatpush3.bf16.msra.mxu0 %v3591_v16 }
 0xab1   : > { %3380 = vmatprep.subr.bf16.mxu0 %v3849_v9 }
 0xab4   : > { %3381 = vmatpush3.bf16.msra.mxu0 %v3592_v17 }
 0xab5   : > { %3382 = vmatprep.subr.bf16.mxu0 %v3849_v9 }
 0xab8   : > { %3383 = vmatpush3.bf16.msra.mxu0 %v3593_v22 }
 0xab9   : > { %3384 = vmatprep.subr.bf16.mxu0 %v3849_v9 }
 0xabc   : > { %3385 = vmatpush3.bf16.msra.mxu0 %v3594_v23 }
 0xabd   : > { %3386 = vmatprep.subr.bf16.mxu0 %v3849_v9 }
 0xac0   : > { %3387 = vmatpush3.bf16.msra.mxu0 %v3595_v25 }
 0xac1   : > { %3388 = vmatprep.subr.bf16.mxu0 %v3849_v9 }
 0xac4   : > { %3389 = vmatpush3.bf16.msra.mxu0 %v3596_v26 }
 0xac5   : > { %3390 = vmatprep.subr.bf16.mxu0 %v3849_v9 }
 0xac8   : > { %3391 = vmatpush3.bf16.msra.mxu0 %v3597_v27 }
 0xb7e   : > { %v1839_v38 = vpop.f32.mrb[0].mxu0 }
 0xb7f   : > { %v1840_v39 = vadd.f32 %v1839_v38, %v1789_v37  ;;  %v3366_v40 = vpop.f32.mrb[1].mxu0 }
 0xb80   : > { %v1842_v42 = vpop.f32.mrb[2].mxu0 }
 0xb81   : > { %v4339_v43 = vadd.f32 %v1840_v39, %v4220_v58  ;;  %v1843_v30 = vadd.f32 %v1842_v42, %v1789_v37  ;;  %v3367_v44 = vpop.f32.mrb[3].mxu0 }
 0xb83   : > { %v4342_v31 = vadd.f32 %v1843_v30, %v4222_v59  ;;  %v1848_v45 = vsel %vm1218_vm6, %v4339_v43, 0.0 }
 0xb84   : > { %1849 = vadd.xlane.f32.xlu1 %v1848_v45 }
 0xb85   : > { %v1851_v46 = vsel %vm1222_vm7, %v4342_v31, 0.0 }
 0xb86   : > { %1852 = vadd.xlane.f32.xlu0 %v1851_v46 }
 0xc11   : > { %v1850_v47 = vpop.xlane.xlu1 %1849 }
 0xc12   : > { %v1854_v48 = vmul.f32 0.03125, %v1850_v47 }
 0xc13   : > { %v1853_v50 = vpop.xlane.xlu0 %1852 }
 0xc14   : > { %v1856_v58 = vsub.f32 %v4339_v43, %v1854_v48  ;;  %v1855_v49 = vmul.f32 0.03125, %v1853_v50 }
 0xc16   : > { %v1857_v41 = vsub.f32 %v4342_v31, %v1855_v49  ;;  %v1858_v59 = vmul.f32 %v1856_v58, %v1856_v58  ;;  %v2057_v49 = vsub.s32 5, %v4242_v18  ;;  %v2074_v18 = vsel (!%p3105_p1), %vm2073_vm2, %v4323_v21, inf }
 0xc18   : > { %v1860_v51 = vsel %vm1218_vm6, %v1858_v59, 0.0  ;;  %v1859_v52 = vmul.f32 %v1857_v41, %v1857_v41 }
 0xc19   : > { %1861 = vadd.xlane.f32.xlu1 %v1860_v51 }
 0xc1a   : > { %v1863_v53 = vsel %vm1222_vm7, %v1859_v52, 0.0 }
 0xc1b   : > { %1864 = vadd.xlane.f32.xlu0 %v1863_v53 }
 0xc1f   : > { %2075 = vmin.xlane.f32.xlu0 (!%p3105_p1), %v2074_v18 }
 0xca6   : > { %v1862_v56 = vpop.xlane.xlu1 %1861 }
 0xca7   : > { %v1866_v57 = vmul.f32 0.03125, %v1862_v56 }
 0xca8   : > { %v1865_v62 = vpop.xlane.xlu0 %1864 }
 0xca9   : > { %v1868_v63 = vadd.f32 1e-05, %v1866_v57  ;;  %v1867_v0 = vmul.f32 0.03125, %v1865_v62 }
 0xcab   : > { %3618 = vrsqrt.f32 %v1868_v63  ;;  %v1869_v60 = vadd.f32 1e-05, %v1867_v0 }
 0xcac   : > { %v2076_v62 = vpop.xlane.xlu0 (!%p3105_p1), %2075 }
 0xcad   : > { %3620 = vrsqrt.f32 %v1869_v60  ;;  %vm2077_vm4 = vcmp.eq.f32.partialorder (!%p3105_p1), %v4323_v21, %v2076_v62 }
 0xcb5   : > { %v3619_v3 = vpop.eup %3618 }
 0xcb6   : > { %v1872_v4 = vmul.f32 %v3619_v3, %v1856_v58 }
 0xcb7   : > { %v3621_v5 = vpop.eup %3620 }
 0xcb8   : > { %v1878_v6 = vmul.f32 %v1877_v1, %v1872_v4  ;;  %v1873_v7 = vmul.f32 %v3621_v5, %v1857_v41  ;;  %v2058_v41 = vrot.slane %v4248_v20, %v2057_v49  ;;  %v2070_v20 = vand.u32 (!%p3105_p1), 127, %v1247_v15 }
 0xcba   : > { %v1879_v10 = vmul.f32 %v1877_v1, %v1873_v7  ;;  %v1884_v11 = vadd.f32 %v1883_v8, %v1878_v6 }
 0xcbc   : > { %v1885_v12 = vadd.f32 %v1883_v8, %v1879_v10 }
 0xcbe   : > { %v1886_v13 = vpack.c.bf16 %v1885_v12, %v1884_v11 }
 0xcc0   : > { %3373 = vmatmul.mubr.msk.bf16.vlgmr.msra.gmra.mrb[12].mxu1 %vm1218_vm6, %v1886_v13 }
 0xd93   : > { %v1940_v32 = vpop.f32.mrb[12].mxu1 }
 0xd94   : > { %v1941_v33 = vadd.f32 %v1940_v32, %v1890_v29  ;;  %v3374_v34 = vpop.f32.mrb[13].mxu1 }
 0xd95   : > { %v1943_v35 = vpop.f32.mrb[14].mxu1 }
 0xd96   : > { %v3095_v36 = vmul.f32 -1.702, %v1941_v33  ;;  %v1944_v37 = vadd.f32 %v1943_v35, %v1890_v29  ;;  %v3375_v38 = vpop.f32.mrb[15].mxu1 }
 0xd98   : > { %v1951_v39 = vmul.f32 1.442695, %v3095_v36  ;;  %v3096_v40 = vmul.f32 -1.702, %v1944_v37 }
 0xd9a   : > { %3622 = vpow2.f32 %v1951_v39  ;;  %v1953_v42 = vmul.f32 1.442695, %v3096_v40 }
 0xd9c   : > { %3624 = vpow2.f32 %v1953_v42 }
 0xda4   : > { %v3623_v30 = vpop.eup %3622 }
 0xda5   : > { %v1955_v9 = vadd.f32 1.0, %v3623_v30 }
 0xda6   : > { %v3625_v44 = vpop.eup %3624 }
 0xda7   : > { %3626 = vrcp.f32 %v1955_v9  ;;  %v1956_v45 = vadd.f32 1.0, %v3625_v44 }
 0xda9   : > { %3628 = vrcp.f32 %v1956_v45 }
 0xdb1   : > { %v3627_v46 = vpop.eup %3626 }
 0xdb2   : > { %v1961_v48 = vmul.f32 %v3627_v46, %v1941_v33 }
 0xdb3   : > { %v3629_v47 = vpop.eup %3628 }
 0xdb4   : > { %v1962_v50 = vmul.f32 %v3629_v47, %v1944_v37 }
 0xdb6   : > { %v1963_v58 = vpack.c.bf16 %v1962_v50, %v1961_v48 }
 0xdb8   : > { %3393 = vmatmul.mubr.bf16.vlgmr.msra.gmra.mrb[4].mxu0 %v1963_v58 }
 0xe8b   : > { %v2046_v59 = vpop.f32.mrb[4].mxu0 }
 0xe8c   : > { %v2053_v51 = vadd.f32 %v2046_v59, %v4339_v43  ;;  %v3394_v52 = vpop.f32.mrb[5].mxu0  ;;  %2068 = sbr.rel (%p3105_p1) target bundleno = 3990 (0xf96), region = 84  ;;  %v2071_v43 = vcvt.s32.f32 (!%p3105_p1), %v2070_v20 }
 0xe8d   : > { %v2049_v53 = vpop.f32.mrb[6].mxu0 }
 0xe8e   : > { %v2059_v54 = vadd.f32 %v2058_v41, %v2053_v51  ;;  %v2054_v55 = vadd.f32 %v2049_v53, %v4342_v31  ;;  %v3395_v56 = vpop.f32.mrb[7].mxu0  ;;  %2079 = vrot.lane.b32.xlu0 (!%p3105_p1), %v2071_v43, %s3858_s23 }
 0xe90   : > { %2063 = vst.msk [vmem:[#allocation2] sm:$0xff] %vm1218_vm6, %v2059_v54  ;;  %v2060_v57 = vadd.f32 %v2058_v41, %v2054_v55 }
 0xe92   : > { %2064 = vst.msk [vmem:[#allocation2 + $0x8] sm:$0x1] %vm1222_vm7, %v2060_v57 }
 0xf00   : > { %v2080_v31 = vpop.permute.xlu0 %2079 }
 0xf01   : > { %v2082_v63 = vsel %vm2077_vm4, %v2080_v31, 1e+09 }
 0xf02   : > { %v2084_v0 = vsel %vm2083_vm3, %v2082_v63, inf }
 0xf03   : > { %2085 = vmin.xlane.f32.xlu1 %v2084_v0 }
 0xf90   : > { %v2086_v60 = vpop.xlane.xlu1 %2085 }
 0xf91   : > { %v2087_v1 = vadd.f32 1.0, %v2086_v60 }
 0xf93   : > { %vm2088_vm5 = vcmp.eq.f32.partialorder %v2071_v43, %v2087_v1 }
 0xf94   : > { %v2089_v2 = vsel %vm2088_vm5, -1e+30, %v2072_v61 }
 0xf95   : > { %2090 = vst.msk [vmem:[#allocation3] sm:$0x1] %vm1424_vm12, %v2089_v2 }
 0xf96 PF: > { %p3106_p2 = scmp.ne.s32.totalorder %s3830_s16, 3 }
 0xf97   : > { %v3630_v15 = vld [vmem:[%s4724_s9 + $0x4] ss:$8 sps:$4 sm:$0xff] (!%p3106_p2)   ;;  %v3632_v21 = vld [vmem:[%s4724_s9] ss:$8 sps:$4 sm:$0xff] (!%p3106_p2)   ;;  %v3859_v3 = vmov (!%p3106_p2), 0   ;;  %v2101_v10 = vpack.c.bf16 (!%p3106_p2), %v2059_v54, %v2059_v54  ;;  %s4769_s12 = sld [smem:[#allocation21_spill]] (!%p3106_p2) }
 0xf98   : > { %2094 = sbr.rel (%p3106_p2) target bundleno = 4902 (0x1326), region = 88  ;;  %2172 = vmatprep.mubr.bf16.mxu0 (!%p3106_p2), %v3859_v3  ;;  %2140 = vmatprep.subr.bf16.mxu0 (!%p3106_p2), %v3630_v15  ;;  %v3633_v4 = vld [vmem:[%s4724_s9 + $0x14] ss:$8 sps:$4 sm:$0xff] (!%p3106_p2)   ;;  %v3635_v5 = vld [vmem:[%s4724_s9 + $0x10] ss:$8 sps:$4 sm:$0xff] (!%p3106_p2)   ;;  %s4770_s16 = sld [smem:[#allocation20_spill]] (!%p3106_p2) }
 0xf99   : > { %2141 = vmatpush1.bf16.msra.mxu0 (!%p3106_p2), %v3632_v21  ;;  %v3636_v6 = vld [vmem:[%s4725_s10 + $0x4] ss:$8 sps:$4 sm:$0xff] (!%p3106_p2)   ;;  %v3638_v7 = vld [vmem:[%s4725_s10] ss:$8 sps:$4 sm:$0xff] (!%p3106_p2)   ;;  %v3639_v8 = vld [vmem:[%s4725_s10 + $0x14] ss:$8 sps:$4 sm:$0xff] (!%p3106_p2)  }
 0xf9a   : > { %2142 = vmatprep.subr.bf16.mxu0 (!%p3106_p2), %v3633_v4  ;;  %2386 = vmatprep.subr.bf16.mxu1 (!%p3106_p2), %v3636_v6  ;;  %v3641_v11 = vld [vmem:[%s4725_s10 + $0x10] ss:$8 sps:$4 sm:$0xff] (!%p3106_p2)   ;;  %v3642_v12 = vld [vmem:[%s4725_s10 + $0x24] ss:$8 sps:$4 sm:$0xff] (!%p3106_p2)   ;;  %v3644_v13 = vld [vmem:[%s4725_s10 + $0x20] ss:$8 sps:$4 sm:$0xff] (!%p3106_p2)  }
 0xf9b   : > { %2387 = vmatpush1.bf16.msra.mxu1 (!%p3106_p2), %v3638_v7  ;;  %v3645_v14 = vld [vmem:[%s4725_s10 + $0x34] ss:$8 sps:$4 sm:$0xff] (!%p3106_p2)   ;;  %v3647_v16 = vld [vmem:[%s4725_s10 + $0x30] ss:$8 sps:$4 sm:$0xff] (!%p3106_p2)   ;;  %v3648_v17 = vld [vmem:[%s4725_s10 + $0x44] ss:$8 sps:$4 sm:$0xff] (!%p3106_p2)  }
 0xf9c   : > { %2388 = vmatprep.subr.bf16.mxu1 (!%p3106_p2), %v3639_v8  ;;  %v3650_v22 = vld [vmem:[%s4725_s10 + $0x40] ss:$8 sps:$4 sm:$0xff] (!%p3106_p2)   ;;  %v3651_v23 = vld [vmem:[%s4725_s10 + $0x54] ss:$8 sps:$4 sm:$0xff] (!%p3106_p2)   ;;  %v3653_v25 = vld [vmem:[%s4725_s10 + $0x50] ss:$8 sps:$4 sm:$0xff] (!%p3106_p2)  }
 0xf9d   : > { %2143 = vmatpush1.bf16.msra.mxu0 (!%p3106_p2), %v3635_v5  ;;  %v3654_v26 = vld [vmem:[%s4725_s10 + $0x64] ss:$8 sps:$4 sm:$0xff] (!%p3106_p2)   ;;  %v3656_v27 = vld [vmem:[%s4725_s10 + $0x60] ss:$8 sps:$4 sm:$0xff] (!%p3106_p2)   ;;  %v3657_v28 = vld [vmem:[%s4725_s10 + $0x74] ss:$8 sps:$4 sm:$0xff] (!%p3106_p2)  }
 0xf9e   : > { %v3659_v29 = vld [vmem:[%s4725_s10 + $0x70] ss:$8 sps:$4 sm:$0xff] (!%p3106_p2)   ;;  %v3660_v32 = vld [vmem:[%s4725_s10 + $0x84] ss:$8 sps:$4 sm:$0xff] (!%p3106_p2)   ;;  %v3662_v33 = vld [vmem:[%s4725_s10 + $0x80] ss:$8 sps:$4 sm:$0xff] (!%p3106_p2)   ;;  %s4771_s1 = smov (!%p3106_p2), %s4770_s16 }
 0xf9f   : > { %2389 = vmatpush1.bf16.msra.mxu1 %v3641_v11  ;;  %v3663_v34 = vld [vmem:[%s4725_s10 + $0x94] ss:$8 sps:$4 sm:$0xff]   ;;  %v3665_v35 = vld [vmem:[%s4725_s10 + $0x90] ss:$8 sps:$4 sm:$0xff]   ;;  %v3666_v36 = vld [vmem:[%s4725_s10 + $0xa4] ss:$8 sps:$4 sm:$0xff]  }
 0xfa0   : > { %3113 = vmatmul.mubr.msk.bf16.vlgmr.msra.gmra.mrb[0].mxu0 %vm1218_vm6, %v2101_v10  ;;  %2390 = vmatprep.subr.bf16.mxu1 %v3642_v12  ;;  %v3668_v37 = vld [vmem:[%s4725_s10 + $0xa0] ss:$8 sps:$4 sm:$0xff]   ;;  %v3669_v38 = vld [vmem:[%s4725_s10 + $0xb4] ss:$8 sps:$4 sm:$0xff]   ;;  %v3671_v39 = vld [vmem:[%s4725_s10 + $0xb0] ss:$8 sps:$4 sm:$0xff]  }
 0xfa1   : > { %v3672_v40 = vld [vmem:[%s4725_s10 + $0xc4] ss:$8 sps:$4 sm:$0xff]   ;;  %v3674_v42 = vld [vmem:[%s4725_s10 + $0xc0] ss:$8 sps:$4 sm:$0xff]   ;;  %v3675_v30 = vld [vmem:[%s4725_s10 + $0xd4] ss:$8 sps:$4 sm:$0xff]  }
 0xfa2   : > { %v3677_v9 = vld [vmem:[%s4725_s10 + $0xd0] ss:$8 sps:$4 sm:$0xff]   ;;  %v3678_v44 = vld [vmem:[%s4725_s10 + $0xe4] ss:$8 sps:$4 sm:$0xff]   ;;  %v3680_v45 = vld [vmem:[%s4725_s10 + $0xe0] ss:$8 sps:$4 sm:$0xff]  }
 0xfa3   : > { %2391 = vmatpush1.bf16.msra.mxu1 %v3644_v13  ;;  %v3681_v46 = vld [vmem:[%s4725_s10 + $0xf4] ss:$8 sps:$4 sm:$0xff]   ;;  %v3683_v47 = vld [vmem:[%s4725_s10 + $0xf0] ss:$8 sps:$4 sm:$0xff]   ;;  %v3684_v48 = vld [vmem:[%s4726_s11] ss:$8 sps:$4 sm:$0xff]  }
 0xfa4   : > { %2392 = vmatprep.subr.bf16.mxu1 %v3645_v14  ;;  %v3686_v50 = vld [vmem:[%s4726_s11 + $0x4] ss:$8 sps:$4 sm:$0xff]   ;;  %v3689_v58 = vld [vmem:[%s4726_s11 + $0x14] ss:$8 sps:$4 sm:$0xff]   ;;  %v3687_v49 = vld [vmem:[%s4726_s11 + $0x10] ss:$8 sps:$4 sm:$0xff]  }
 0xfa5   : > { %2634 = vmatprep.subr.bf16.mxu0 %v3686_v50  ;;  %v3692_v41 = vld [vmem:[%s4726_s11 + $0x24] ss:$8 sps:$4 sm:$0xff]   ;;  %v3690_v59 = vld [vmem:[%s4726_s11 + $0x20] ss:$8 sps:$4 sm:$0xff]   ;;  %v3695_v51 = vld [vmem:[%s4726_s11 + $0x34] ss:$8 sps:$4 sm:$0xff]  }
 0xfa6   : > { %2635 = vmatpush1.bf16.msra.mxu0 %v3684_v48  ;;  %v3693_v52 = vld [vmem:[%s4726_s11 + $0x30] ss:$8 sps:$4 sm:$0xff]   ;;  %v3698_v53 = vld [vmem:[%s4726_s11 + $0x44] ss:$8 sps:$4 sm:$0xff]   ;;  %v3696_v54 = vld [vmem:[%s4726_s11 + $0x40] ss:$8 sps:$4 sm:$0xff]  }
 0xfa7   : > { %2393 = vmatpush1.bf16.msra.mxu1 %v3647_v16  ;;  %2636 = vmatprep.subr.bf16.mxu0 %v3689_v58  ;;  %v3701_v55 = vld [vmem:[%s4726_s11 + $0x54] ss:$8 sps:$4 sm:$0xff]   ;;  %v3699_v56 = vld [vmem:[%s4726_s11 + $0x50] ss:$8 sps:$4 sm:$0xff]   ;;  %v3704_v57 = vld [vmem:[%s4726_s11 + $0x64] ss:$8 sps:$4 sm:$0xff]  }
 0xfa8   : > { %2394 = vmatprep.subr.bf16.mxu1 %v3648_v17  ;;  %v3702_v18 = vld [vmem:[%s4726_s11 + $0x60] ss:$8 sps:$4 sm:$0xff]   ;;  %v3707_v20 = vld [vmem:[%s4726_s11 + $0x74] ss:$8 sps:$4 sm:$0xff]   ;;  %v3705_v43 = vld [vmem:[%s4726_s11 + $0x70] ss:$8 sps:$4 sm:$0xff]  }
 0xfa9   : > { %v3710_v62 = vld [vmem:[%s4726_s11 + $0x84] ss:$8 sps:$4 sm:$0xff]   ;;  %v3708_v31 = vld [vmem:[%s4726_s11 + $0x80] ss:$8 sps:$4 sm:$0xff]   ;;  %v3713_v63 = vld [vmem:[%s4726_s11 + $0x94] ss:$8 sps:$4 sm:$0xff]  }
 0xfaa   : > { %2637 = vmatpush1.bf16.msra.mxu0 %v3687_v49  ;;  %v3711_v0 = vld [vmem:[%s4726_s11 + $0x90] ss:$8 sps:$4 sm:$0xff]   ;;  %v3716_v60 = vld [vmem:[%s4726_s11 + $0xa4] ss:$8 sps:$4 sm:$0xff]   ;;  %v3714_v61 = vld [vmem:[%s4726_s11 + $0xa0] ss:$8 sps:$4 sm:$0xff]  }
 0xfab   : > { %2395 = vmatpush1.bf16.msra.mxu1 %v3650_v22  ;;  %2638 = vmatprep.subr.bf16.mxu0 %v3692_v41  ;;  %v3719_v1 = vld [vmem:[%s4726_s11 + $0xb4] ss:$8 sps:$4 sm:$0xff]   ;;  %v3717_v2 = vld [vmem:[%s4726_s11 + $0xb0] ss:$8 sps:$4 sm:$0xff]   ;;  %v3722_v15 = vld [vmem:[%s4726_s11 + $0xc4] ss:$8 sps:$4 sm:$0xff]  }
 0xfac   : > { %2396 = vmatprep.subr.bf16.mxu1 %v3651_v23  ;;  %v3720_v21 = vld [vmem:[%s4726_s11 + $0xc0] ss:$8 sps:$4 sm:$0xff]   ;;  %v3725_v3 = vld [vmem:[%s4726_s11 + $0xd4] ss:$8 sps:$4 sm:$0xff]   ;;  %v3723_v4 = vld [vmem:[%s4726_s11 + $0xd0] ss:$8 sps:$4 sm:$0xff]  }
 0xfad   : > { %v2095_v5 = vld [vmem:[%s4769_s12] ss:$4 sm:$0x3]  ;;  %vm2853_vm6 = vcmask 24576  }
 0xfae   : > { %2639 = vmatpush1.bf16.msra.mxu0 %v3690_v59  ;;  %v2130_v6 = vrot.slane %v2095_v5, %v4245_v19  ;;  %v2134_v7 = vrot.slane %v2095_v5, %v4253_v24  ;;  %v3728_v22 = vld [vmem:[%s4726_s11 + $0xe4] ss:$8 sps:$4 sm:$0xff]   ;;  %v3726_v23 = vld [vmem:[%s4726_s11 + $0xe0] ss:$8 sps:$4 sm:$0xff]  }
 0xfaf   : > { %2397 = vmatpush1.bf16.msra.mxu1 %v3653_v25  ;;  %2640 = vmatprep.subr.bf16.mxu0 %v3695_v51  ;;  %v3731_v25 = vld [vmem:[%s4726_s11 + $0xf4] ss:$8 sps:$4 sm:$0xff]  }
 0xfb0   : > { %2398 = vmatprep.subr.bf16.mxu1 %v3654_v26  ;;  %v3729_v26 = vld [vmem:[%s4726_s11 + $0xf0] ss:$8 sps:$4 sm:$0xff]  }
 0xfb1   : > { %v3744_v51 = vld [vmem:[%s4771_s1 + $0x70] sm:$0xff]  }
 0xfb2   : > { %2641 = vmatpush1.bf16.msra.mxu0 %v3693_v52  ;;  %v3745_v52 = vld [vmem:[%s4771_s1 + $0x30] sm:$0xff]  }
 0xfb3   : > { %2399 = vmatpush1.bf16.msra.mxu1 %v3656_v27  ;;  %2642 = vmatprep.subr.bf16.mxu0 %v3698_v53  ;;  %v3732_v27 = vld [vmem:[%s4770_s16 + $0x40] sm:$0xff]   ;;  %v3746_v53 = vld [vmem:[%s4771_s1 + $0x78] sm:$0xff]  }
 0xfb4   : > { %2400 = vmatprep.subr.bf16.mxu1 %v3657_v28  ;;  %v3733_v28 = vld [vmem:[%s4771_s1] sm:$0xff]  }
 0xfb6   : > { %2643 = vmatpush1.bf16.msra.mxu0 %v3696_v54  ;;  %v3747_v54 = vld [vmem:[%s4771_s1 + $0x38] sm:$0xff]  }
 0xfb7   : > { %2401 = vmatpush1.bf16.msra.mxu1 %v3659_v29  ;;  %2644 = vmatprep.subr.bf16.mxu0 %v3701_v55  ;;  %v3734_v29 = vld [vmem:[%s4771_s1 + $0x48] sm:$0xff]   ;;  %v3108_v55 = vld [vmem:[%s4769_s12 + $0x2] ss:$4 sm:$0x3] }
 0xfb8   : > { %2402 = vmatprep.subr.bf16.mxu1 %v3660_v32  ;;  %v3735_v32 = vld [vmem:[%s4771_s1 + $0x8] sm:$0xff]  }
 0xfba   : > { %2645 = vmatpush1.bf16.msra.mxu0 %v3699_v56  ;;  %v2627_v56 = vrot.slane %v3108_v55, %v4245_v19 }
 0xfbb   : > { %2403 = vmatpush1.bf16.msra.mxu1 %v3662_v33  ;;  %2646 = vmatprep.subr.bf16.mxu0 %v3704_v57  ;;  %v3736_v33 = vld [vmem:[%s4771_s1 + $0x50] sm:$0xff]   ;;  %v2631_v57 = vrot.slane %v3108_v55, %v4253_v24 }
 0xfbc   : > { %2404 = vmatprep.subr.bf16.mxu1 %v3663_v34  ;;  %v3737_v34 = vld [vmem:[%s4771_s1 + $0x10] sm:$0xff]  }
 0xfbe   : > { %2647 = vmatpush1.bf16.msra.mxu0 %v3702_v18 }
 0xfbf   : > { %2405 = vmatpush1.bf16.msra.mxu1 %v3665_v35  ;;  %2648 = vmatprep.subr.bf16.mxu0 %v3707_v20  ;;  %v3738_v35 = vld [vmem:[%s4771_s1 + $0x58] sm:$0xff]  }
 0xfc0   : > { %2406 = vmatprep.subr.bf16.mxu1 %v3666_v36  ;;  %v3739_v36 = vld [vmem:[%s4771_s1 + $0x18] sm:$0xff]  }
 0xfc2   : > { %2649 = vmatpush1.bf16.msra.mxu0 %v3705_v43 }
 0xfc3   : > { %2407 = vmatpush1.bf16.msra.mxu1 %v3668_v37  ;;  %2650 = vmatprep.subr.bf16.mxu0 %v3710_v62  ;;  %v3740_v37 = vld [vmem:[%s4771_s1 + $0x60] sm:$0xff]  }
 0xfc4   : > { %2408 = vmatprep.subr.bf16.mxu1 %v3669_v38  ;;  %v3741_v38 = vld [vmem:[%s4771_s1 + $0x20] sm:$0xff]  }
 0xfc6   : > { %2651 = vmatpush1.bf16.msra.mxu0 %v3708_v31 }
 0xfc7   : > { %2409 = vmatpush1.bf16.msra.mxu1 %v3671_v39  ;;  %2652 = vmatprep.subr.bf16.mxu0 %v3713_v63  ;;  %v3742_v39 = vld [vmem:[%s4771_s1 + $0x68] sm:$0xff]  }
 0xfc8   : > { %2410 = vmatprep.subr.bf16.mxu1 %v3672_v40  ;;  %v3743_v40 = vld [vmem:[%s4771_s1 + $0x28] sm:$0xff]  }
 0xfca   : > { %2653 = vmatpush1.bf16.msra.mxu0 %v3711_v0 }
 0xfcb   : > { %2411 = vmatpush1.bf16.msra.mxu1 %v3674_v42  ;;  %2654 = vmatprep.subr.bf16.mxu0 %v3716_v60  ;;  %v3107_v42 = vld [vmem:[%s4769_s12 + $0x1] ss:$4 sm:$0x3] }
 0xfcc   : > { %2412 = vmatprep.subr.bf16.mxu1 %v3675_v30  ;;  %v2379_v30 = vrot.slane %v3107_v42, %v4245_v19  ;;  %v2100_v19 = vld [vmem:[%s4769_s12 + $0x3] sm:$0x1] }
 0xfce   : > { %2655 = vmatpush1.bf16.msra.mxu0 %v3714_v61 }
 0xfcf   : > { %2413 = vmatpush1.bf16.msra.mxu1 %v3677_v9  ;;  %2656 = vmatprep.subr.bf16.mxu0 %v3719_v1  ;;  %v2383_v9 = vrot.slane %v3107_v42, %v4253_v24 }
 0xfd0   : > { %2414 = vmatprep.subr.bf16.mxu1 %v3678_v44 }
 0xfd2   : > { %2657 = vmatpush1.bf16.msra.mxu0 %v3717_v2 }
 0xfd3   : > { %2415 = vmatpush1.bf16.msra.mxu1 %v3680_v45  ;;  %2658 = vmatprep.subr.bf16.mxu0 %v3722_v15 }
 0xfd4   : > { %2416 = vmatprep.subr.bf16.mxu1 %v3681_v46 }
 0xfd6   : > { %2659 = vmatpush1.bf16.msra.mxu0 %v3720_v21 }
 0xfd7   : > { %2417 = vmatpush1.bf16.msra.mxu1 %v3683_v47  ;;  %2660 = vmatprep.subr.bf16.mxu0 %v3725_v3 }
 0xfd8   : > { %3302 = vmatprep.subr.bf16.mxu1 %v3732_v27 }
 0xfda   : > { %2661 = vmatpush1.bf16.msra.mxu0 %v3723_v4 }
 0xfdb   : > { %2662 = vmatprep.subr.bf16.mxu0 %v3728_v22 }
 0xfde   : > { %2663 = vmatpush1.bf16.msra.mxu0 %v3726_v23 }
 0xfdf   : > { %2664 = vmatprep.subr.bf16.mxu0 %v3731_v25 }
 0xfe2   : > { %2665 = vmatpush1.bf16.msra.mxu0 %v3729_v26 }
0x1073   : > { %v2174_v8 = vpop.f32.mrb[0].mxu0 }
0x1074   : > { %v2175_v10 = vadd.f32 %v2174_v8, %v2130_v6  ;;  %v2176_v11 = vpop.f32.mrb[1].mxu0 }
0x1075   : > { %v2178_v12 = vpop.f32.mrb[2].mxu0  ;;  %v2177_v13 = vadd.f32 %v2176_v11, %v2134_v7 }
0x1076   : > { %v2179_v14 = vpop.f32.mrb[3].mxu0  ;;  %v2181_v17 = vpack.c.bf16 %v2175_v10, %v2175_v10 }
0x1077   : > { %v2182_v16 = vpack.c.bf16 %v2177_v13, %v2177_v13 }
0x1079   : > { %2418 = vmatprep.mubr.bf16.mxu1 %v2182_v16 }
0x107a   : > { %2419 = vmatmul.mubr.bf16.vlgmr.msra.gmra.mrb[0].mxu1 %v2181_v17 }
0x107b   : > { %3303 = vmatpush3.bf16.msra.mxu1 %v3733_v28 }
0x107c   : > { %3304 = vmatprep.subr.bf16.mxu1 %v3734_v29 }
0x107f   : > { %3305 = vmatpush3.bf16.msra.mxu1 %v3735_v32 }
0x1080   : > { %3306 = vmatprep.subr.bf16.mxu1 %v3736_v33 }
0x1083   : > { %3307 = vmatpush3.bf16.msra.mxu1 %v3737_v34 }
0x1084   : > { %3308 = vmatprep.subr.bf16.mxu1 %v3738_v35 }
0x1087   : > { %3309 = vmatpush3.bf16.msra.mxu1 %v3739_v36 }
0x1088   : > { %3310 = vmatprep.subr.bf16.mxu1 %v3740_v37 }
0x108b   : > { %3311 = vmatpush3.bf16.msra.mxu1 %v3741_v38 }
0x108c   : > { %3312 = vmatprep.subr.bf16.mxu1 %v3742_v39 }
0x108f   : > { %3313 = vmatpush3.bf16.msra.mxu1 %v3743_v40 }
0x1090   : > { %3314 = vmatprep.subr.bf16.mxu1 %v3744_v51 }
0x1093   : > { %3315 = vmatpush3.bf16.msra.mxu1 %v3745_v52 }
0x1094   : > { %3316 = vmatprep.subr.bf16.mxu1 %v3746_v53 }
0x1097   : > { %3317 = vmatpush3.bf16.msra.mxu1 %v3747_v54 }
0x114d   : > { %v2420_v44 = vpop.f32.mrb[0].mxu1 }
0x114e   : > { %v2421_v45 = vadd.f32 %v2420_v44, %v2379_v30  ;;  %v2422_v46 = vpop.f32.mrb[1].mxu1 }
0x114f   : > { %v2423_v47 = vadd.f32 %v2422_v46, %v2383_v9  ;;  %v2424_v48 = vpop.f32.mrb[2].mxu1 }
0x1150   : > { %v2427_v50 = vmax.f32 %v2421_v45, 0.0  ;;  %v2425_v58 = vpop.f32.mrb[3].mxu1 }
0x1151   : > { %v2428_v49 = vmax.f32 %v2423_v47, 0.0 }
0x1152   : > { %v2429_v59 = vpack.c.bf16 %v2427_v50, %v2427_v50 }
0x1153   : > { %v2430_v41 = vpack.c.bf16 %v2428_v49, %v2428_v49 }
0x1155   : > { %2666 = vmatprep.mubr.bf16.mxu0 %v2430_v41 }
0x1156   : > { %2667 = vmatmul.mubr.bf16.vlgmr.msra.gmra.mrb[4].mxu0 %v2429_v59 }
0x1229   : > { %v2668_v18 = vpop.f32.mrb[4].mxu0 }
0x122a   : > { %v2669_v20 = vadd.f32 %v2668_v18, %v2627_v56  ;;  %v2670_v43 = vpop.f32.mrb[5].mxu0 }
0x122b   : > { %v2671_v62 = vadd.f32 %v2670_v43, %v2631_v57  ;;  %v2672_v31 = vpop.f32.mrb[6].mxu0 }
0x122c   : > { %v2675_v63 = vmax.f32 %v2669_v20, 0.0  ;;  %v2673_v0 = vpop.f32.mrb[7].mxu0 }
0x122d   : > { %v2676_v60 = vmax.f32 %v2671_v62, 0.0 }
0x122e   : > { %v2677_v1 = vpack.c.bf16 %v2675_v63, %v2675_v63 }
0x122f   : > { %v2678_v61 = vpack.c.bf16 %v2676_v60, %v2676_v60 }
0x1231   : > { %2839 = vmatprep.mubr.bf16.mxu1 %v2678_v61 }
0x1232   : > { %2840 = vmatmul.mubr.bf16.vlgmr.msra.gmra.mrb[4].mxu1 %v2677_v1 }
0x1305   : > { %v3318_v2 = vpop.f32.mrb[4].mxu1 }
0x1306   : > { %v3319_v15 = vpop.f32.mrb[5].mxu1 }
0x1307   : > { %v3320_v24 = vadd.f32 %v3319_v15, %v3318_v2  ;;  %v3321_v21 = vpop.f32.mrb[6].mxu1 }
0x1308   : > { %v3322_v3 = vpop.f32.mrb[7].mxu1 }
0x1309   : > { %v2842_v4 = vadd.f32 %v3320_v24, %v2100_v19 }
0x130b   : > { %v3194_v5 = vmul.f32 -1.442695, %v2842_v4 }
0x130d   : > { %3748 = vpow2.f32 %v3194_v5 }
0x1317   : > { %v3749_v6 = vpop.eup %3748 }
0x1318   : > { %v2850_v7 = vadd.f32 1.0, %v3749_v6 }
0x131a   : > { %3750 = vrcp.f32 %v2850_v7 }
0x1324   : > { %v3751_v8 = vpop.eup %3750 }
0x1325   : > { %2854 = vst.msk [vmem:[%s4047_s17] sm:$0x1] %vm2853_vm6, %v3751_v8 }
0x1326 PF: > { %s4772_s0 = sld [smem:[#allocation9_spill]]  ;;  %s2868_s21 = sshll.u32 %s4047_s17, 4  ;;  %s2869_s21 = int_to_ptr.vmem [resolvable:$true] %s2868_s21 }
0x1327   : > { %s4774_s23 = sld [smem:[#allocation22_spill]]  ;;  %s4775_s13 = sand.u32 1, %s3822_s30  }
0x1328   : > { %s2856_s28 = scalar_lea.sflag [#allocation5], %s4775_s13  ;;  %s3752_s18 = scalar_lea.vmem %s2869_s21, 16 }
0x1329   : > { %p3753_p4 = scmp.ne.s32.totalorder %s2869_s21, %s3752_s18  ;;  %s3860_s20 = smov [#allocation4]  }
0x132a   : > { %s3756_s26 = sshll.u32 %s3860_s20, 4  ;;  %s3757_s26 = int_to_ptr.vmem [resolvable:$false] %s3756_s26 }
0x132b   : > { %p3754_p5 = pnand %p3753_p4, %p3985_p3  ;;  %s3758_s19 = scalar_lea.vmem %s3757_s26, 32 }
0x132c   : > { %s3195_s27 = sshll.u32 %s4772_s0, 4  ;;  %p3759_p7 = scmp.lt.s32.totalorder %s2869_s21, %s3757_s26 }
0x132d   : > { %s4665_s24 = scalar_lea.hbm %s4774_s23, %s3195_s27  ;;  %p3755_p6 = pneg %p3754_p5 }
0x132e   : > { %p3760_p8 = scmp.lt.s32.totalorder %s3758_s19, %s3752_s18 }
0x1330   : > { %p3761_p10 = por %p3760_p8, %p3759_p7 }
0x1332   : > { %p3762_p11 = pnand %p3761_p10, %p3755_p6 }
0x1334   : > { %3765 = shalt.err (!%p3762_p11)
}
0x1335   : > { %s3766_s17 = scalar_lea.hbm %s4665_s24, 16  ;;  %s3770_s14 = scalar_lea.hbm %s4774_s23, 32 }
0x1336   : > { %p3767_p12 = scmp.ne.s32.totalorder %s4665_s24, %s3766_s17  ;;  %p3771_p1 = scmp.lt.u32.totalorder %s4665_s24, %s4774_s23 }
0x1337   : > { %p3772_p2 = scmp.lt.u32.totalorder %s3770_s14, %s3766_s17  ;;  %p3774_p5 = scmp.lt.u32.totalorder %s3766_s17, %s4665_s24 }
0x1338   : > { %p3768_p13 = pnand %p3767_p12, %p3985_p3 }
0x1339   : > { %p3773_p4 = por %p3772_p2, %p3771_p1 }
0x133a   : > { %p3769_p0 = pneg %p3768_p13 }
0x133b   : > { %p3775_p6 = por %p3774_p5, %p3773_p4 }
0x133d   : > { %p3776_p7 = pnand %p3775_p6, %p3769_p0 }
0x133f   : > { %3779 = shalt.err (!%p3776_p7)
}
0x1340   : > { %3421 = dma.vmem_to_hbm [thread:$0]  (%p3985_p3), %s2869_s21, 16, %s4665_s24, %s2856_s28  }
0x1341 PF: > { %s4776_s22 = sld [smem:[#allocation12_spill]]  ;;  %s4777_s15 = sld [smem:[#allocation7_spill]] }
0x1347   : > { %p3427_p8 = scmp.ge.s32.totalorder %s4776_s22, 2  ;;  %s2880_s18 = sand.u32 1, %s4777_s15  }
0x1348   : > { %s2881_s20 = scalar_lea.sflag [#allocation5], %s2880_s18 }
0x1349   : > { %p3424_p10 = pnand %p3427_p8, %p3995_p9 }
0x134b   : > { %3813 = dma.done.wait (!%p3424_p10), %s2881_s20, 16  }
0x134c   : > { %3815 = vsyncadd (!%p3424_p10), %s2881_s20, 4294967280  ;;  %s27_s20 = sadd.s32 1, %s4776_s22   ;;  %s4779_s26 = sld [smem:[#allocation8_spill]] }
0x134d   : > { %p24_p11 = scmp.ge.s32.totalorder %s27_s20, 10   ;;  %s4780_s15 = sld [smem:[#allocation17_spill]] }
0x134e   : > { %s4781_s16 = sld [smem:[#allocation10_spill]]  ;;  %s4782_s17 = sld [smem:[#allocation11_spill]] }
0x134f   : > { %s4783_s18 = sld [smem:[#allocation13_spill]]  ;;  %s4784_s19 = sld [smem:[#allocation15_spill]] }
0x1350   : > { %s4785_s29 = smov %s3822_s30  ;;  %26 = sbr.rel (!%p24_p11) target bundleno = 11 (0xb), region = 143 }
0x1352   : > { %s4786_s30 = smov %s4779_s26 }
0x1357   :  { %2885 = vsyncpa [#allocation5], 1 }
0x1358   :  { %2887 = vsyncpa [#allocation5 + $0x1], 1 }

</bundles_post_ra>
